<compile_context>
chip_gen: v7x
topology: tpu7x:2x2x1
jax: 0.10.0
libtpu: 0.0.40
codegen_flags: <defaults>
</compile_context>

<pallas_src>
import jax
import jax.numpy as jnp
from jax.experimental import pallas as pl
from jax.experimental.pallas import tpu as pltpu

# Shapes implied by the module: fc1 expects 1024 = 256*4 features, so the conv
# cascade (L-2-4-6 = L-12) followed by MaxPool1d(2) must yield length 4 => L=20.
EMBED = 16              # embedding_dim (in_channels of conv1)
SEQ = 20                # input length
B = 2                   # batch
K1, K2, K3 = 3, 5, 7
C1, C2, C3 = 64, 128, 256
L1 = SEQ - K1 + 1                       # 18
L2 = L1 - K2 + 1                        # 14
L3 = L2 - K3 + 1                        # 8
LP = L3 // 2                            # 4 pooled positions
NROWS = B * SEQ                         # 40: sample b owns rows [b*SEQ, b*SEQ+SEQ)
XROWS = 48                              # padded input rows  (>= NROWS+K1-1, mult of 8)
SCR_ROWS = 48                           # activation scratch (>= NROWS+K3-1 = 46)
SLAB_W = 256                            # lane width of weight/bias/activation slabs

# Static row offsets inside the packed bf16 weight slab (all multiples of 16,
# i.e. bf16 sublane-tile aligned).
W1_OFF = 0                              # (K1*EMBED, C1) = (48, 64)
W2_OFF = W1_OFF + K1 * EMBED            # (K2*C1,   C2) = (320, 128) @ row 48
W3_OFF = W2_OFF + K2 * C1               # (K3*C2,   C3) = (896, 256) @ row 368
WF2_OFF = W3_OFF + K3 * C2              # (C3,      C2) = (256, 128) @ row 1264
W_ROWS = WF2_OFF + C3                   # 1520 rows total

# Rows of the f32 bias/aux slab.
B1_ROW, B2_ROW, B3_ROW, BF1_ROW, BF2_ROW, BF3_ROW, WF3_ROW = range(7)


def cnn_kernel(x_ref, w_ref, b_ref, wf1_hbm, o_ref, act_ref, wf1_vmem, sem):
    """Whole forward pass for all B samples; everything resident in VMEM."""
    f32 = jnp.float32
    bf16 = jnp.bfloat16

    # Kick off the fc1 weight DMA (largest tensor, not needed until the end) so
    # it overlaps the conv stack.
    wf1_cp = pltpu.make_async_copy(wf1_hbm, wf1_vmem, sem)
    wf1_cp.start()

    # Zero the scratch tail rows once so every shifted window read is deterministic.
    act_ref[NROWS:SCR_ROWS, :] = jnp.zeros((SCR_ROWS - NROWS, SLAB_W), f32)

    def conv_from(src_ref, c_in, k_size, c_out, w_off, b_row):
        """Valid 1-D conv (+bias+ReLU) over the whole batch as K shift-accumulate
        matmuls: tap k's LHS is the (NROWS, c_in) window of src_ref starting at
        row k.  Rows past each sample's valid length are don't-care (finite)."""
        acc = jnp.zeros((NROWS, c_out), f32)
        for k in range(k_size):                                   # K static & tiny
            lhs = src_ref[k:k + NROWS, 0:c_in].astype(bf16)
            wk = w_ref[w_off + k * c_in:w_off + (k + 1) * c_in, 0:c_out]
            acc = acc + jnp.dot(lhs, wk, preferred_element_type=f32)
        bias = b_ref[b_row:b_row + 1, 0:c_out]
        return jnp.maximum(acc + bias, 0.0)                       # (NROWS, c_out) f32

    # conv1 reads its shifted windows straight from the (row-padded) input ref.
    h = conv_from(x_ref, EMBED, K1, C1, W1_OFF, B1_ROW)           # (40, 64)
    act_ref[0:NROWS, 0:C1] = h
    h = conv_from(act_ref, C1, K2, C2, W2_OFF, B2_ROW)            # (40, 128)
    act_ref[0:NROWS, 0:C2] = h
    h = conv_from(act_ref, C2, K3, C3, W3_OFF, B3_ROW)            # (40, 256)
    act_ref[0:NROWS, 0:C3] = h

    # fc1 weights must be resident from here on.
    wf1_cp.wait()

    wf2 = w_ref[WF2_OFF:WF2_OFF + C3, 0:C2]                       # (256, 128) bf16
    bf1 = b_ref[BF1_ROW:BF1_ROW + 1, 0:C3]
    bf2 = b_ref[BF2_ROW:BF2_ROW + 1, 0:C2]
    bf3 = b_ref[BF3_ROW:BF3_ROW + 1, 0:1]
    wf3 = b_ref[WF3_ROW:WF3_ROW + 1, 0:C2]                        # (1, 128) f32

    # Per sample: MaxPool1d(2) fused into fc1's contraction, then fc2, then fc3
    # as a VPU multiply + XLU lane-reduce (N=1 MXU pass would be wasted).
    for b in range(B):
        base = b * SEQ
        f1 = jnp.zeros((1, C3), f32)
        for t in range(LP):
            r = base + 2 * t
            pooled = jnp.maximum(act_ref[r:r + 1, 0:C3],
                                 act_ref[r + 1:r + 2, 0:C3])      # (1, 256) f32
            wt = wf1_vmem[t * C3:(t + 1) * C3, 0:C3]              # (256, 256) bf16
            f1 = f1 + jnp.dot(pooled.astype(bf16), wt,
                              preferred_element_type=f32)
        f1 = jnp.maximum(f1 + bf1, 0.0)                           # (1, 256)
        f2 = jnp.dot(f1.astype(bf16), wf2, preferred_element_type=f32)
        f2 = jnp.maximum(f2 + bf2, 0.0)                           # (1, 128)
        o = jnp.sum(f2 * wf3, axis=-1, keepdims=True) + bf3       # (1, 1)
        o_ref[b:b + 1, :] = o.astype(o_ref.dtype)


def pack_params(params):
    """ONE-TIME repack of PyTorch-layout parameters into the kernel slabs.

    Returns (w_slab bf16 (1520,256), wf1k bf16 (1024,256), bias f32 (8,256)).
    """
    (w1, b1, w2, b2, w3, b3, wf1, bf1, wf2, bf2, wf3, bf3) = params
    assert wf1.shape == (C3, C3 * LP), (
        "fc1(1024, 256) pins the conv stack to seq_len=20 / embedding_dim=16")

    def conv_im2col_w(w):                       # (Co, Ci, K) -> (K*Ci, Co)
        co, ci, k = w.shape
        return jnp.transpose(w, (2, 1, 0)).reshape(k * ci, co)

    slab = jnp.zeros((W_ROWS, SLAB_W), jnp.float32)
    slab = slab.at[W1_OFF:W1_OFF + K1 * EMBED, 0:C1].set(conv_im2col_w(w1))
    slab = slab.at[W2_OFF:W2_OFF + K2 * C1, 0:C2].set(conv_im2col_w(w2))
    slab = slab.at[W3_OFF:W3_OFF + K3 * C2, 0:C3].set(conv_im2col_w(w3))
    slab = slab.at[WF2_OFF:WF2_OFF + C3, 0:C2].set(wf2.T)
    w_slab = slab.astype(jnp.bfloat16)

    # torch flattens (B, 256, 4) channel-major (j = c*LP + t); the kernel
    # accumulates fc1 per pooled position t, so repack to row index t*256 + c.
    wf1k = jnp.transpose(wf1.reshape(C3, C3, LP), (2, 1, 0)) \
              .reshape(LP * C3, C3).astype(jnp.bfloat16)

    bias = jnp.zeros((8, SLAB_W), jnp.float32)
    for row, v in enumerate((b1, b2, b3, bf1, bf2, bf3, wf3[0])):
        bias = bias.at[row, 0:v.shape[0]].set(v)
    return w_slab, wf1k, bias


@jax.jit
def cnn_forward(x_ncw, w_slab, wf1k, bias):
    """x_ncw: (B, EMBED, SEQ) float32 in PyTorch NCW layout. Returns (B, 1) f32."""
    # Only per-call glue: NCW -> (B*SEQ, EMBED) row slab, padded to XROWS rows.
    xt = jnp.transpose(x_ncw, (0, 2, 1)).reshape(B * SEQ, EMBED)
    x_slab = jnp.zeros((XROWS, EMBED), jnp.float32).at[0:B * SEQ, :].set(xt)

    flops = 2 * (K1 * NROWS * EMBED * C1 + K2 * NROWS * C1 * C2
                 + K3 * NROWS * C2 * C3 + B * LP * C3 * C3 + B * C3 * C2 + B * C2)
    bytes_accessed = (x_slab.size * 4 + w_slab.size * 2 + bias.size * 4
                      + wf1k.size * 2 + B * 4)

    return pl.pallas_call(
        cnn_kernel,
        out_shape=jax.ShapeDtypeStruct((B, 1), jnp.float32),
        in_specs=[
            pl.BlockSpec(memory_space=pltpu.MemorySpace.VMEM),    # input slab
            pl.BlockSpec(memory_space=pltpu.MemorySpace.VMEM),    # packed weights
            pl.BlockSpec(memory_space=pltpu.MemorySpace.VMEM),    # biases + fc3 row
            pl.BlockSpec(memory_space=pl.ANY),                    # fc1 weights (manual DMA)
        ],
        out_specs=pl.BlockSpec(memory_space=pltpu.MemorySpace.VMEM),
        scratch_shapes=[
            pltpu.VMEM((SCR_ROWS, SLAB_W), jnp.float32),          # activation scratch
            pltpu.VMEM((LP * C3, C3), jnp.bfloat16),              # fc1 weight landing buf
            pltpu.SemaphoreType.DMA,
        ],
        cost_estimate=pl.CostEstimate(flops=flops, transcendentals=0,
                                      bytes_accessed=bytes_accessed),
    )(x_slab, w_slab, bias, wf1k)


def torch_reference(x_ncw, params):
    """Pure-JAX re-implementation following PyTorch conventions exactly (f32)."""
    w1, b1, w2, b2, w3, b3, wf1, bf1, wf2, bf2, wf3, bf3 = params
    hi = jax.lax.Precision.HIGHEST

    def conv1d(x, w, b):                     # x (B,Ci,L), w (Co,Ci,K), b (Co,)
        K = w.shape[2]
        Lo = x.shape[2] - K + 1
        out = jnp.zeros((x.shape[0], w.shape[0], Lo), jnp.float32) + b[None, :, None]
        for k in range(K):
            out = out + jnp.einsum('bcl,oc->bol', x[:, :, k:k + Lo], w[:, :, k],
                                   precision=hi)
        return out

    h = jax.nn.relu(conv1d(x_ncw, w1, b1))
    h = jax.nn.relu(conv1d(h, w2, b2))
    h = jax.nn.relu(conv1d(h, w3, b3))
    Bn, C, L = h.shape
    h = jnp.max(h.reshape(Bn, C, L // 2, 2), axis=3)   # MaxPool1d(2)
    h = h.reshape(Bn, -1)                              # (B, 1024), channel-major
    h = jax.nn.relu(jnp.dot(h, wf1.T, precision=hi) + bf1)
    h = jax.nn.relu(jnp.dot(h, wf2.T, precision=hi) + bf2)
    return jnp.dot(h, wf3.T, precision=hi) + bf3


if __name__ == "__main__":
    key = jax.random.PRNGKey(0)
    keys = jax.random.split(key, 13)

    def init(k, shape, scale=0.05):
        return scale * jax.random.normal(k, shape, jnp.float32)

    # Deterministic synthetic parameters in PyTorch layouts.
    params = (
        init(keys[1], (C1, EMBED, K1)), init(keys[2], (C1,)),     # conv1
        init(keys[3], (C2, C1, K2)),    init(keys[4], (C2,)),     # conv2
        init(keys[5], (C3, C2, K3)),    init(keys[6], (C3,)),     # conv3
        init(keys[7], (C3, C3 * LP)),   init(keys[8], (C3,)),     # fc1
        init(keys[9], (C2, C3)),        init(keys[10], (C2,)),    # fc2
        init(keys[11], (1, C2)),        init(keys[12], (1,)),     # fc3
    )
    x = jax.random.normal(keys[0], (B, EMBED, SEQ), jnp.float32)  # NCW input

    packed = pack_params(params)            # one-time repack, hoisted out of forward
    out = cnn_forward(x, *packed)
    jax.block_until_ready(out)

    ref = torch_reference(x, params)
    assert out.shape == (B, 1), out.shape
    max_err = float(jnp.max(jnp.abs(out - ref)))
    assert max_err < 2e-2, f"mismatch vs reference: {max_err}"
    print("KERNEL_OK")
</pallas_src>

<mosaic_0001>
module attributes {stable_mosaic.version = 11 : i64} {
  func.func @cnn_kernel(%arg0: memref<48x16xf32, #tpu.memory_space<vmem>>, %arg1: memref<1520x256xbf16, #tpu.memory_space<vmem>>, %arg2: memref<8x256xf32, #tpu.memory_space<vmem>>, %arg3: memref<1024x256xbf16, #tpu.memory_space<any>>, %arg4: memref<2x1xf32, #tpu.memory_space<vmem>>, %arg5: memref<48x256xf32, #tpu.memory_space<vmem>>, %arg6: memref<1024x256xbf16, #tpu.memory_space<vmem>>, %arg7: memref<!tpu.dma_semaphore, #tpu.memory_space<semaphore_mem>>) attributes {dimension_semantics = [], scalar_prefetch = 0 : i64, scratch_operands = 3 : i64, tpu.core_type = #tpu.core_type<tc>} {
    tpu.enqueue_dma source(%arg3 : memref<1024x256xbf16, #tpu.memory_space<any>>) target(%arg6 : memref<1024x256xbf16, #tpu.memory_space<vmem>>) target_semaphore(%arg7 : memref<!tpu.dma_semaphore, #tpu.memory_space<semaphore_mem>>)
    %cst = arith.constant 0.000000e+00 : f32
    %0 = vector.broadcast %cst : f32 to vector<8x256xf32>
    %c40 = arith.constant 40 : index
    %c0 = arith.constant 0 : index
    %1 = vector.load %arg5[%c40, %c0] : memref<48x256xf32, #tpu.memory_space<vmem>>, vector<8x256xf32>
    tpu.vector_store %arg5[%c40, %c0], %0 {strides = array<i32>} : memref<48x256xf32, #tpu.memory_space<vmem>>, vector<8x256xf32>,
    %cst_0 = arith.constant 0.000000e+00 : f32
    %2 = vector.broadcast %cst_0 : f32 to vector<40x64xf32>
    %c0_1 = arith.constant 0 : index
    %c0_2 = arith.constant 0 : index
    %3 = vector.load %arg0[%c0_1, %c0_2] : memref<48x16xf32, #tpu.memory_space<vmem>>, vector<40x16xf32>
    %4 = arith.truncf %3 : vector<40x16xf32> to vector<40x16xbf16>
    %c0_3 = arith.constant 0 : index
    %c0_4 = arith.constant 0 : index
    %5 = vector.load %arg1[%c0_3, %c0_4] : memref<1520x256xbf16, #tpu.memory_space<vmem>>, vector<16x64xbf16>
    %cst_5 = arith.constant dense<0.000000e+00> : vector<40x64xf32>
    %6 = tpu.matmul %4, %5, %cst_5 {dimension_numbers = #tpu.dot_dimension_numbers<[1], [0], [0], [1], [0, 0, 1, 1], [], []>} : vector<40x16xbf16>, vector<16x64xbf16>, vector<40x64xf32> -> vector<40x64xf32>
    %7 = arith.addf %2, %6 : vector<40x64xf32>
    %c1 = arith.constant 1 : index
    %c0_6 = arith.constant 0 : index
    %8 = vector.load %arg0[%c1, %c0_6] : memref<48x16xf32, #tpu.memory_space<vmem>>, vector<40x16xf32>
    %9 = arith.truncf %8 : vector<40x16xf32> to vector<40x16xbf16>
    %c16 = arith.constant 16 : index
    %c0_7 = arith.constant 0 : index
    %10 = vector.load %arg1[%c16, %c0_7] : memref<1520x256xbf16, #tpu.memory_space<vmem>>, vector<16x64xbf16>
    %cst_8 = arith.constant dense<0.000000e+00> : vector<40x64xf32>
    %11 = tpu.matmul %9, %10, %cst_8 {dimension_numbers = #tpu.dot_dimension_numbers<[1], [0], [0], [1], [0, 0, 1, 1], [], []>} : vector<40x16xbf16>, vector<16x64xbf16>, vector<40x64xf32> -> vector<40x64xf32>
    %12 = arith.addf %7, %11 : vector<40x64xf32>
    %c2 = arith.constant 2 : index
    %c0_9 = arith.constant 0 : index
    %13 = vector.load %arg0[%c2, %c0_9] : memref<48x16xf32, #tpu.memory_space<vmem>>, vector<40x16xf32>
    %14 = arith.truncf %13 : vector<40x16xf32> to vector<40x16xbf16>
    %c32 = arith.constant 32 : index
    %c0_10 = arith.constant 0 : index
    %15 = vector.load %arg1[%c32, %c0_10] : memref<1520x256xbf16, #tpu.memory_space<vmem>>, vector<16x64xbf16>
    %cst_11 = arith.constant dense<0.000000e+00> : vector<40x64xf32>
    %16 = tpu.matmul %14, %15, %cst_11 {dimension_numbers = #tpu.dot_dimension_numbers<[1], [0], [0], [1], [0, 0, 1, 1], [], []>} : vector<40x16xbf16>, vector<16x64xbf16>, vector<40x64xf32> -> vector<40x64xf32>
    %17 = arith.addf %12, %16 : vector<40x64xf32>
    %c0_12 = arith.constant 0 : index
    %c0_13 = arith.constant 0 : index
    %18 = vector.load %arg2[%c0_12, %c0_13] : memref<8x256xf32, #tpu.memory_space<vmem>>, vector<1x64xf32>
    %19 = vector.broadcast %18 : vector<1x64xf32> to vector<40x64xf32>
    %20 = arith.addf %17, %19 : vector<40x64xf32>
    %cst_14 = arith.constant 0.000000e+00 : f32
    %21 = vector.broadcast %cst_14 : f32 to vector<40x64xf32>
    %22 = arith.maximumf %20, %21 : vector<40x64xf32>
    %c0_15 = arith.constant 0 : index
    %c0_16 = arith.constant 0 : index
    %23 = vector.load %arg5[%c0_15, %c0_16] : memref<48x256xf32, #tpu.memory_space<vmem>>, vector<40x64xf32>
    tpu.vector_store %arg5[%c0_15, %c0_16], %22 {strides = array<i32>} : memref<48x256xf32, #tpu.memory_space<vmem>>, vector<40x64xf32>,
    %cst_17 = arith.constant 0.000000e+00 : f32
    %24 = vector.broadcast %cst_17 : f32 to vector<40x128xf32>
    %c0_18 = arith.constant 0 : index
    %c0_19 = arith.constant 0 : index
    %25 = vector.load %arg5[%c0_18, %c0_19] : memref<48x256xf32, #tpu.memory_space<vmem>>, vector<40x64xf32>
    %26 = arith.truncf %25 : vector<40x64xf32> to vector<40x64xbf16>
    %c48 = arith.constant 48 : index
    %c0_20 = arith.constant 0 : index
    %27 = vector.load %arg1[%c48, %c0_20] : memref<1520x256xbf16, #tpu.memory_space<vmem>>, vector<64x128xbf16>
    %cst_21 = arith.constant dense<0.000000e+00> : vector<40x128xf32>
    %28 = tpu.matmul %26, %27, %cst_21 {dimension_numbers = #tpu.dot_dimension_numbers<[1], [0], [0], [1], [0, 0, 1, 1], [], []>} : vector<40x64xbf16>, vector<64x128xbf16>, vector<40x128xf32> -> vector<40x128xf32>
    %29 = arith.addf %24, %28 : vector<40x128xf32>
    %c1_22 = arith.constant 1 : index
    %c0_23 = arith.constant 0 : index
    %30 = vector.load %arg5[%c1_22, %c0_23] : memref<48x256xf32, #tpu.memory_space<vmem>>, vector<40x64xf32>
    %31 = arith.truncf %30 : vector<40x64xf32> to vector<40x64xbf16>
    %c112 = arith.constant 112 : index
    %c0_24 = arith.constant 0 : index
    %32 = vector.load %arg1[%c112, %c0_24] : memref<1520x256xbf16, #tpu.memory_space<vmem>>, vector<64x128xbf16>
    %cst_25 = arith.constant dense<0.000000e+00> : vector<40x128xf32>
    %33 = tpu.matmul %31, %32, %cst_25 {dimension_numbers = #tpu.dot_dimension_numbers<[1], [0], [0], [1], [0, 0, 1, 1], [], []>} : vector<40x64xbf16>, vector<64x128xbf16>, vector<40x128xf32> -> vector<40x128xf32>
    %34 = arith.addf %29, %33 : vector<40x128xf32>
    %c2_26 = arith.constant 2 : index
    %c0_27 = arith.constant 0 : index
    %35 = vector.load %arg5[%c2_26, %c0_27] : memref<48x256xf32, #tpu.memory_space<vmem>>, vector<40x64xf32>
    %36 = arith.truncf %35 : vector<40x64xf32> to vector<40x64xbf16>
    %c176 = arith.constant 176 : index
    %c0_28 = arith.constant 0 : index
    %37 = vector.load %arg1[%c176, %c0_28] : memref<1520x256xbf16, #tpu.memory_space<vmem>>, vector<64x128xbf16>
    %cst_29 = arith.constant dense<0.000000e+00> : vector<40x128xf32>
    %38 = tpu.matmul %36, %37, %cst_29 {dimension_numbers = #tpu.dot_dimension_numbers<[1], [0], [0], [1], [0, 0, 1, 1], [], []>} : vector<40x64xbf16>, vector<64x128xbf16>, vector<40x128xf32> -> vector<40x128xf32>
    %39 = arith.addf %34, %38 : vector<40x128xf32>
    %c3 = arith.constant 3 : index
    %c0_30 = arith.constant 0 : index
    %40 = vector.load %arg5[%c3, %c0_30] : memref<48x256xf32, #tpu.memory_space<vmem>>, vector<40x64xf32>
    %41 = arith.truncf %40 : vector<40x64xf32> to vector<40x64xbf16>
    %c240 = arith.constant 240 : index
    %c0_31 = arith.constant 0 : index
    %42 = vector.load %arg1[%c240, %c0_31] : memref<1520x256xbf16, #tpu.memory_space<vmem>>, vector<64x128xbf16>
    %cst_32 = arith.constant dense<0.000000e+00> : vector<40x128xf32>
    %43 = tpu.matmul %41, %42, %cst_32 {dimension_numbers = #tpu.dot_dimension_numbers<[1], [0], [0], [1], [0, 0, 1, 1], [], []>} : vector<40x64xbf16>, vector<64x128xbf16>, vector<40x128xf32> -> vector<40x128xf32>
    %44 = arith.addf %39, %43 : vector<40x128xf32>
    %c4 = arith.constant 4 : index
    %c0_33 = arith.constant 0 : index
    %45 = vector.load %arg5[%c4, %c0_33] : memref<48x256xf32, #tpu.memory_space<vmem>>, vector<40x64xf32>
    %46 = arith.truncf %45 : vector<40x64xf32> to vector<40x64xbf16>
    %c304 = arith.constant 304 : index
    %c0_34 = arith.constant 0 : index
    %47 = vector.load %arg1[%c304, %c0_34] : memref<1520x256xbf16, #tpu.memory_space<vmem>>, vector<64x128xbf16>
    %cst_35 = arith.constant dense<0.000000e+00> : vector<40x128xf32>
    %48 = tpu.matmul %46, %47, %cst_35 {dimension_numbers = #tpu.dot_dimension_numbers<[1], [0], [0], [1], [0, 0, 1, 1], [], []>} : vector<40x64xbf16>, vector<64x128xbf16>, vector<40x128xf32> -> vector<40x128xf32>
    %49 = arith.addf %44, %48 : vector<40x128xf32>
    %c1_36 = arith.constant 1 : index
    %c0_37 = arith.constant 0 : index
    %50 = vector.load %arg2[%c1_36, %c0_37] : memref<8x256xf32, #tpu.memory_space<vmem>>, vector<1x128xf32>
    %51 = vector.broadcast %50 : vector<1x128xf32> to vector<40x128xf32>
    %52 = arith.addf %49, %51 : vector<40x128xf32>
    %cst_38 = arith.constant 0.000000e+00 : f32
    %53 = vector.broadcast %cst_38 : f32 to vector<40x128xf32>
    %54 = arith.maximumf %52, %53 : vector<40x128xf32>
    %c0_39 = arith.constant 0 : index
    %c0_40 = arith.constant 0 : index
    %55 = vector.load %arg5[%c0_39, %c0_40] : memref<48x256xf32, #tpu.memory_space<vmem>>, vector<40x128xf32>
    tpu.vector_store %arg5[%c0_39, %c0_40], %54 {strides = array<i32>} : memref<48x256xf32, #tpu.memory_space<vmem>>, vector<40x128xf32>,
    %cst_41 = arith.constant 0.000000e+00 : f32
    %56 = vector.broadcast %cst_41 : f32 to vector<40x256xf32>
    %c0_42 = arith.constant 0 : index
    %c0_43 = arith.constant 0 : index
    %57 = vector.load %arg5[%c0_42, %c0_43] : memref<48x256xf32, #tpu.memory_space<vmem>>, vector<40x128xf32>
    %58 = arith.truncf %57 : vector<40x128xf32> to vector<40x128xbf16>
    %c368 = arith.constant 368 : index
    %c0_44 = arith.constant 0 : index
    %59 = vector.load %arg1[%c368, %c0_44] : memref<1520x256xbf16, #tpu.memory_space<vmem>>, vector<128x256xbf16>
    %cst_45 = arith.constant dense<0.000000e+00> : vector<40x256xf32>
    %60 = tpu.matmul %58, %59, %cst_45 {dimension_numbers = #tpu.dot_dimension_numbers<[1], [0], [0], [1], [0, 0, 1, 1], [], []>} : vector<40x128xbf16>, vector<128x256xbf16>, vector<40x256xf32> -> vector<40x256xf32>
    %61 = arith.addf %56, %60 : vector<40x256xf32>
    %c1_46 = arith.constant 1 : index
    %c0_47 = arith.constant 0 : index
    %62 = vector.load %arg5[%c1_46, %c0_47] : memref<48x256xf32, #tpu.memory_space<vmem>>, vector<40x128xf32>
    %63 = arith.truncf %62 : vector<40x128xf32> to vector<40x128xbf16>
    %c496 = arith.constant 496 : index
    %c0_48 = arith.constant 0 : index
    %64 = vector.load %arg1[%c496, %c0_48] : memref<1520x256xbf16, #tpu.memory_space<vmem>>, vector<128x256xbf16>
    %cst_49 = arith.constant dense<0.000000e+00> : vector<40x256xf32>
    %65 = tpu.matmul %63, %64, %cst_49 {dimension_numbers = #tpu.dot_dimension_numbers<[1], [0], [0], [1], [0, 0, 1, 1], [], []>} : vector<40x128xbf16>, vector<128x256xbf16>, vector<40x256xf32> -> vector<40x256xf32>
    %66 = arith.addf %61, %65 : vector<40x256xf32>
    %c2_50 = arith.constant 2 : index
    %c0_51 = arith.constant 0 : index
    %67 = vector.load %arg5[%c2_50, %c0_51] : memref<48x256xf32, #tpu.memory_space<vmem>>, vector<40x128xf32>
    %68 = arith.truncf %67 : vector<40x128xf32> to vector<40x128xbf16>
    %c624 = arith.constant 624 : index
    %c0_52 = arith.constant 0 : index
    %69 = vector.load %arg1[%c624, %c0_52] : memref<1520x256xbf16, #tpu.memory_space<vmem>>, vector<128x256xbf16>
    %cst_53 = arith.constant dense<0.000000e+00> : vector<40x256xf32>
    %70 = tpu.matmul %68, %69, %cst_53 {dimension_numbers = #tpu.dot_dimension_numbers<[1], [0], [0], [1], [0, 0, 1, 1], [], []>} : vector<40x128xbf16>, vector<128x256xbf16>, vector<40x256xf32> -> vector<40x256xf32>
    %71 = arith.addf %66, %70 : vector<40x256xf32>
    %c3_54 = arith.constant 3 : index
    %c0_55 = arith.constant 0 : index
    %72 = vector.load %arg5[%c3_54, %c0_55] : memref<48x256xf32, #tpu.memory_space<vmem>>, vector<40x128xf32>
    %73 = arith.truncf %72 : vector<40x128xf32> to vector<40x128xbf16>
    %c752 = arith.constant 752 : index
    %c0_56 = arith.constant 0 : index
    %74 = vector.load %arg1[%c752, %c0_56] : memref<1520x256xbf16, #tpu.memory_space<vmem>>, vector<128x256xbf16>
    %cst_57 = arith.constant dense<0.000000e+00> : vector<40x256xf32>
    %75 = tpu.matmul %73, %74, %cst_57 {dimension_numbers = #tpu.dot_dimension_numbers<[1], [0], [0], [1], [0, 0, 1, 1], [], []>} : vector<40x128xbf16>, vector<128x256xbf16>, vector<40x256xf32> -> vector<40x256xf32>
    %76 = arith.addf %71, %75 : vector<40x256xf32>
    %c4_58 = arith.constant 4 : index
    %c0_59 = arith.constant 0 : index
    %77 = vector.load %arg5[%c4_58, %c0_59] : memref<48x256xf32, #tpu.memory_space<vmem>>, vector<40x128xf32>
    %78 = arith.truncf %77 : vector<40x128xf32> to vector<40x128xbf16>
    %c880 = arith.constant 880 : index
    %c0_60 = arith.constant 0 : index
    %79 = vector.load %arg1[%c880, %c0_60] : memref<1520x256xbf16, #tpu.memory_space<vmem>>, vector<128x256xbf16>
    %cst_61 = arith.constant dense<0.000000e+00> : vector<40x256xf32>
    %80 = tpu.matmul %78, %79, %cst_61 {dimension_numbers = #tpu.dot_dimension_numbers<[1], [0], [0], [1], [0, 0, 1, 1], [], []>} : vector<40x128xbf16>, vector<128x256xbf16>, vector<40x256xf32> -> vector<40x256xf32>
    %81 = arith.addf %76, %80 : vector<40x256xf32>
    %c5 = arith.constant 5 : index
    %c0_62 = arith.constant 0 : index
    %82 = vector.load %arg5[%c5, %c0_62] : memref<48x256xf32, #tpu.memory_space<vmem>>, vector<40x128xf32>
    %83 = arith.truncf %82 : vector<40x128xf32> to vector<40x128xbf16>
    %c1008 = arith.constant 1008 : index
    %c0_63 = arith.constant 0 : index
    %84 = vector.load %arg1[%c1008, %c0_63] : memref<1520x256xbf16, #tpu.memory_space<vmem>>, vector<128x256xbf16>
    %cst_64 = arith.constant dense<0.000000e+00> : vector<40x256xf32>
    %85 = tpu.matmul %83, %84, %cst_64 {dimension_numbers = #tpu.dot_dimension_numbers<[1], [0], [0], [1], [0, 0, 1, 1], [], []>} : vector<40x128xbf16>, vector<128x256xbf16>, vector<40x256xf32> -> vector<40x256xf32>
    %86 = arith.addf %81, %85 : vector<40x256xf32>
    %c6 = arith.constant 6 : index
    %c0_65 = arith.constant 0 : index
    %87 = vector.load %arg5[%c6, %c0_65] : memref<48x256xf32, #tpu.memory_space<vmem>>, vector<40x128xf32>
    %88 = arith.truncf %87 : vector<40x128xf32> to vector<40x128xbf16>
    %c1136 = arith.constant 1136 : index
    %c0_66 = arith.constant 0 : index
    %89 = vector.load %arg1[%c1136, %c0_66] : memref<1520x256xbf16, #tpu.memory_space<vmem>>, vector<128x256xbf16>
    %cst_67 = arith.constant dense<0.000000e+00> : vector<40x256xf32>
    %90 = tpu.matmul %88, %89, %cst_67 {dimension_numbers = #tpu.dot_dimension_numbers<[1], [0], [0], [1], [0, 0, 1, 1], [], []>} : vector<40x128xbf16>, vector<128x256xbf16>, vector<40x256xf32> -> vector<40x256xf32>
    %91 = arith.addf %86, %90 : vector<40x256xf32>
    %c2_68 = arith.constant 2 : index
    %c0_69 = arith.constant 0 : index
    %92 = vector.load %arg2[%c2_68, %c0_69] : memref<8x256xf32, #tpu.memory_space<vmem>>, vector<1x256xf32>
    %93 = vector.broadcast %92 : vector<1x256xf32> to vector<40x256xf32>
    %94 = arith.addf %91, %93 : vector<40x256xf32>
    %cst_70 = arith.constant 0.000000e+00 : f32
    %95 = vector.broadcast %cst_70 : f32 to vector<40x256xf32>
    %96 = arith.maximumf %94, %95 : vector<40x256xf32>
    %c0_71 = arith.constant 0 : index
    %c0_72 = arith.constant 0 : index
    %97 = vector.load %arg5[%c0_71, %c0_72] : memref<48x256xf32, #tpu.memory_space<vmem>>, vector<40x256xf32>
    tpu.vector_store %arg5[%c0_71, %c0_72], %96 {strides = array<i32>} : memref<48x256xf32, #tpu.memory_space<vmem>>, vector<40x256xf32>,
    tpu.wait_dma2 semaphore(%arg7 : memref<!tpu.dma_semaphore, #tpu.memory_space<semaphore_mem>>) src(%arg3 : memref<1024x256xbf16, #tpu.memory_space<any>>) dst(%arg6 : memref<1024x256xbf16, #tpu.memory_space<vmem>>)
    %c1264 = arith.constant 1264 : index
    %c0_73 = arith.constant 0 : index
    %98 = vector.load %arg1[%c1264, %c0_73] : memref<1520x256xbf16, #tpu.memory_space<vmem>>, vector<256x128xbf16>
    %c3_74 = arith.constant 3 : index
    %c0_75 = arith.constant 0 : index
    %99 = vector.load %arg2[%c3_74, %c0_75] : memref<8x256xf32, #tpu.memory_space<vmem>>, vector<1x256xf32>
    %c4_76 = arith.constant 4 : index
    %c0_77 = arith.constant 0 : index
    %100 = vector.load %arg2[%c4_76, %c0_77] : memref<8x256xf32, #tpu.memory_space<vmem>>, vector<1x128xf32>
    %c5_78 = arith.constant 5 : index
    %c0_79 = arith.constant 0 : index
    %101 = vector.load %arg2[%c5_78, %c0_79] : memref<8x256xf32, #tpu.memory_space<vmem>>, vector<1x1xf32>
    %c6_80 = arith.constant 6 : index
    %c0_81 = arith.constant 0 : index
    %102 = vector.load %arg2[%c6_80, %c0_81] : memref<8x256xf32, #tpu.memory_space<vmem>>, vector<1x128xf32>
    %cst_82 = arith.constant 0.000000e+00 : f32
    %103 = vector.broadcast %cst_82 : f32 to vector<1x256xf32>
    %c0_83 = arith.constant 0 : index
    %c0_84 = arith.constant 0 : index
    %104 = vector.load %arg5[%c0_83, %c0_84] : memref<48x256xf32, #tpu.memory_space<vmem>>, vector<1x256xf32>
    %c1_85 = arith.constant 1 : index
    %c0_86 = arith.constant 0 : index
    %105 = vector.load %arg5[%c1_85, %c0_86] : memref<48x256xf32, #tpu.memory_space<vmem>>, vector<1x256xf32>
    %106 = arith.maximumf %104, %105 : vector<1x256xf32>
    %c0_87 = arith.constant 0 : index
    %c0_88 = arith.constant 0 : index
    %107 = vector.load %arg6[%c0_87, %c0_88] : memref<1024x256xbf16, #tpu.memory_space<vmem>>, vector<256x256xbf16>
    %108 = arith.truncf %106 : vector<1x256xf32> to vector<1x256xbf16>
    %cst_89 = arith.constant dense<0.000000e+00> : vector<1x256xf32>
    %109 = tpu.matmul %108, %107, %cst_89 {dimension_numbers = #tpu.dot_dimension_numbers<[1], [0], [0], [1], [0, 0, 1, 1], [], []>} : vector<1x256xbf16>, vector<256x256xbf16>, vector<1x256xf32> -> vector<1x256xf32>
    %110 = arith.addf %103, %109 : vector<1x256xf32>
    %c2_90 = arith.constant 2 : index
    %c0_91 = arith.constant 0 : index
    %111 = vector.load %arg5[%c2_90, %c0_91] : memref<48x256xf32, #tpu.memory_space<vmem>>, vector<1x256xf32>
    %c3_92 = arith.constant 3 : index
    %c0_93 = arith.constant 0 : index
    %112 = vector.load %arg5[%c3_92, %c0_93] : memref<48x256xf32, #tpu.memory_space<vmem>>, vector<1x256xf32>
    %113 = arith.maximumf %111, %112 : vector<1x256xf32>
    %c256 = arith.constant 256 : index
    %c0_94 = arith.constant 0 : index
    %114 = vector.load %arg6[%c256, %c0_94] : memref<1024x256xbf16, #tpu.memory_space<vmem>>, vector<256x256xbf16>
    %115 = arith.truncf %113 : vector<1x256xf32> to vector<1x256xbf16>
    %cst_95 = arith.constant dense<0.000000e+00> : vector<1x256xf32>
    %116 = tpu.matmul %115, %114, %cst_95 {dimension_numbers = #tpu.dot_dimension_numbers<[1], [0], [0], [1], [0, 0, 1, 1], [], []>} : vector<1x256xbf16>, vector<256x256xbf16>, vector<1x256xf32> -> vector<1x256xf32>
    %117 = arith.addf %110, %116 : vector<1x256xf32>
    %c4_96 = arith.constant 4 : index
    %c0_97 = arith.constant 0 : index
    %118 = vector.load %arg5[%c4_96, %c0_97] : memref<48x256xf32, #tpu.memory_space<vmem>>, vector<1x256xf32>
    %c5_98 = arith.constant 5 : index
    %c0_99 = arith.constant 0 : index
    %119 = vector.load %arg5[%c5_98, %c0_99] : memref<48x256xf32, #tpu.memory_space<vmem>>, vector<1x256xf32>
    %120 = arith.maximumf %118, %119 : vector<1x256xf32>
    %c512 = arith.constant 512 : index
    %c0_100 = arith.constant 0 : index
    %121 = vector.load %arg6[%c512, %c0_100] : memref<1024x256xbf16, #tpu.memory_space<vmem>>, vector<256x256xbf16>
    %122 = arith.truncf %120 : vector<1x256xf32> to vector<1x256xbf16>
    %cst_101 = arith.constant dense<0.000000e+00> : vector<1x256xf32>
    %123 = tpu.matmul %122, %121, %cst_101 {dimension_numbers = #tpu.dot_dimension_numbers<[1], [0], [0], [1], [0, 0, 1, 1], [], []>} : vector<1x256xbf16>, vector<256x256xbf16>, vector<1x256xf32> -> vector<1x256xf32>
    %124 = arith.addf %117, %123 : vector<1x256xf32>
    %c6_102 = arith.constant 6 : index
    %c0_103 = arith.constant 0 : index
    %125 = vector.load %arg5[%c6_102, %c0_103] : memref<48x256xf32, #tpu.memory_space<vmem>>, vector<1x256xf32>
    %c7 = arith.constant 7 : index
    %c0_104 = arith.constant 0 : index
    %126 = vector.load %arg5[%c7, %c0_104] : memref<48x256xf32, #tpu.memory_space<vmem>>, vector<1x256xf32>
    %127 = arith.maximumf %125, %126 : vector<1x256xf32>
    %c768 = arith.constant 768 : index
    %c0_105 = arith.constant 0 : index
    %128 = vector.load %arg6[%c768, %c0_105] : memref<1024x256xbf16, #tpu.memory_space<vmem>>, vector<256x256xbf16>
    %129 = arith.truncf %127 : vector<1x256xf32> to vector<1x256xbf16>
    %cst_106 = arith.constant dense<0.000000e+00> : vector<1x256xf32>
    %130 = tpu.matmul %129, %128, %cst_106 {dimension_numbers = #tpu.dot_dimension_numbers<[1], [0], [0], [1], [0, 0, 1, 1], [], []>} : vector<1x256xbf16>, vector<256x256xbf16>, vector<1x256xf32> -> vector<1x256xf32>
    %131 = arith.addf %124, %130 : vector<1x256xf32>
    %132 = arith.addf %131, %99 : vector<1x256xf32>
    %cst_107 = arith.constant 0.000000e+00 : f32
    %133 = vector.broadcast %cst_107 : f32 to vector<1x256xf32>
    %134 = arith.maximumf %132, %133 : vector<1x256xf32>
    %135 = arith.truncf %134 : vector<1x256xf32> to vector<1x256xbf16>
    %cst_108 = arith.constant dense<0.000000e+00> : vector<1x128xf32>
    %136 = tpu.matmul %135, %98, %cst_108 {dimension_numbers = #tpu.dot_dimension_numbers<[1], [0], [0], [1], [0, 0, 1, 1], [], []>} : vector<1x256xbf16>, vector<256x128xbf16>, vector<1x128xf32> -> vector<1x128xf32>
    %137 = arith.addf %136, %100 : vector<1x128xf32>
    %cst_109 = arith.constant 0.000000e+00 : f32
    %138 = vector.broadcast %cst_109 : f32 to vector<1x128xf32>
    %139 = arith.maximumf %137, %138 : vector<1x128xf32>
    %140 = arith.mulf %139, %102 : vector<1x128xf32>
    %cst_110 = arith.constant dense<0.000000e+00> : vector<1xf32>
    %141 = vector.multi_reduction <add>, %140, %cst_110 [1] : vector<1x128xf32> to vector<1xf32>
    %142 = vector.shape_cast %141 : vector<1xf32> to vector<1x1xf32>
    %143 = arith.addf %142, %101 : vector<1x1xf32>
    %c0_111 = arith.constant 0 : index
    %c0_112 = arith.constant 0 : index
    %144 = vector.load %arg4[%c0_111, %c0_112] : memref<2x1xf32, #tpu.memory_space<vmem>>, vector<1x1xf32>
    tpu.vector_store %arg4[%c0_111, %c0_112], %143 {strides = array<i32>} : memref<2x1xf32, #tpu.memory_space<vmem>>, vector<1x1xf32>,
    %cst_113 = arith.constant 0.000000e+00 : f32
    %145 = vector.broadcast %cst_113 : f32 to vector<1x256xf32>
    %c20 = arith.constant 20 : index
    %c0_114 = arith.constant 0 : index
    %146 = vector.load %arg5[%c20, %c0_114] : memref<48x256xf32, #tpu.memory_space<vmem>>, vector<1x256xf32>
    %c21 = arith.constant 21 : index
    %c0_115 = arith.constant 0 : index
    %147 = vector.load %arg5[%c21, %c0_115] : memref<48x256xf32, #tpu.memory_space<vmem>>, vector<1x256xf32>
    %148 = arith.maximumf %146, %147 : vector<1x256xf32>
    %c0_116 = arith.constant 0 : index
    %c0_117 = arith.constant 0 : index
    %149 = vector.load %arg6[%c0_116, %c0_117] : memref<1024x256xbf16, #tpu.memory_space<vmem>>, vector<256x256xbf16>
    %150 = arith.truncf %148 : vector<1x256xf32> to vector<1x256xbf16>
    %cst_118 = arith.constant dense<0.000000e+00> : vector<1x256xf32>
    %151 = tpu.matmul %150, %149, %cst_118 {dimension_numbers = #tpu.dot_dimension_numbers<[1], [0], [0], [1], [0, 0, 1, 1], [], []>} : vector<1x256xbf16>, vector<256x256xbf16>, vector<1x256xf32> -> vector<1x256xf32>
    %152 = arith.addf %145, %151 : vector<1x256xf32>
    %c22 = arith.constant 22 : index
    %c0_119 = arith.constant 0 : index
    %153 = vector.load %arg5[%c22, %c0_119] : memref<48x256xf32, #tpu.memory_space<vmem>>, vector<1x256xf32>
    %c23 = arith.constant 23 : index
    %c0_120 = arith.constant 0 : index
    %154 = vector.load %arg5[%c23, %c0_120] : memref<48x256xf32, #tpu.memory_space<vmem>>, vector<1x256xf32>
    %155 = arith.maximumf %153, %154 : vector<1x256xf32>
    %c256_121 = arith.constant 256 : index
    %c0_122 = arith.constant 0 : index
    %156 = vector.load %arg6[%c256_121, %c0_122] : memref<1024x256xbf16, #tpu.memory_space<vmem>>, vector<256x256xbf16>
    %157 = arith.truncf %155 : vector<1x256xf32> to vector<1x256xbf16>
    %cst_123 = arith.constant dense<0.000000e+00> : vector<1x256xf32>
    %158 = tpu.matmul %157, %156, %cst_123 {dimension_numbers = #tpu.dot_dimension_numbers<[1], [0], [0], [1], [0, 0, 1, 1], [], []>} : vector<1x256xbf16>, vector<256x256xbf16>, vector<1x256xf32> -> vector<1x256xf32>
    %159 = arith.addf %152, %158 : vector<1x256xf32>
    %c24 = arith.constant 24 : index
    %c0_124 = arith.constant 0 : index
    %160 = vector.load %arg5[%c24, %c0_124] : memref<48x256xf32, #tpu.memory_space<vmem>>, vector<1x256xf32>
    %c25 = arith.constant 25 : index
    %c0_125 = arith.constant 0 : index
    %161 = vector.load %arg5[%c25, %c0_125] : memref<48x256xf32, #tpu.memory_space<vmem>>, vector<1x256xf32>
    %162 = arith.maximumf %160, %161 : vector<1x256xf32>
    %c512_126 = arith.constant 512 : index
    %c0_127 = arith.constant 0 : index
    %163 = vector.load %arg6[%c512_126, %c0_127] : memref<1024x256xbf16, #tpu.memory_space<vmem>>, vector<256x256xbf16>
    %164 = arith.truncf %162 : vector<1x256xf32> to vector<1x256xbf16>
    %cst_128 = arith.constant dense<0.000000e+00> : vector<1x256xf32>
    %165 = tpu.matmul %164, %163, %cst_128 {dimension_numbers = #tpu.dot_dimension_numbers<[1], [0], [0], [1], [0, 0, 1, 1], [], []>} : vector<1x256xbf16>, vector<256x256xbf16>, vector<1x256xf32> -> vector<1x256xf32>
    %166 = arith.addf %159, %165 : vector<1x256xf32>
    %c26 = arith.constant 26 : index
    %c0_129 = arith.constant 0 : index
    %167 = vector.load %arg5[%c26, %c0_129] : memref<48x256xf32, #tpu.memory_space<vmem>>, vector<1x256xf32>
    %c27 = arith.constant 27 : index
    %c0_130 = arith.constant 0 : index
    %168 = vector.load %arg5[%c27, %c0_130] : memref<48x256xf32, #tpu.memory_space<vmem>>, vector<1x256xf32>
    %169 = arith.maximumf %167, %168 : vector<1x256xf32>
    %c768_131 = arith.constant 768 : index
    %c0_132 = arith.constant 0 : index
    %170 = vector.load %arg6[%c768_131, %c0_132] : memref<1024x256xbf16, #tpu.memory_space<vmem>>, vector<256x256xbf16>
    %171 = arith.truncf %169 : vector<1x256xf32> to vector<1x256xbf16>
    %cst_133 = arith.constant dense<0.000000e+00> : vector<1x256xf32>
    %172 = tpu.matmul %171, %170, %cst_133 {dimension_numbers = #tpu.dot_dimension_numbers<[1], [0], [0], [1], [0, 0, 1, 1], [], []>} : vector<1x256xbf16>, vector<256x256xbf16>, vector<1x256xf32> -> vector<1x256xf32>
    %173 = arith.addf %166, %172 : vector<1x256xf32>
    %174 = arith.addf %173, %99 : vector<1x256xf32>
    %cst_134 = arith.constant 0.000000e+00 : f32
    %175 = vector.broadcast %cst_134 : f32 to vector<1x256xf32>
    %176 = arith.maximumf %174, %175 : vector<1x256xf32>
    %177 = arith.truncf %176 : vector<1x256xf32> to vector<1x256xbf16>
    %cst_135 = arith.constant dense<0.000000e+00> : vector<1x128xf32>
    %178 = tpu.matmul %177, %98, %cst_135 {dimension_numbers = #tpu.dot_dimension_numbers<[1], [0], [0], [1], [0, 0, 1, 1], [], []>} : vector<1x256xbf16>, vector<256x128xbf16>, vector<1x128xf32> -> vector<1x128xf32>
    %179 = arith.addf %178, %100 : vector<1x128xf32>
    %cst_136 = arith.constant 0.000000e+00 : f32
    %180 = vector.broadcast %cst_136 : f32 to vector<1x128xf32>
    %181 = arith.maximumf %179, %180 : vector<1x128xf32>
    %182 = arith.mulf %181, %102 : vector<1x128xf32>
    %cst_137 = arith.constant dense<0.000000e+00> : vector<1xf32>
    %183 = vector.multi_reduction <add>, %182, %cst_137 [1] : vector<1x128xf32> to vector<1xf32>
    %184 = vector.shape_cast %183 : vector<1xf32> to vector<1x1xf32>
    %185 = arith.addf %184, %101 : vector<1x1xf32>
    %c1_138 = arith.constant 1 : index
    %c0_139 = arith.constant 0 : index
    %186 = vector.load %arg4[%c1_138, %c0_139] : memref<2x1xf32, #tpu.memory_space<vmem>>, vector<1x1xf32>
    tpu.vector_store %arg4[%c1_138, %c0_139], %185 {strides = array<i32>} : memref<2x1xf32, #tpu.memory_space<vmem>>, vector<1x1xf32>,
    return
  }
}

</mosaic_0001>

<bundles_post_ra>
// kernel: cnn_forward.1
= control target key start
LH: loop header
LB: loop body
LE: loop exit
PB: predicated region body
PF: predicated region fallthrough
CT: control target
= control target key end

     0   :  { %9 = vsyncpa [#allocation6], 0  ;;  %s3977_s15 = smov [#allocation5]   ;;  %s4989_s0 = inlined_call_operand.vmem [shape: f32[48,16], index: 0, kind: input, shape index: {}]   ;;  %s4990_s1 = inlined_call_operand.hbm [shape: bf16[1520,256], index: 1, kind: input, shape index: {}]   ;;  %s4991_s2 = inlined_call_operand.vmem [shape: f32[8,256], index: 2, kind: input, shape index: {}]   ;;  %s4992_s3 = inlined_call_operand.hbm [shape: bf16[1024,256], index: 3, kind: input, shape index: {}]   ;;  %s4993_s4 = inlined_call_operand.vmem [shape: f32[2,1], index: 4, kind: output, shape index: {}]  }
   0x1   :  { %s17_s16 = sshll.u32 %s3977_s15, 4  ;;  %s3951_s19 = scalar_lea.hbm %s4990_s1, 24320  ;;  %s18_s16 = int_to_ptr.vmem [resolvable:$true] %s17_s16 }
   0x2   :  { %p3952_p0 = scmp.ne.s32.totalorder %s4990_s1, %s3951_s19  ;;  %p3955_p1 = scmp.lt.u32.totalorder %s3951_s19, %s4990_s1 }
   0x4   :  { %p3957_p2 = pnand %p3955_p1, %p3952_p0 }
   0x6   :  { %3960 = shalt.err (!%p3957_p2)
}
   0x7   :  { %s3961_s24 = scalar_lea.vmem %s18_s16, 24320  ;;  %p3966_p4 = scmp.lt.s32.totalorder %s18_s16, %s18_s16 }
   0x8   :  { %p3962_p3 = scmp.ne.s32.totalorder %s18_s16, %s3961_s24  ;;  %p3967_p5 = scmp.lt.s32.totalorder %s3961_s24, %s3961_s24 }
   0xa   :  { %p3968_p6 = por %p3967_p5, %p3966_p4 }
   0xc   :  { %p3969_p7 = pnand %p3968_p6, %p3962_p3 }
   0xe   :  { %3972 = shalt.err (!%p3969_p7)
}
   0xf   :  { %s3978_s25 = smov 128   ;;  %s3979_s26 = smov 8  }
  0x10   :  { %23 = dma.hbm_to_vmem [thread:$0]  %s4990_s1, 24320, %s18_s16, [#allocation6], %s3978_s25, %s3978_s25, %s3979_s26  }
  0x11   :  { %3973 = dma.done.wait [#allocation6], 24320  }
  0x12   :  { %3974 = vsyncadd [#allocation6], 4294942976  ;;  %s34_s29 = sld [smem:[#allocation0]]   ;;  %s3980_s30 = smov 256   ;;  %v3981_v0 = vmov 0.0   ;;  %vm3982_vm0 = vmmov 0  }
  0x13   :  { %46 = sst [smem:[#allocation8]] %s3980_s30  ;;  %3681 = vmatprep.subr.bf16.mxu1 %v3981_v0  ;;  %3545 = vmatprep.mubr.msk.bf16.mxu1 %vm3982_vm0, %v3981_v0  ;;  %s3983_s5 = smov 2   ;;  %vm93_vm1 = vcmask 130048   ;;  %vm327_vm2 = vcmask 523264   ;;  %vm361_vm3 = vsmask.f32 7424 }
  0x14   :  { %48 = sst [smem:[#allocation8 + $0x1]] %s3980_s30  ;;  %3539 = vmatprep.subr.bf16.mxu0 %v3981_v0  ;;  %3541 = vmatprep.mubr.msk.bf16.mxu0 %vm3982_vm0, %v3981_v0  ;;  %s3984_s1 = smov 64   ;;  %vm689_vm4 = vsmask.f32 6400  ;;  %vm577_vm5 = vcmask 1046528   ;;  %vm819_vm6 = vcmask 1045504  }
  0x15   :  { %50 = sst [smem:[#allocation8 + $0x2]] %s3983_s5  ;;  %s3985_s6 = smov [#allocation3]   ;;  %vm1865_vm7 = vsmask.f32 5376  ;;  %vm2063_vm8 = vcmask 1044480  }
  0x16   :  { %52 = sst [smem:[#allocation8 + $0x3]] %s3984_s1  ;;  %s42_s7 = sshll.u32 %s3985_s6, 4  ;;  %s43_s7 = int_to_ptr.vmem [resolvable:$true] %s42_s7 }
  0x17   :  { %54 = sst [smem:[#allocation8 + $0x4]] %s3978_s25  ;;  %s3986_s10 = smov 4  }
  0x18   :  { %56 = sst [smem:[#allocation8 + $0x5]] %s3983_s5  ;;  %s3268_s8 = sshll.u32 %s34_s29, 26 }
  0x19   :  { %58 = sst [smem:[#allocation8 + $0x6]] %s3978_s25  ;;  %s3269_s9 = sadd.s32 134217728, %s3268_s8 }
  0x1a   :  { %60 = sst [smem:[#allocation8 + $0x7]] %s3984_s1  ;;  %s3987_s11 = smov [#allocation4]  }
  0x1b   :  { %62 = sst [smem:[#allocation8 + $0x8]] %s3986_s10  ;;  %s3988_s12 = smov [#allocation7]  }
  0x1c   :  { %64 = dma.general %s4992_s3, 16384, %s43_s7, %s3987_s11, %s3988_s12, [#allocation8], %s3269_s9, 0  }
  0x1d   :  { %65 = vst [vmem:[#allocation2 + $0x50] sm:$0xff] %v3981_v0  ;;  %v3744_v1 = vld [vmem:[#allocation5 + $0x10] ss:$8 sps:$4 sm:$0xff]   ;;  %v3745_v5 = vld [vmem:[#allocation5] ss:$8 sps:$4 sm:$0xff]  }
  0x1e   :  { %v79_v2 = vld [vmem:[%s4989_s0 + $0x11] sm:$0xff]  ;;  %v80_v3 = vld [vmem:[%s4989_s0 + $0x19] sm:$0xff]  ;;  %3682 = vmatpush3.bf16.msra.mxu1 %v3744_v1  ;;  %3540 = vmatpush3.bf16.msra.mxu0 %v3744_v1  ;;  %v77_v6 = vld [vmem:[%s4989_s0 + $0x1] sm:$0xff] }
  0x1f   :  { %v83_v4 = vpack.c.bf16 %v80_v3, %v79_v2  ;;  %3553 = vmatprep.subr.bf16.mxu1 %v3981_v0  ;;  %v78_v7 = vld [vmem:[%s4989_s0 + $0x9] sm:$0xff]  ;;  %3567 = vmatprep.subr.bf16.mxu0 %v3981_v0  ;;  %v81_v10 = vld [vmem:[%s4989_s0 + $0x21] sm:$0xff]  ;;  %v232_v17 = vld [vmem:[%s4989_s0 + $0x12] sm:$0xff] }
  0x20   :  { %v82_v8 = vpack.c.bf16 %v78_v7, %v77_v6  ;;  %v3746_v9 = vld [vmem:[#allocation5 + $0x20] ss:$8 sps:$4 sm:$0xff]   ;;  %v84_v13 = vpack.c.bf16 %v81_v10, %v81_v10  ;;  %v69_v21 = vld [vmem:[%s4989_s0 + $0x10] sm:$0xff]  ;;  %v70_v22 = vld [vmem:[%s4989_s0 + $0x18] sm:$0xff] }
  0x21   :  { %3546 = vmatmul.mubr.msk.bf16.vlgmr.msra.gmra.mrb[0].mxu1 %vm93_vm1, %v83_v4  ;;  %v230_v11 = vld [vmem:[%s4989_s0 + $0x2] sm:$0xff]  ;;  %v231_v12 = vld [vmem:[%s4989_s0 + $0xa] sm:$0xff]  ;;  %v233_v18 = vld [vmem:[%s4989_s0 + $0x1a] sm:$0xff]  ;;  %v73_v24 = vpack.c.bf16 %v70_v22, %v69_v21 }
  0x22   :  { %3554 = vmatpush3.bf16.msra.mxu1 %v3745_v5  ;;  %3549 = vmatprep.mubr.msk.bf16.mxu1 %vm3982_vm0, %v3981_v0  ;;  %v235_v14 = vpack.c.bf16 %v231_v12, %v230_v11  ;;  %v67_v15 = vld [vmem:[%s4989_s0] sm:$0xff]  ;;  %v68_v16 = vld [vmem:[%s4989_s0 + $0x8] sm:$0xff]  ;;  %v236_v20 = vpack.c.bf16 %v233_v18, %v232_v17  ;;  %v3747_v28 = vld [vmem:[#allocation5 + $0x30] ss:$8 sps:$4 sm:$0xff]  }
  0x23   :  { %3542 = vmatmul.mubr.msk.bf16.vlgmr.msra.gmra.mrb[0].mxu0 %vm93_vm1, %v82_v8  ;;  %3581 = vmatprep.subr.bf16.mxu1 %v3981_v0  ;;  %v72_v19 = vpack.c.bf16 %v68_v16, %v67_v15  ;;  %v234_v23 = vld [vmem:[%s4989_s0 + $0x22] sm:$0xff]  ;;  %v3750_v30 = vld [vmem:[#allocation5 + $0x50] ss:$8 sps:$4 sm:$0xff]   ;;  %v316_v55 = vld [vmem:[%s4991_s2] ss:$0 sm:$0xff] }
  0x24   :  { %3568 = vmatpush3.bf16.msra.mxu0 %v3746_v9  ;;  %3569 = vmatprep.mubr.msk.bf16.mxu0 %vm3982_vm0, %v3981_v0  ;;  %v237_v25 = vpack.c.bf16 %v234_v23, %v234_v23  ;;  %v71_v26 = vld [vmem:[%s4989_s0 + $0x20] sm:$0xff]  ;;  %v3749_v32 = vld [vmem:[#allocation5 + $0x70] ss:$8 sps:$4 sm:$0xff]  }
  0x25   :  { %3601 = vmatprep.subr.bf16.mxu0 %v3981_v0  ;;  %v74_v27 = vpack.c.bf16 %v71_v26, %v71_v26  ;;  %v3748_v29 = vld [vmem:[#allocation5 + $0x40] ss:$8 sps:$4 sm:$0xff]   ;;  %v3753_v34 = vld [vmem:[#allocation5 + $0x90] ss:$8 sps:$4 sm:$0xff]  }
  0x26   :  { %v3752_v31 = vld [vmem:[#allocation5 + $0x60] ss:$8 sps:$4 sm:$0xff]  }
  0x27   :  { %v3751_v33 = vld [vmem:[#allocation5 + $0x80] ss:$8 sps:$4 sm:$0xff]  }
  0x28   :  { %v3754_v35 = vld [vmem:[#allocation5 + $0xa0] ss:$8 sps:$4 sm:$0xff]  }
  0x29   :  { %3550 = vmatmul.mubr.msk.bf16.gmra.mrb[4].mxu1 %vm93_vm1, %v84_v13 }
  0x2a   :  { %3555 = vmatprep.mubr.msk.bf16.mxu1 %vm3982_vm0, %v3981_v0 }
  0x2b   :  { %3570 = vmatmul.mubr.msk.bf16.vlgmr.msra.gmra.mrb[4].mxu0 %vm93_vm1, %v235_v14 }
  0x2c   :  { %3573 = vmatprep.mubr.msk.bf16.mxu0 %vm3982_vm0, %v3981_v0  ;;  %3602 = vmatpush3.bf16.msra.mxu0 %v3747_v28 }
  0x2d   :  { %3603 = vmatprep.subr.bf16.mxu0 %v3981_v0 }
  0x30   :  { %3604 = vmatpush3.bf16.msra.mxu0 %v3748_v29 }
  0x31   :  { %3556 = vmatmul.mubr.msk.bf16.vlgmr.msra.gmra.mrb[8].mxu1 %vm93_vm1, %v72_v19  ;;  %3605 = vmatprep.subr.bf16.mxu0 %v3981_v0 }
  0x32   :  { %3559 = vmatprep.mubr.msk.bf16.mxu1 %vm3982_vm0, %v3981_v0  ;;  %3582 = vmatpush3.bf16.msra.mxu1 %v3749_v32 }
  0x33   :  { %3574 = vmatmul.mubr.msk.bf16.gmra.mrb[8].mxu0 %vm93_vm1, %v236_v20  ;;  %3583 = vmatprep.subr.bf16.mxu1 %v3981_v0 }
  0x34   :  { %3577 = vmatprep.mubr.msk.bf16.mxu0 %vm3982_vm0, %v3981_v0  ;;  %3606 = vmatpush3.bf16.msra.mxu0 %v3750_v30 }
  0x35   :  { %3607 = vmatprep.subr.bf16.mxu0 %v3981_v0 }
  0x36   :  { %3584 = vmatpush3.bf16.msra.mxu1 %v3751_v33 }
  0x37   :  { %3585 = vmatprep.subr.bf16.mxu1 %v3981_v0 }
  0x38   :  { %3608 = vmatpush3.bf16.msra.mxu0 %v3752_v31 }
  0x39   :  { %3560 = vmatmul.mubr.msk.bf16.gmra.mrb[12].mxu1 %vm93_vm1, %v73_v24  ;;  %3641 = vmatprep.subr.bf16.mxu0 %v3981_v0 }
  0x3a   :  { %3563 = vmatprep.mubr.msk.bf16.mxu1 %vm3982_vm0, %v3981_v0  ;;  %3586 = vmatpush3.bf16.msra.mxu1 %v3753_v34 }
  0x3b   :  { %3578 = vmatmul.mubr.msk.bf16.gmra.mrb[12].mxu0 %vm93_vm1, %v237_v25  ;;  %3587 = vmatprep.subr.bf16.mxu1 %v3981_v0  ;;  %v3755_v25 = vld [vmem:[#allocation5 + $0xf0] ss:$8 sps:$4 sm:$0xff]  }
  0x3c   :  { %3609 = vmatprep.mubr.msk.bf16.mxu0 %vm3982_vm0, %v3981_v0 }
  0x3e   :  { %3588 = vmatpush3.bf16.msra.mxu1 %v3754_v35  ;;  %v3756_v35 = vld [vmem:[#allocation5 + $0x100] ss:$8 sps:$4 sm:$0xff]  }
  0x3f   :  { %3621 = vmatprep.subr.bf16.mxu1 %v3981_v0 }
  0x41   :  { %3564 = vmatmul.mubr.msk.bf16.gmra.mrb[16].mxu1 %vm93_vm1, %v74_v27 }
  0x42   :  { %3589 = vmatprep.mubr.msk.bf16.mxu1 %vm3982_vm0, %v3981_v0 }
  0xf4   :  { %v145_v36 = vpop.f32.mrb[0].mxu1 }
  0xf5   :  { %v3547_v37 = vpop.f32.mrb[1].mxu1 }
  0xf6   :  { %v148_v38 = vpop.f32.mrb[2].mxu1  ;;  %v137_v39 = vpop.f32.mrb[0].mxu0 }
  0xf7   :  { %v3548_v40 = vpop.f32.mrb[3].mxu1  ;;  %v3543_v41 = vpop.f32.mrb[1].mxu0 }
  0xf8   :  { %v140_v42 = vpop.f32.mrb[2].mxu0  ;;  %v3758_v40 = vld [vmem:[#allocation5 + $0x110] ss:$8 sps:$4 sm:$0xff]  }
  0xf9   :  { %v3544_v43 = vpop.f32.mrb[3].mxu0 }
  0xfc   :  { %v153_v44 = vpop.f32.mrb[4].mxu1 }
  0xfd   :  { %v3551_v45 = vpop.f32.mrb[5].mxu1 }
  0xfe   :  { %v156_v46 = vpop.f32.mrb[6].mxu1  ;;  %v289_v47 = vpop.f32.mrb[4].mxu0 }
  0xff   :  { %v3552_v48 = vpop.f32.mrb[7].mxu1  ;;  %v3571_v49 = vpop.f32.mrb[5].mxu0  ;;  %v350_v46 = vld [vmem:[#allocation2 + $0x50] sm:$0x1] }
 0x100   :  { %v292_v50 = vpop.f32.mrb[6].mxu0 }
 0x101   :  { %v3572_v51 = vpop.f32.mrb[7].mxu0 }
 0x102   :  { %v3757_v51 = vld [vmem:[#allocation5 + $0xb0] ss:$8 sps:$4 sm:$0xff]  }
 0x104   :  { %v208_v52 = vpop.f32.mrb[8].mxu1 }
 0x105   :  { %v209_v53 = vadd.f32 %v208_v52, %v137_v39  ;;  %v3557_v54 = vpop.f32.mrb[9].mxu1 }
 0x106   :  { %v211_v56 = vpop.f32.mrb[10].mxu1  ;;  %v297_v57 = vpop.f32.mrb[8].mxu0 }
 0x107   :  { %v311_v58 = vadd.f32 %v289_v47, %v209_v53  ;;  %v212_v59 = vadd.f32 %v211_v56, %v140_v42  ;;  %v3558_v60 = vpop.f32.mrb[11].mxu1  ;;  %v3575_v61 = vpop.f32.mrb[9].mxu0  ;;  %v3760_v47 = vld [vmem:[#allocation5 + $0x120] ss:$8 sps:$4 sm:$0xff]   ;;  %v678_v56 = vld [vmem:[#allocation2 + $0x50] sm:$0x7] }
 0x108   :  { %v300_v62 = vpop.f32.mrb[10].mxu0  ;;  %v3759_v60 = vld [vmem:[#allocation5 + $0xc0] ss:$8 sps:$4 sm:$0xff]  }
 0x109   :  { %v317_v63 = vadd.f32 %v316_v55, %v311_v58  ;;  %v312_v1 = vadd.f32 %v292_v50, %v212_v59  ;;  %v3576_v2 = vpop.f32.mrb[11].mxu0 }
 0x10b   :  { %v322_v3 = vmax.f32 %v317_v63, 0.0  ;;  %v318_v4 = vadd.f32 %v316_v55, %v312_v1 }
 0x10c   :  { %v216_v5 = vpop.f32.mrb[12].mxu1 }
 0x10d   :  { %328 = vst.msk [vmem:[#allocation2] sm:$0xff] %vm327_vm2, %v322_v3  ;;  %v323_v6 = vmax.f32 %v318_v4, 0.0  ;;  %v217_v7 = vadd.f32 %v216_v5, %v145_v36  ;;  %v3561_v8 = vpop.f32.mrb[13].mxu1 }
 0x10e   :  { %v219_v9 = vpop.f32.mrb[14].mxu1  ;;  %v305_v10 = vpop.f32.mrb[12].mxu0 }
 0x10f   :  { %329 = vst.msk [vmem:[#allocation2 + $0x10] sm:$0xff] %vm327_vm2, %v323_v6  ;;  %v313_v11 = vadd.f32 %v297_v57, %v217_v7  ;;  %v220_v12 = vadd.f32 %v219_v9, %v148_v38  ;;  %v3562_v13 = vpop.f32.mrb[15].mxu1  ;;  %v3579_v14 = vpop.f32.mrb[13].mxu0  ;;  %v3761_v6 = vld [vmem:[#allocation5 + $0xd0] ss:$8 sps:$4 sm:$0xff]  }
 0x110   :  { %v308_v15 = vpop.f32.mrb[14].mxu0 }
 0x111   :  { %v319_v16 = vadd.f32 %v316_v55, %v313_v11  ;;  %v314_v17 = vadd.f32 %v300_v62, %v220_v12  ;;  %v3580_v18 = vpop.f32.mrb[15].mxu0  ;;  %v3762_v12 = vld [vmem:[#allocation5 + $0xe0] ss:$8 sps:$4 sm:$0xff]  }
 0x113   :  { %v324_v19 = vmax.f32 %v319_v16, 0.0  ;;  %v320_v20 = vadd.f32 %v316_v55, %v314_v17 }
 0x114   :  { %v224_v21 = vpop.f32.mrb[16].mxu1  ;;  %v333_v27 = vld [vmem:[#allocation2] sm:$0xff] }
 0x115   :  { %330 = vst.msk [vmem:[#allocation2 + $0x20] sm:$0xff] %vm327_vm2, %v324_v19  ;;  %v325_v22 = vmax.f32 %v320_v20, 0.0  ;;  %v225_v23 = vadd.f32 %v224_v21, %v153_v44  ;;  %v3565_v24 = vpop.f32.mrb[17].mxu1  ;;  %v349_v29 = vld [vmem:[#allocation2] sm:$0xfe] }
 0x116   :  { %v227_v26 = vpop.f32.mrb[18].mxu1  ;;  %v4127_v28 = vld [vmem:[#allocation2 + $0x10] sm:$0xff]  ;;  %v677_v45 = vld [vmem:[#allocation2] sm:$0xf8] }
 0x117   :  { %331 = vst.msk [vmem:[#allocation2 + $0x30] sm:$0xff] %vm327_vm2, %v325_v22  ;;  %v315_v30 = vadd.f32 %v305_v10, %v225_v23  ;;  %v3566_v31 = vpop.f32.mrb[19].mxu1  ;;  %v338_v32 = vpack.c.bf16 %v4127_v28, %v333_v27  ;;  %v351_v33 = vpack.c.bf16 %v4127_v28, %v349_v29  ;;  %v679_v48 = vpack.c.bf16 %v4127_v28, %v677_v45  ;;  %v562_v19 = vld [vmem:[#allocation2] sm:$0xfc]  ;;  %v563_v23 = vld [vmem:[#allocation2 + $0x50] sm:$0x3] }
 0x118   :  { %v564_v20 = vpack.c.bf16 %v4127_v28, %v562_v19  ;;  %v3764_v29 = vld [vmem:[#allocation5 + $0x140] ss:$8 sps:$4 sm:$0xff]   ;;  %v3765_v31 = vld [vmem:[#allocation5 + $0x150] ss:$8 sps:$4 sm:$0xff]  }
 0x119   :  { %v321_v34 = vadd.f32 %v316_v55, %v315_v30  ;;  %3610 = vmatmul.mubr.msk.bf16.vlgmr.msra.gmra.mrb[16].mxu0 %vm327_vm2, %v338_v32  ;;  %v365_v37 = vshll.u32 %v351_v33, 16  ;;  %v363_v43 = vshrl.u32 %v351_v33, 16  ;;  %v691_v57 = vshrl.u32 %v679_v48, 16  ;;  %v3766_v33 = vld [vmem:[#allocation5 + $0x160] ss:$8 sps:$4 sm:$0xff]  }
 0x11a   :  { %3613 = vmatprep.mubr.msk.bf16.mxu0 %vm3982_vm0, %v3981_v0  ;;  %3642 = vmatpush3.bf16.msra.mxu0 %v3755_v25  ;;  %v694_v58 = vshll.u32 %v679_v48, 16  ;;  %v578_v24 = vrot.slane %v564_v20, 1  ;;  %v3763_v25 = vld [vmem:[#allocation5 + $0x130] ss:$8 sps:$4 sm:$0xff]   ;;  %v3770_v45 = vld [vmem:[#allocation5 + $0x200] ss:$8 sps:$4 sm:$0xff]  }
 0x11b   :  { %v326_v36 = vmax.f32 %v321_v34, 0.0  ;;  %3643 = vmatprep.subr.bf16.mxu0 %v3981_v0  ;;  %v367_v42 = vrot.slane %v365_v37, 1  ;;  %v693_v3 = vrot.slane %v691_v57, 1  ;;  %v805_v34 = vld [vmem:[#allocation2] sm:$0xf0] }
 0x11c   :  { %v335_v38 = vld [vmem:[#allocation2 + $0x20] sm:$0xff]  ;;  %v696_v4 = vrot.slane %v694_v58, 2  ;;  %v806_v37 = vld [vmem:[#allocation2 + $0x50] sm:$0xf]  ;;  %v3793_v57 = vld [vmem:[#allocation5 + $0x174] ss:$8 sps:$4 sm:$0xff]  }
 0x11d   :  { %332 = vst.msk [vmem:[#allocation2 + $0x40] sm:$0xff] %vm327_vm2, %v326_v36  ;;  %v368_v49 = vor.u32 %v367_v42, %v363_v43  ;;  %v3778_v48 = vld [vmem:[#allocation5 + $0x224] ss:$8 sps:$4 sm:$0xff]   ;;  %v3989_v58 = vmov 0  }
 0x11e   :  { %v336_v39 = vld [vmem:[#allocation2 + $0x30] sm:$0xff]  ;;  %3644 = vmatpush3.bf16.msra.mxu0 %v3756_v35  ;;  %v697_v11 = vor.u32 %v696_v4, %v693_v3  ;;  %v807_v35 = vpack.c.bf16 %v4127_v28, %v805_v34 }
 0x11f   :  { %v4137_v41 = vpack.c.bf16 %v336_v39, %v335_v38  ;;  %3645 = vmatprep.subr.bf16.mxu0 %v3981_v0  ;;  %v3769_v28 = vld [vmem:[#allocation5 + $0x1f4] ss:$8 sps:$4 sm:$0xff]  }
 0x120   :  { %v820_v38 = vrot.slane %v807_v35, 2 }
 0x121   :  { %3614 = vmatmul.mubr.msk.bf16.gmra.mrb[20].mxu0 %vm327_vm2, %v4137_v41  ;;  %v370_v44 = vshll.u32 %v4137_v41, 16  ;;  %v374_v53 = vshrl.u32 %v4137_v41, 16  ;;  %v579_v22 = vrot.slane %v4137_v41, 1  ;;  %v821_v36 = vrot.slane %v4137_v41, 2  ;;  %v3767_v41 = vld [vmem:[#allocation5 + $0x1f0] ss:$8 sps:$4 sm:$0xff]  }
 0x122   :  { %3617 = vmatprep.mubr.msk.bf16.mxu0 %vm3982_vm0, %v3981_v0  ;;  %3646 = vmatpush3.bf16.msra.mxu0 %v3758_v40 }
 0x123   :  { %v372_v50 = vrot.slane %v370_v44, 1  ;;  %3647 = vmatprep.subr.bf16.mxu0 %v3981_v0  ;;  %v698_v62 = vrot.slane %v374_v53, 1  ;;  %v699_v63 = vrot.slane %v370_v44, 2  ;;  %v580_v26 = vsel %vm577_vm5, %v578_v24, %v579_v22  ;;  %v3772_v44 = vld [vmem:[#allocation5 + $0x204] ss:$8 sps:$4 sm:$0xff]  }
 0x124   :  { %v4147_v52 = vld [vmem:[#allocation2 + $0x40] sm:$0xff]  ;;  %v822_v39 = vsel %vm819_vm6, %v820_v38, %v821_v36 }
 0x125   :  { %v373_v54 = vsel %vm361_vm3, %v368_v49, %v372_v50  ;;  %v352_v55 = vpack.c.bf16 %v350_v46, %v4147_v52  ;;  %v340_v59 = vpack.c.bf16 %v4147_v52, %v4147_v52  ;;  %v680_v1 = vpack.c.bf16 %v678_v56, %v4147_v52  ;;  %v3775_v46 = vld [vmem:[#allocation5 + $0x214] ss:$8 sps:$4 sm:$0xff]   ;;  %v3776_v49 = vld [vmem:[#allocation5 + $0x220] ss:$8 sps:$4 sm:$0xff]  }
 0x126   :  { %3590 = vmatmul.mubr.msk.bf16.vlgmr.msra.gmra.mrb[20].mxu1 %vm327_vm2, %v373_v54  ;;  %3648 = vmatpush3.bf16.msra.mxu0 %v3760_v47  ;;  %v376_v5 = vor.u32 %v374_v53, %v372_v50  ;;  %v700_v7 = vor.u32 %v699_v63, %v698_v62  ;;  %v565_v27 = vpack.c.bf16 %v563_v23, %v4147_v52  ;;  %v3773_v47 = vld [vmem:[#allocation5 + $0x210] ss:$8 sps:$4 sm:$0xff]   ;;  %v3781_v50 = vld [vmem:[#allocation5 + $0x234] ss:$8 sps:$4 sm:$0xff]   ;;  %v3788_v56 = vld [vmem:[#allocation5 + $0x260] ss:$8 sps:$4 sm:$0xff]  }
 0x127   :  { %3622 = vmatpush3.bf16.msra.mxu1 %v3757_v51  ;;  %3593 = vmatprep.mubr.msk.bf16.mxu1 %vm3982_vm0, %v3981_v0  ;;  %v378_v61 = vshll.u32 %v352_v55, 16  ;;  %v703_v8 = vshrl.u32 %v680_v1, 16  ;;  %v706_v9 = vshll.u32 %v680_v1, 16  ;;  %v382_v16 = vshrl.u32 %v352_v55, 16  ;;  %v3784_v51 = vld [vmem:[#allocation5 + $0x244] ss:$8 sps:$4 sm:$0xff]  }
 0x128   :  { %3623 = vmatprep.subr.bf16.mxu1 %v3981_v0  ;;  %v701_v13 = vsel %vm689_vm4, %v697_v11, %v700_v7  ;;  %v581_v30 = vrot.slane %v565_v27, 1  ;;  %v808_v40 = vpack.c.bf16 %v806_v37, %v4147_v52  ;;  %1085 = vmatprep.subr.bf16.mxu0 %v3769_v28  ;;  %v3782_v52 = vld [vmem:[#allocation5 + $0x240] ss:$8 sps:$4 sm:$0xff]   ;;  %v3787_v53 = vld [vmem:[#allocation5 + $0x254] ss:$8 sps:$4 sm:$0xff]  }
 0x129   :  { %3618 = vmatmul.mubr.msk.bf16.gmra.mrb[24].mxu0 %vm327_vm2, %v340_v59  ;;  %v380_v2 = vrot.slane %v378_v61, 1  ;;  %v705_v14 = vrot.slane %v703_v8, 1  ;;  %v708_v15 = vrot.slane %v706_v9, 2  ;;  %v3785_v54 = vld [vmem:[#allocation5 + $0x250] ss:$8 sps:$4 sm:$0xff]  }
 0x12a   :  { %3649 = vmatprep.mubr.msk.bf16.mxu0 %vm3982_vm0, %v3981_v0  ;;  %v582_v32 = vsel %vm577_vm5, %v579_v22, %v581_v30  ;;  %v823_v42 = vrot.slane %v808_v40, 2  ;;  %v3790_v55 = vld [vmem:[#allocation5 + $0x264] ss:$8 sps:$4 sm:$0xff]  }
 0x12b   :  { %3624 = vmatpush3.bf16.msra.mxu1 %v3759_v60  ;;  %v381_v10 = vsel %vm361_vm3, %v376_v5, %v380_v2  ;;  %v384_v17 = vor.u32 %v382_v16, %v380_v2  ;;  %v709_v18 = vor.u32 %v708_v15, %v705_v14 }
 0x12c   :  { %3625 = vmatprep.subr.bf16.mxu1 %v3981_v0  ;;  %v824_v43 = vsel %vm819_vm6, %v821_v36, %v823_v42 }
 0x12d   :  { %v710_v21 = vsel %vm689_vm4, %v700_v7, %v709_v18 }
 0x12e   :  { %3594 = vmatmul.mubr.msk.bf16.gmra.mrb[24].mxu1 %vm327_vm2, %v381_v10 }
 0x12f   :  { %3626 = vmatpush3.bf16.msra.mxu1 %v3761_v6  ;;  %3597 = vmatprep.mubr.msk.bf16.mxu1 %vm3982_vm0, %v3981_v0 }
 0x130   :  { %3627 = vmatprep.subr.bf16.mxu1 %v3981_v0 }
 0x131   :  { %3650 = vmatmul.mubr.msk.bf16.vlgmr.msra.gmra.mrb[28].mxu0 %vm327_vm2, %v701_v13 }
 0x132   :  { %3653 = vmatprep.mubr.msk.bf16.mxu0 %vm3982_vm0, %v3981_v0  ;;  %1086 = vmatpush1.bf16.msra.mxu0 %v3767_v41 }
 0x133   :  { %3628 = vmatpush3.bf16.msra.mxu1 %v3762_v12  ;;  %1087 = vmatprep.subr.bf16.mxu0 %v3772_v44 }
 0x134   :  { %3661 = vmatprep.subr.bf16.mxu1 %v3981_v0 }
 0x136   :  { %3598 = vmatmul.mubr.msk.bf16.gmra.mrb[28].mxu1 %vm327_vm2, %v384_v17  ;;  %1088 = vmatpush1.bf16.msra.mxu0 %v3770_v45 }
 0x137   :  { %3629 = vmatprep.mubr.msk.bf16.mxu1 %vm3982_vm0, %v3981_v0  ;;  %1089 = vmatprep.subr.bf16.mxu0 %v3775_v46 }
 0x139   :  { %3654 = vmatmul.mubr.msk.bf16.gmra.mrb[32].mxu0 %vm327_vm2, %v710_v21 }
 0x13a   :  { %3657 = vmatprep.mubr.msk.bf16.mxu0 %vm3982_vm0, %v3981_v0  ;;  %1090 = vmatpush1.bf16.msra.mxu0 %v3773_v47 }
 0x13b   :  { %1091 = vmatprep.subr.bf16.mxu0 %v3778_v48 }
 0x13e   :  { %3630 = vmatmul.mubr.msk.bf16.vlgmr.msra.gmra.mrb[32].mxu1 %vm327_vm2, %v580_v26  ;;  %1092 = vmatpush1.bf16.msra.mxu0 %v3776_v49 }
 0x13f   :  { %3662 = vmatpush3.bf16.msra.mxu1 %v3763_v25  ;;  %3633 = vmatprep.mubr.msk.bf16.mxu1 %vm3982_vm0, %v3981_v0 }
 0x140   :  { %3663 = vmatprep.subr.bf16.mxu1 %v3981_v0  ;;  %1093 = vmatprep.subr.bf16.mxu0 %v3781_v50 }
 0x141   :  { %3658 = vmatmul.mubr.msk.bf16.gmra.mrb[36].mxu0 %vm327_vm2, %v709_v18 }
 0x142   :  { %1117 = vmatprep.mubr.bf16.mxu0 %v3989_v58 }
 0x143   :  { %3664 = vmatpush3.bf16.msra.mxu1 %v3764_v29 }
 0x144   :  { %3665 = vmatprep.subr.bf16.mxu1 %v3981_v0 }
 0x146   :  { %3634 = vmatmul.mubr.msk.bf16.gmra.mrb[36].mxu1 %vm327_vm2, %v582_v32 }
 0x147   :  { %3666 = vmatpush3.bf16.msra.mxu1 %v3765_v31  ;;  %3637 = vmatprep.mubr.msk.bf16.mxu1 %vm3982_vm0, %v3981_v0 }
 0x148   :  { %3667 = vmatprep.subr.bf16.mxu1 %v3981_v0 }
 0x14b   :  { %3668 = vmatpush3.bf16.msra.mxu1 %v3766_v33 }
 0x14e   :  { %3638 = vmatmul.mubr.msk.bf16.gmra.mrb[40].mxu1 %vm327_vm2, %v581_v30 }
 0x14f   :  { %3669 = vmatprep.mubr.msk.bf16.mxu1 %vm3982_vm0, %v3981_v0 }
 0x156   :  { %3670 = vmatmul.mubr.msk.bf16.vlgmr.msra.gmra.mrb[44].mxu1 %vm327_vm2, %v822_v39 }
 0x157   :  { %3673 = vmatprep.mubr.msk.bf16.mxu1 %vm3982_vm0, %v3981_v0 }
 0x15e   :  { %3674 = vmatmul.mubr.msk.bf16.gmra.mrb[48].mxu1 %vm327_vm2, %v824_v43 }
 0x15f   :  { %3677 = vmatprep.mubr.msk.bf16.mxu1 %vm3982_vm0, %v3981_v0  ;;  %v3779_v0 = vld [vmem:[#allocation5 + $0x230] ss:$8 sps:$4 sm:$0xff]  }
 0x160   :  { %1094 = vmatpush1.bf16.msra.mxu0 %v3779_v0 }
 0x161   :  { %1095 = vmatprep.subr.bf16.mxu0 %v3784_v51 }
 0x164   :  { %1096 = vmatpush1.bf16.msra.mxu0 %v3782_v52 }
 0x165   :  { %1097 = vmatprep.subr.bf16.mxu0 %v3787_v53 }
 0x166   :  { %3678 = vmatmul.mubr.msk.bf16.gmra.mrb[52].mxu1 %vm327_vm2, %v823_v42 }
 0x168   :  { %1098 = vmatpush1.bf16.msra.mxu0 %v3785_v54 }
 0x169   :  { %1099 = vmatprep.subr.bf16.mxu0 %v3790_v55 }
 0x16c   :  { %1100 = vmatpush1.bf16.msra.mxu0 %v3788_v56 }
 0x16d   :  { %1226 = vmatprep.subr.bf16.mxu0 %v3793_v57 }
 0x1ec   :  { %v540_v59 = vpop.f32.mrb[16].mxu0 }
 0x1ed   :  { %v3611_v60 = vpop.f32.mrb[17].mxu0 }
 0x1ee   :  { %v543_v61 = vpop.f32.mrb[18].mxu0  ;;  %v919_v60 = vld [vmem:[%s4991_s2 + $0x1] ss:$0 sm:$0xff] }
 0x1ef   :  { %v3612_v62 = vpop.f32.mrb[19].mxu0 }
 0x1f4   :  { %v548_v63 = vpop.f32.mrb[20].mxu0 }
 0x1f5   :  { %v3615_v1 = vpop.f32.mrb[21].mxu0 }
 0x1f6   :  { %v551_v2 = vpop.f32.mrb[22].mxu0 }
 0x1f7   :  { %v3616_v3 = vpop.f32.mrb[23].mxu0 }
 0x1f9   :  { %v452_v4 = vpop.f32.mrb[20].mxu1 }
 0x1fa   :  { %v541_v5 = vadd.f32 %v540_v59, %v452_v4  ;;  %v3591_v6 = vpop.f32.mrb[21].mxu1 }
 0x1fb   :  { %v455_v7 = vpop.f32.mrb[22].mxu1 }
 0x1fc   :  { %v544_v8 = vadd.f32 %v543_v61, %v455_v7  ;;  %v3592_v9 = vpop.f32.mrb[23].mxu1  ;;  %v556_v10 = vpop.f32.mrb[24].mxu0 }
 0x1fd   :  { %v3619_v11 = vpop.f32.mrb[25].mxu0 }
 0x1fe   :  { %v559_v12 = vpop.f32.mrb[26].mxu0 }
 0x1ff   :  { %v3620_v13 = vpop.f32.mrb[27].mxu0 }
 0x201   :  { %v460_v14 = vpop.f32.mrb[24].mxu1 }
 0x202   :  { %v549_v15 = vadd.f32 %v548_v63, %v460_v14  ;;  %v3595_v16 = vpop.f32.mrb[25].mxu1 }
 0x203   :  { %v463_v17 = vpop.f32.mrb[26].mxu1 }
 0x204   :  { %v552_v18 = vadd.f32 %v551_v2, %v463_v17  ;;  %v3596_v19 = vpop.f32.mrb[27].mxu1  ;;  %v778_v20 = vpop.f32.mrb[28].mxu0 }
 0x205   :  { %v3651_v21 = vpop.f32.mrb[29].mxu0 }
 0x206   :  { %v781_v22 = vpop.f32.mrb[30].mxu0 }
 0x207   :  { %v3652_v23 = vpop.f32.mrb[31].mxu0 }
 0x209   :  { %v468_v24 = vpop.f32.mrb[28].mxu1 }
 0x20a   :  { %v557_v25 = vadd.f32 %v556_v10, %v468_v24  ;;  %v3599_v26 = vpop.f32.mrb[29].mxu1 }
 0x20b   :  { %v471_v27 = vpop.f32.mrb[30].mxu1 }
 0x20c   :  { %v3600_v29 = vpop.f32.mrb[31].mxu1  ;;  %v786_v30 = vpop.f32.mrb[32].mxu0 }
 0x20d   :  { %v3655_v31 = vpop.f32.mrb[33].mxu0 }
 0x20e   :  { %v789_v32 = vpop.f32.mrb[34].mxu0 }
 0x20f   :  { %v3656_v33 = vpop.f32.mrb[35].mxu0 }
 0x211   :  { %v650_v34 = vpop.f32.mrb[32].mxu1 }
 0x212   :  { %v672_v35 = vadd.f32 %v650_v34, %v541_v5  ;;  %v3631_v36 = vpop.f32.mrb[33].mxu1 }
 0x213   :  { %v653_v37 = vpop.f32.mrb[34].mxu1 }
 0x214   :  { %v673_v38 = vadd.f32 %v653_v37, %v544_v8  ;;  %v3632_v39 = vpop.f32.mrb[35].mxu1  ;;  %v794_v40 = vpop.f32.mrb[36].mxu0  ;;  %v800_v42 = vadd.f32 %v778_v20, %v672_v35  ;;  %v960_v35 = vld [vmem:[#allocation2 + $0x50] sm:$0x1] }
 0x215   :  { %v3659_v43 = vpop.f32.mrb[37].mxu0 }
 0x216   :  { %v797_v28 = vpop.f32.mrb[38].mxu0  ;;  %v801_v41 = vadd.f32 %v781_v22, %v673_v38 }
 0x217   :  { %v3660_v44 = vpop.f32.mrb[39].mxu0 }
 0x218   :  { %v1288_v44 = vld [vmem:[#allocation2 + $0x50] sm:$0x3] }
 0x219   :  { %v658_v45 = vpop.f32.mrb[36].mxu1 }
 0x21a   :  { %v674_v46 = vadd.f32 %v658_v45, %v549_v15  ;;  %v3635_v47 = vpop.f32.mrb[37].mxu1  ;;  %v1470_v45 = vld [vmem:[#allocation2 + $0x50] sm:$0x7] }
 0x21b   :  { %v661_v48 = vpop.f32.mrb[38].mxu1 }
 0x21c   :  { %v675_v49 = vadd.f32 %v661_v48, %v552_v18  ;;  %v3636_v50 = vpop.f32.mrb[39].mxu1  ;;  %v802_v0 = vadd.f32 %v786_v30, %v674_v46  ;;  %v3796_v46 = vld [vmem:[#allocation5 + $0x184] ss:$8 sps:$4 sm:$0xff]  }
 0x21e   :  { %v803_v51 = vadd.f32 %v789_v32, %v675_v49 }
 0x221   :  { %v666_v52 = vpop.f32.mrb[40].mxu1 }
 0x222   :  { %v676_v53 = vadd.f32 %v666_v52, %v557_v25  ;;  %v3639_v54 = vpop.f32.mrb[41].mxu1 }
 0x223   :  { %v669_v55 = vpop.f32.mrb[42].mxu1 }
 0x224   :  { %v3640_v56 = vpop.f32.mrb[43].mxu1  ;;  %v804_v57 = vadd.f32 %v794_v40, %v676_v53  ;;  %v1665_v55 = vld [vmem:[#allocation2 + $0x50] sm:$0xf] }
 0x229   :  { %v892_v59 = vpop.f32.mrb[44].mxu1 }
 0x22a   :  { %v914_v61 = vadd.f32 %v892_v59, %v800_v42  ;;  %v3671_v62 = vpop.f32.mrb[45].mxu1  ;;  %v3791_v42 = vld [vmem:[#allocation5 + $0x170] ss:$8 sps:$4 sm:$0xff]  }
 0x22b   :  { %v895_v63 = vpop.f32.mrb[46].mxu1 }
 0x22c   :  { %v920_v1 = vadd.f32 %v919_v60, %v914_v61  ;;  %v915_v2 = vadd.f32 %v895_v63, %v801_v41  ;;  %v3672_v3 = vpop.f32.mrb[47].mxu1  ;;  %v1846_v61 = vld [vmem:[#allocation2 + $0x50] sm:$0x1f] }
 0x22e   :  { %v925_v4 = vmax.f32 %v920_v1, 0.0  ;;  %v921_v5 = vadd.f32 %v919_v60, %v915_v2 }
 0x230   :  { %930 = vst [vmem:[#allocation2] sm:$0xff] %v925_v4  ;;  %v4214_v6 = vmax.f32 %v921_v5, 0.0 }
 0x231   :  { %v900_v7 = vpop.f32.mrb[48].mxu1 }
 0x232   :  { %v916_v8 = vadd.f32 %v900_v7, %v802_v0  ;;  %v3675_v9 = vpop.f32.mrb[49].mxu1  ;;  %v4217_v10 = vpack.c.bf16 %v4214_v6, %v925_v4 }
 0x233   :  { %v903_v11 = vpop.f32.mrb[50].mxu1 }
 0x234   :  { %v922_v12 = vadd.f32 %v919_v60, %v916_v8  ;;  %v917_v13 = vadd.f32 %v903_v11, %v803_v51  ;;  %v3676_v14 = vpop.f32.mrb[51].mxu1  ;;  %v3794_v8 = vld [vmem:[#allocation5 + $0x180] ss:$8 sps:$4 sm:$0xff]  }
 0x236   :  { %v923_v15 = vadd.f32 %v919_v60, %v917_v13  ;;  %v927_v19 = vmax.f32 %v922_v12, 0.0  ;;  %v3799_v13 = vld [vmem:[#allocation5 + $0x194] ss:$8 sps:$4 sm:$0xff]  }
 0x237   :  { %v959_v16 = vld [vmem:[#allocation2] sm:$0xfe] }
 0x238   :  { %v1287_v17 = vld [vmem:[#allocation2] sm:$0xfc]  ;;  %v928_v20 = vmax.f32 %v923_v15, 0.0  ;;  %v961_v21 = vpack.c.bf16 %v4214_v6, %v959_v16 }
 0x239   :  { %v1469_v18 = vld [vmem:[#allocation2] sm:$0xf8]  ;;  %v908_v25 = vpop.f32.mrb[52].mxu1  ;;  %v1289_v26 = vpack.c.bf16 %v4214_v6, %v1287_v17 }
 0x23a   :  { %v1471_v22 = vpack.c.bf16 %v4214_v6, %v1469_v18  ;;  %v1664_v23 = vld [vmem:[#allocation2] sm:$0xf0]  ;;  %v918_v27 = vadd.f32 %v908_v25, %v804_v57  ;;  %v3679_v29 = vpop.f32.mrb[53].mxu1  ;;  %v4222_v30 = vpack.c.bf16 %v928_v20, %v927_v19  ;;  %v982_v31 = vshll.u32 %v961_v21, 16 }
 0x23b   :  { %v1845_v24 = vld [vmem:[#allocation2] sm:$0xe0]  ;;  %v1666_v32 = vpack.c.bf16 %v4214_v6, %v1664_v23  ;;  %v911_v33 = vpop.f32.mrb[54].mxu1  ;;  %v980_v34 = vshrl.u32 %v961_v21, 16  ;;  %v1310_v47 = vrot.slane %v1289_v26, 1 }
 0x23c   :  { %v1490_v36 = vshrl.u32 %v1471_v22, 16  ;;  %v1493_v37 = vshll.u32 %v1471_v22, 16  ;;  %v4226_v38 = vpack.c.bf16 %v4214_v6, %v1845_v24  ;;  %v924_v39 = vadd.f32 %v919_v60, %v918_v27  ;;  %v3680_v40 = vpop.f32.mrb[55].mxu1  ;;  %v2041_v0 = vld [vmem:[#allocation2] sm:$0xc0] }
 0x23d   :  { %v984_v43 = vrot.slane %v982_v31, 1  ;;  %v4229_v28 = vshll.u32 %v4222_v30, 16  ;;  %v4232_v41 = vshrl.u32 %v4222_v30, 16  ;;  %v1311_v48 = vrot.slane %v4222_v30, 1  ;;  %v2042_v26 = vld [vmem:[#allocation2 + $0x50] sm:$0x3f] }
 0x23e   :  { %v1492_v49 = vrot.slane %v1490_v36, 1  ;;  %v1495_v50 = vrot.slane %v1493_v37, 2  ;;  %v4235_v51 = vmax.f32 %v924_v39, 0.0  ;;  %v1686_v59 = vrot.slane %v1666_v32, 2  ;;  %v3797_v27 = vld [vmem:[#allocation5 + $0x190] ss:$8 sps:$4 sm:$0xff]  }
 0x23f   :  { %v985_v52 = vor.u32 %v984_v43, %v980_v34  ;;  %v989_v53 = vrot.slane %v4229_v28, 1  ;;  %v1497_v54 = vrot.slane %v4232_v41, 1  ;;  %v4240_v56 = vsel %vm577_vm5, %v1310_v47, %v1311_v48  ;;  %v3802_v33 = vld [vmem:[#allocation5 + $0x1a4] ss:$8 sps:$4 sm:$0xff]  }
 0x240   :  { %v1498_v57 = vrot.slane %v4229_v28, 2  ;;  %v1687_v60 = vrot.slane %v4222_v30, 2  ;;  %v4246_v63 = vpack.c.bf16 %v960_v35, %v4235_v51  ;;  %v1496_v1 = vor.u32 %v1495_v50, %v1492_v49  ;;  %v3805_v49 = vld [vmem:[#allocation5 + $0x1b4] ss:$8 sps:$4 sm:$0xff]  }
 0x241   :  { %v990_v62 = vsel %vm361_vm3, %v985_v52, %v989_v53  ;;  %v2043_v2 = vpack.c.bf16 %v4214_v6, %v2041_v0  ;;  %v1290_v3 = vpack.c.bf16 %v1288_v44, %v4235_v51  ;;  %v1472_v5 = vpack.c.bf16 %v1470_v45, %v4235_v51 }
 0x242   :  { %1118 = vmatmul.mubr.bf16.vlgmr.msra.gmra.mrb[40].mxu0 %v990_v62  ;;  %v1499_v4 = vor.u32 %v1498_v57, %v1497_v54  ;;  %v4252_v7 = vsel %vm819_vm6, %v1686_v59, %v1687_v60  ;;  %v993_v9 = vor.u32 %v4232_v41, %v989_v53  ;;  %v995_v11 = vshll.u32 %v4246_v63, 16  ;;  %v3803_v54 = vld [vmem:[#allocation5 + $0x1b0] ss:$8 sps:$4 sm:$0xff]   ;;  %v3808_v59 = vld [vmem:[#allocation5 + $0x1c4] ss:$8 sps:$4 sm:$0xff]  }
 0x243   :  { %1227 = vmatpush1.bf16.msra.mxu0 %v3791_v42  ;;  %1127 = vmatprep.mubr.bf16.mxu0 %v3989_v58  ;;  %v1667_v12 = vpack.c.bf16 %v1665_v55, %v4235_v51  ;;  %v1848_v6 = vpack.c.bf16 %v1846_v61, %v4235_v51  ;;  %v4259_v14 = vrot.slane %v1290_v3, 1  ;;  %v1502_v16 = vshrl.u32 %v1472_v5, 16  ;;  %v3811_v61 = vld [vmem:[#allocation5 + $0x1d4] ss:$8 sps:$4 sm:$0xff]   ;;  %v3809_v62 = vld [vmem:[#allocation5 + $0x1d0] ss:$8 sps:$4 sm:$0xff]  }
 0x244   :  { %1228 = vmatprep.subr.bf16.mxu0 %v3796_v46  ;;  %v4262_v15 = vsel %vm689_vm4, %v1496_v1, %v1499_v4  ;;  %v1505_v17 = vshll.u32 %v1472_v5, 16  ;;  %v997_v18 = vrot.slane %v995_v11, 1  ;;  %v1867_v20 = vshrl.u32 %v4226_v38, 16  ;;  %v3800_v46 = vld [vmem:[#allocation5 + $0x1a0] ss:$8 sps:$4 sm:$0xff]  }
 0x245   :  { %v4264_v19 = vrot.slane %v1667_v12, 2  ;;  %v1870_v21 = vshll.u32 %v4226_v38, 16  ;;  %v4270_v22 = vsel %vm577_vm5, %v1311_v48, %v4259_v14  ;;  %v1504_v23 = vrot.slane %v1502_v16, 1  ;;  %v3812_v1 = vld [vmem:[#allocation5 + $0x1e0] ss:$8 sps:$4 sm:$0xff]  }
 0x246   :  { %v1507_v24 = vrot.slane %v1505_v17, 2  ;;  %v1874_v25 = vrot.slane %v4232_v41, 2  ;;  %v998_v29 = vsel %vm361_vm3, %v993_v9, %v997_v18  ;;  %v1869_v32 = vrot.slane %v1867_v20, 2  ;;  %v3815_v3 = vld [vmem:[#allocation5 + $0x270] ss:$8 sps:$4 sm:$0xff]  }
 0x247   :  { %1229 = vmatpush1.bf16.msra.mxu0 %v3794_v8  ;;  %v4276_v31 = vsel %vm819_vm6, %v1687_v60, %v4264_v19  ;;  %v1872_v35 = vrot.slane %v1870_v21, 3  ;;  %v1875_v36 = vrot.slane %v4229_v28, 3  ;;  %v1879_v37 = vshrl.u32 %v1848_v6, 16  ;;  %v3806_v60 = vld [vmem:[#allocation5 + $0x1c0] ss:$8 sps:$4 sm:$0xff]  }
 0x248   :  { %1230 = vmatprep.subr.bf16.mxu0 %v3799_v13  ;;  %v4278_v34 = vor.u32 %v1507_v24, %v1504_v23  ;;  %v1882_v38 = vshll.u32 %v1848_v6, 16  ;;  %v2064_v39 = vrot.slane %v2043_v2, 3  ;;  %v2065_v40 = vrot.slane %v4222_v30, 3  ;;  %v3817_v2 = vld [vmem:[#allocation5 + $0x274] ss:$8 sps:$4 sm:$0xff]  }
 0x249   :  { %v2044_v42 = vpack.c.bf16 %v2042_v26, %v4235_v51  ;;  %v1873_v41 = vor.u32 %v1872_v35, %v1869_v32  ;;  %v1876_v44 = vor.u32 %v1875_v36, %v1874_v25  ;;  %v1881_v45 = vrot.slane %v1879_v37, 2  ;;  %v3818_v5 = vld [vmem:[#allocation5 + $0x280] ss:$8 sps:$4 sm:$0xff]   ;;  %v3823_v8 = vld [vmem:[#allocation5 + $0x294] ss:$8 sps:$4 sm:$0xff]  }
 0x24a   :  { %1128 = vmatmul.mubr.bf16.gmra.mrb[44].mxu0 %v998_v29  ;;  %v4285_v43 = vsel %vm689_vm4, %v1499_v4, %v4278_v34  ;;  %v1884_v28 = vrot.slane %v1882_v38, 3  ;;  %v4289_v47 = vsel %vm2063_vm8, %v2064_v39, %v2065_v40  ;;  %v999_v53 = vshrl.u32 %v4246_v63, 16  ;;  %v3814_v63 = vld [vmem:[#allocation5 + $0x1e4] ss:$8 sps:$4 sm:$0xff]   ;;  %v3821_v9 = vld [vmem:[#allocation5 + $0x290] ss:$8 sps:$4 sm:$0xff]  }
 0x24b   :  { %1231 = vmatpush1.bf16.msra.mxu0 %v3797_v27  ;;  %1137 = vmatprep.mubr.bf16.mxu0 %v3989_v58  ;;  %v4291_v48 = vrot.slane %v2044_v42, 3  ;;  %v4294_v50 = vsel %vm1865_vm7, %v1873_v41, %v1876_v44  ;;  %v3820_v4 = vld [vmem:[#allocation5 + $0x284] ss:$8 sps:$4 sm:$0xff]   ;;  %v3824_v12 = vld [vmem:[#allocation5 + $0x2a0] ss:$8 sps:$4 sm:$0xff]   ;;  %v942_v13 = vpack.c.bf16 %v4235_v51, %v4235_v51 }
 0x24c   :  { %1232 = vmatprep.subr.bf16.mxu0 %v3802_v33  ;;  %v4296_v0 = vor.u32 %v1884_v28, %v1881_v45  ;;  %v1001_v57 = vor.u32 %v999_v53, %v997_v18  ;;  %v3826_v11 = vld [vmem:[#allocation5 + $0x2a4] ss:$8 sps:$4 sm:$0xff]   ;;  %v3829_v6 = vld [vmem:[#allocation5 + $0x2b4] ss:$8 sps:$4 sm:$0xff]   ;;  %v3830_v17 = vld [vmem:[#allocation5 + $0x2c0] ss:$8 sps:$4 sm:$0xff]  }
 0x24d   :  { %v4300_v52 = vsel %vm2063_vm8, %v2065_v40, %v4291_v48  ;;  %v3832_v16 = vld [vmem:[#allocation5 + $0x2c4] ss:$8 sps:$4 sm:$0xff]   ;;  %v3833_v18 = vld [vmem:[#allocation5 + $0x2d0] ss:$8 sps:$4 sm:$0xff]   ;;  %v3836_v21 = vld [vmem:[#allocation5 + $0x2e0] ss:$8 sps:$4 sm:$0xff]  }
 0x24e   :  { %v4305_v55 = vsel %vm1865_vm7, %v1876_v44, %v4296_v0  ;;  %v3838_v20 = vld [vmem:[#allocation5 + $0x2e4] ss:$8 sps:$4 sm:$0xff]   ;;  %v3841_v23 = vld [vmem:[#allocation5 + $0x2f4] ss:$8 sps:$4 sm:$0xff]   ;;  %v3839_v24 = vld [vmem:[#allocation5 + $0x2f0] ss:$8 sps:$4 sm:$0xff]  }
 0x24f   :  { %1233 = vmatpush1.bf16.msra.mxu0 %v3800_v46  ;;  %v3844_v51 = vld [vmem:[#allocation5 + $0x304] ss:$8 sps:$4 sm:$0xff]   ;;  %v3842_v25 = vld [vmem:[#allocation5 + $0x300] ss:$8 sps:$4 sm:$0xff]   ;;  %v3847_v26 = vld [vmem:[#allocation5 + $0x314] ss:$8 sps:$4 sm:$0xff]  }
 0x250   :  { %1234 = vmatprep.subr.bf16.mxu0 %v3805_v49  ;;  %v3845_v27 = vld [vmem:[#allocation5 + $0x310] ss:$8 sps:$4 sm:$0xff]   ;;  %v3850_v29 = vld [vmem:[#allocation5 + $0x324] ss:$8 sps:$4 sm:$0xff]   ;;  %v3848_v32 = vld [vmem:[#allocation5 + $0x320] ss:$8 sps:$4 sm:$0xff]  }
 0x251   :  { %v3853_v33 = vld [vmem:[#allocation5 + $0x334] ss:$8 sps:$4 sm:$0xff]   ;;  %v3856_v35 = vld [vmem:[#allocation5 + $0x344] ss:$8 sps:$4 sm:$0xff]   ;;  %v3854_v36 = vld [vmem:[#allocation5 + $0x340] ss:$8 sps:$4 sm:$0xff]  }
 0x252   :  { %1138 = vmatmul.mubr.bf16.gmra.mrb[48].mxu0 %v1001_v57  ;;  %v3859_v37 = vld [vmem:[#allocation5 + $0x354] ss:$8 sps:$4 sm:$0xff]   ;;  %v3862_v38 = vld [vmem:[#allocation5 + $0x364] ss:$8 sps:$4 sm:$0xff]   ;;  %v3860_v39 = vld [vmem:[#allocation5 + $0x360] ss:$8 sps:$4 sm:$0xff]  }
 0x253   :  { %1235 = vmatpush1.bf16.msra.mxu0 %v3803_v54  ;;  %1258 = vmatprep.mubr.bf16.mxu0 %v3989_v58  ;;  %v3865_v40 = vld [vmem:[#allocation5 + $0x374] ss:$8 sps:$4 sm:$0xff]   ;;  %v3863_v42 = vld [vmem:[#allocation5 + $0x370] ss:$8 sps:$4 sm:$0xff]   ;;  %v3868_v41 = vld [vmem:[#allocation5 + $0x384] ss:$8 sps:$4 sm:$0xff]  }
 0x254   :  { %1236 = vmatprep.subr.bf16.mxu0 %v3808_v59  ;;  %v3871_v44 = vld [vmem:[#allocation5 + $0x394] ss:$8 sps:$4 sm:$0xff]   ;;  %v3869_v45 = vld [vmem:[#allocation5 + $0x390] ss:$8 sps:$4 sm:$0xff]   ;;  %v3874_v46 = vld [vmem:[#allocation5 + $0x3a4] ss:$8 sps:$4 sm:$0xff]  }
 0x255   :  { %v3872_v28 = vld [vmem:[#allocation5 + $0x3a0] ss:$8 sps:$4 sm:$0xff]   ;;  %v3877_v49 = vld [vmem:[#allocation5 + $0x3b4] ss:$8 sps:$4 sm:$0xff]   ;;  %v3880_v53 = vld [vmem:[#allocation5 + $0x3c4] ss:$8 sps:$4 sm:$0xff]  }
 0x256   :  { %v3878_v54 = vld [vmem:[#allocation5 + $0x3c0] ss:$8 sps:$4 sm:$0xff]   ;;  %v3883_v57 = vld [vmem:[#allocation5 + $0x3d4] ss:$8 sps:$4 sm:$0xff]   ;;  %v3886_v59 = vld [vmem:[#allocation5 + $0x3e4] ss:$8 sps:$4 sm:$0xff]  }
 0x257   :  { %1237 = vmatpush1.bf16.msra.mxu0 %v3806_v60  ;;  %v3884_v60 = vld [vmem:[#allocation5 + $0x3e0] ss:$8 sps:$4 sm:$0xff]  }
 0x258   :  { %1238 = vmatprep.subr.bf16.mxu0 %v3811_v61  ;;  %v3889_v61 = vld [vmem:[#allocation5 + $0x3f4] ss:$8 sps:$4 sm:$0xff]  }
 0x25b   :  { %1239 = vmatpush1.bf16.msra.mxu0 %v3809_v62  ;;  %v3887_v62 = vld [vmem:[#allocation5 + $0x3f0] ss:$8 sps:$4 sm:$0xff]  }
 0x25c   :  { %1240 = vmatprep.subr.bf16.mxu0 %v3814_v63  ;;  %v3892_v63 = vld [vmem:[#allocation5 + $0x404] ss:$8 sps:$4 sm:$0xff]  }
 0x25f   :  { %1241 = vmatpush1.bf16.msra.mxu0 %v3812_v1  ;;  %v3895_v1 = vld [vmem:[#allocation5 + $0x414] ss:$8 sps:$4 sm:$0xff]  }
 0x260   :  { %1398 = vmatprep.subr.bf16.mxu0 %v3817_v2  ;;  %v3893_v2 = vld [vmem:[#allocation5 + $0x410] ss:$8 sps:$4 sm:$0xff]  }
 0x262   :  { %1259 = vmatmul.mubr.bf16.vlgmr.msra.gmra.mrb[40].mxu0 %v4217_v10  ;;  %v3827_v10 = vld [vmem:[#allocation5 + $0x2b0] ss:$8 sps:$4 sm:$0xff]  }
 0x263   :  { %1399 = vmatpush1.bf16.msra.mxu0 %v3815_v3  ;;  %1268 = vmatprep.mubr.bf16.mxu0 %v3989_v58  ;;  %v3898_v3 = vld [vmem:[#allocation5 + $0x424] ss:$8 sps:$4 sm:$0xff]  }
 0x264   :  { %1400 = vmatprep.subr.bf16.mxu0 %v3820_v4  ;;  %v3896_v4 = vld [vmem:[#allocation5 + $0x420] ss:$8 sps:$4 sm:$0xff]  }
 0x267   :  { %1401 = vmatpush1.bf16.msra.mxu0 %v3818_v5  ;;  %v3901_v5 = vld [vmem:[#allocation5 + $0x434] ss:$8 sps:$4 sm:$0xff]  }
 0x268   :  { %1402 = vmatprep.subr.bf16.mxu0 %v3823_v8  ;;  %v3904_v8 = vld [vmem:[#allocation5 + $0x444] ss:$8 sps:$4 sm:$0xff]  }
 0x26a   :  { %1269 = vmatmul.mubr.bf16.gmra.mrb[44].mxu0 %v4222_v30  ;;  %v3835_v30 = vld [vmem:[#allocation5 + $0x2d4] ss:$8 sps:$4 sm:$0xff]  }
 0x26b   :  { %1403 = vmatpush1.bf16.msra.mxu0 %v3821_v9  ;;  %1278 = vmatprep.mubr.bf16.mxu0 %v3989_v58  ;;  %v3902_v9 = vld [vmem:[#allocation5 + $0x440] ss:$8 sps:$4 sm:$0xff]  }
 0x26c   :  { %1404 = vmatprep.subr.bf16.mxu0 %v3826_v11  ;;  %v3907_v11 = vld [vmem:[#allocation5 + $0x454] ss:$8 sps:$4 sm:$0xff]  }
 0x26f   :  { %1405 = vmatpush1.bf16.msra.mxu0 %v3824_v12  ;;  %v3910_v12 = vld [vmem:[#allocation5 + $0x464] ss:$8 sps:$4 sm:$0xff]  }
 0x270   :  { %1406 = vmatprep.subr.bf16.mxu0 %v3829_v6  ;;  %v3908_v6 = vld [vmem:[#allocation5 + $0x460] ss:$8 sps:$4 sm:$0xff]  }
 0x272   :  { %1279 = vmatmul.mubr.bf16.gmra.mrb[52].mxu0 %v942_v13  ;;  %v3911_v13 = vld [vmem:[#allocation5 + $0x470] ss:$8 sps:$4 sm:$0xff]  }
 0x273   :  { %1407 = vmatpush1.bf16.msra.mxu0 %v3827_v10  ;;  %1430 = vmatprep.mubr.bf16.mxu0 %v3989_v58  ;;  %v3913_v10 = vld [vmem:[#allocation5 + $0x474] ss:$8 sps:$4 sm:$0xff]  }
 0x274   :  { %1408 = vmatprep.subr.bf16.mxu0 %v3832_v16  ;;  %v3916_v16 = vld [vmem:[#allocation5 + $0x484] ss:$8 sps:$4 sm:$0xff]  }
 0x277   :  { %1409 = vmatpush1.bf16.msra.mxu0 %v3830_v17  ;;  %v3919_v17 = vld [vmem:[#allocation5 + $0x494] ss:$8 sps:$4 sm:$0xff]  }
 0x278   :  { %1410 = vmatprep.subr.bf16.mxu0 %v3835_v30  ;;  %v3917_v30 = vld [vmem:[#allocation5 + $0x490] ss:$8 sps:$4 sm:$0xff]  }
 0x27b   :  { %1411 = vmatpush1.bf16.msra.mxu0 %v3833_v18  ;;  %v3922_v18 = vld [vmem:[#allocation5 + $0x4a4] ss:$8 sps:$4 sm:$0xff]  }
 0x27c   :  { %1412 = vmatprep.subr.bf16.mxu0 %v3838_v20  ;;  %v3920_v20 = vld [vmem:[#allocation5 + $0x4a0] ss:$8 sps:$4 sm:$0xff]  }
 0x27f   :  { %1413 = vmatpush1.bf16.msra.mxu0 %v3836_v21  ;;  %v3925_v21 = vld [vmem:[#allocation5 + $0x4b4] ss:$8 sps:$4 sm:$0xff]  }
 0x280   :  { %1593 = vmatprep.subr.bf16.mxu0 %v3841_v23  ;;  %v3928_v23 = vld [vmem:[#allocation5 + $0x4c4] ss:$8 sps:$4 sm:$0xff]  }
 0x282   :  { %1431 = vmatmul.mubr.bf16.vlgmr.msra.gmra.mrb[40].mxu0 %v4240_v56  ;;  %v3851_v56 = vld [vmem:[#allocation5 + $0x330] ss:$8 sps:$4 sm:$0xff]  }
 0x283   :  { %1594 = vmatpush1.bf16.msra.mxu0 %v3839_v24  ;;  %1440 = vmatprep.mubr.bf16.mxu0 %v3989_v58  ;;  %v3926_v24 = vld [vmem:[#allocation5 + $0x4c0] ss:$8 sps:$4 sm:$0xff]  }
 0x284   :  { %1595 = vmatprep.subr.bf16.mxu0 %v3844_v51  ;;  %v3931_v51 = vld [vmem:[#allocation5 + $0x4d4] ss:$8 sps:$4 sm:$0xff]  }
 0x287   :  { %1596 = vmatpush1.bf16.msra.mxu0 %v3842_v25  ;;  %v3934_v25 = vld [vmem:[#allocation5 + $0x4e4] ss:$8 sps:$4 sm:$0xff]  }
 0x288   :  { %1597 = vmatprep.subr.bf16.mxu0 %v3847_v26  ;;  %v3932_v26 = vld [vmem:[#allocation5 + $0x4e0] ss:$8 sps:$4 sm:$0xff]  }
 0x28a   :  { %1441 = vmatmul.mubr.bf16.gmra.mrb[44].mxu0 %v4270_v22  ;;  %v3857_v22 = vld [vmem:[#allocation5 + $0x350] ss:$8 sps:$4 sm:$0xff]  }
 0x28b   :  { %1598 = vmatpush1.bf16.msra.mxu0 %v3845_v27  ;;  %1450 = vmatprep.mubr.bf16.mxu0 %v3989_v58 }
 0x28c   :  { %1599 = vmatprep.subr.bf16.mxu0 %v3850_v29 }
 0x28f   :  { %1600 = vmatpush1.bf16.msra.mxu0 %v3848_v32 }
 0x290   :  { %1601 = vmatprep.subr.bf16.mxu0 %v3853_v33 }
 0x292   :  { %1451 = vmatmul.mubr.bf16.gmra.mrb[56].mxu0 %v4259_v14  ;;  %v3866_v14 = vld [vmem:[#allocation5 + $0x380] ss:$8 sps:$4 sm:$0xff]  }
 0x293   :  { %1602 = vmatpush1.bf16.msra.mxu0 %v3851_v56  ;;  %1625 = vmatprep.mubr.bf16.mxu0 %v3989_v58 }
 0x294   :  { %1603 = vmatprep.subr.bf16.mxu0 %v3856_v35 }
 0x297   :  { %1604 = vmatpush1.bf16.msra.mxu0 %v3854_v36 }
 0x298   :  { %1605 = vmatprep.subr.bf16.mxu0 %v3859_v37 }
 0x29b   :  { %1606 = vmatpush1.bf16.msra.mxu0 %v3857_v22 }
 0x29c   :  { %1607 = vmatprep.subr.bf16.mxu0 %v3862_v38 }
 0x29f   :  { %1608 = vmatpush1.bf16.msra.mxu0 %v3860_v39 }
 0x2a0   :  { %1774 = vmatprep.subr.bf16.mxu0 %v3865_v40 }
 0x2a2   :  { %1626 = vmatmul.mubr.bf16.vlgmr.msra.gmra.mrb[40].mxu0 %v4262_v15  ;;  %v3875_v15 = vld [vmem:[#allocation5 + $0x3b0] ss:$8 sps:$4 sm:$0xff]  }
 0x2a3   :  { %1775 = vmatpush1.bf16.msra.mxu0 %v3863_v42  ;;  %1635 = vmatprep.mubr.bf16.mxu0 %v3989_v58 }
 0x2a4   :  { %1776 = vmatprep.subr.bf16.mxu0 %v3868_v41 }
 0x2a7   :  { %1777 = vmatpush1.bf16.msra.mxu0 %v3866_v14 }
 0x2a8   :  { %1778 = vmatprep.subr.bf16.mxu0 %v3871_v44 }
 0x2aa   :  { %1636 = vmatmul.mubr.bf16.gmra.mrb[44].mxu0 %v4285_v43  ;;  %v3881_v43 = vld [vmem:[#allocation5 + $0x3d0] ss:$8 sps:$4 sm:$0xff]  }
 0x2ab   :  { %1779 = vmatpush1.bf16.msra.mxu0 %v3869_v45  ;;  %1645 = vmatprep.mubr.bf16.mxu0 %v3989_v58 }
 0x2ac   :  { %1780 = vmatprep.subr.bf16.mxu0 %v3874_v46 }
 0x2af   :  { %1781 = vmatpush1.bf16.msra.mxu0 %v3872_v28 }
 0x2b0   :  { %1782 = vmatprep.subr.bf16.mxu0 %v3877_v49 }
 0x2b2   :  { %1646 = vmatmul.mubr.bf16.gmra.mrb[60].mxu0 %v4278_v34  ;;  %v3890_v34 = vld [vmem:[#allocation5 + $0x400] ss:$8 sps:$4 sm:$0xff]  }
 0x2b3   :  { %1783 = vmatpush1.bf16.msra.mxu0 %v3875_v15  ;;  %1806 = vmatprep.mubr.bf16.mxu0 %v3989_v58 }
 0x2b4   :  { %1784 = vmatprep.subr.bf16.mxu0 %v3880_v53 }
 0x2b7   :  { %1785 = vmatpush1.bf16.msra.mxu0 %v3878_v54  ;;  %v2226_v54 = vlaneseq }
 0x2b8   :  { %1786 = vmatprep.subr.bf16.mxu0 %v3883_v57 }
 0x2bb   :  { %1787 = vmatpush1.bf16.msra.mxu0 %v3881_v43 }
 0x2bc   :  { %1788 = vmatprep.subr.bf16.mxu0 %v3886_v59  ;;  %v2227_v59 = vshrl.u32 %v2226_v54, 7 }
 0x2bf   :  { %1789 = vmatpush1.bf16.msra.mxu0 %v3884_v60  ;;  %v4344_v60 = vsub.s32 0, %v2227_v59 }
 0x2c0   :  { %1970 = vmatprep.subr.bf16.mxu0 %v3889_v61  ;;  %v3429_v61 = vld [vmem:[%s4991_s2 + $0x2] ss:$8 sm:$0x3] }
 0x2c2   :  { %1807 = vmatmul.mubr.bf16.vlgmr.msra.gmra.mrb[40].mxu0 %v4252_v7  ;;  %v3899_v7 = vld [vmem:[#allocation5 + $0x430] ss:$8 sps:$4 sm:$0xff]  }
 0x2c3   :  { %1971 = vmatpush1.bf16.msra.mxu0 %v3887_v62  ;;  %1816 = vmatprep.mubr.bf16.mxu0 %v3989_v58  ;;  %v4349_v62 = vsub.s32 1, %v2227_v59 }
 0x2c4   :  { %1972 = vmatprep.subr.bf16.mxu0 %v3892_v63  ;;  %v2229_v63 = vrot.slane %v3429_v61, %v4344_v60 }
 0x2c7   :  { %1973 = vmatpush1.bf16.msra.mxu0 %v3890_v34  ;;  %v2233_v34 = vrot.slane %v3429_v61, %v4349_v62 }
 0x2c8   :  { %1974 = vmatprep.subr.bf16.mxu0 %v3895_v1 }
 0x2ca   :  { %1817 = vmatmul.mubr.bf16.gmra.mrb[44].mxu0 %v4276_v31  ;;  %v3905_v31 = vld [vmem:[#allocation5 + $0x450] ss:$8 sps:$4 sm:$0xff]  }
 0x2cb   :  { %1975 = vmatpush1.bf16.msra.mxu0 %v3893_v2  ;;  %1826 = vmatprep.mubr.bf16.mxu0 %v3989_v58 }
 0x2cc   :  { %1976 = vmatprep.subr.bf16.mxu0 %v3898_v3 }
 0x2cf   :  { %1977 = vmatpush1.bf16.msra.mxu0 %v3896_v4 }
 0x2d0   :  { %1978 = vmatprep.subr.bf16.mxu0 %v3901_v5 }
 0x2d2   :  { %1827 = vmatmul.mubr.bf16.gmra.mrb[64].mxu0 %v4264_v19  ;;  %v3914_v19 = vld [vmem:[#allocation5 + $0x480] ss:$8 sps:$4 sm:$0xff]  }
 0x2d3   :  { %1979 = vmatpush1.bf16.msra.mxu0 %v3899_v7  ;;  %2002 = vmatprep.mubr.bf16.mxu0 %v3989_v58 }
 0x2d4   :  { %1980 = vmatprep.subr.bf16.mxu0 %v3904_v8 }
 0x2d7   :  { %1981 = vmatpush1.bf16.msra.mxu0 %v3902_v9 }
 0x2d8   :  { %1982 = vmatprep.subr.bf16.mxu0 %v3907_v11 }
 0x2db   :  { %1983 = vmatpush1.bf16.msra.mxu0 %v3905_v31 }
 0x2dc   :  { %1984 = vmatprep.subr.bf16.mxu0 %v3910_v12 }
 0x2df   :  { %1985 = vmatpush1.bf16.msra.mxu0 %v3908_v6 }
 0x2e0   :  { %2152 = vmatprep.subr.bf16.mxu0 %v3913_v10 }
 0x2e2   :  { %2003 = vmatmul.mubr.bf16.vlgmr.msra.gmra.mrb[40].mxu0 %v4294_v50  ;;  %v3923_v50 = vld [vmem:[#allocation5 + $0x4b0] ss:$8 sps:$4 sm:$0xff]  }
 0x2e3   :  { %2153 = vmatpush1.bf16.msra.mxu0 %v3911_v13  ;;  %2012 = vmatprep.mubr.bf16.mxu0 %v3989_v58 }
 0x2e4   :  { %2154 = vmatprep.subr.bf16.mxu0 %v3916_v16 }
 0x2e7   :  { %2155 = vmatpush1.bf16.msra.mxu0 %v3914_v19 }
 0x2e8   :  { %2156 = vmatprep.subr.bf16.mxu0 %v3919_v17 }
 0x2ea   :  { %2013 = vmatmul.mubr.bf16.gmra.mrb[44].mxu0 %v4305_v55  ;;  %v3929_v55 = vld [vmem:[#allocation5 + $0x4d0] ss:$8 sps:$4 sm:$0xff]  }
 0x2eb   :  { %2157 = vmatpush1.bf16.msra.mxu0 %v3917_v30  ;;  %2022 = vmatprep.mubr.bf16.mxu0 %v3989_v58 }
 0x2ec   :  { %2158 = vmatprep.subr.bf16.mxu0 %v3922_v18 }
 0x2ef   :  { %2159 = vmatpush1.bf16.msra.mxu0 %v3920_v20 }
 0x2f0   :  { %2160 = vmatprep.subr.bf16.mxu0 %v3925_v21 }
 0x2f2   :  { %2023 = vmatmul.mubr.bf16.gmra.mrb[68].mxu0 %v4296_v0 }
 0x2f3   :  { %2161 = vmatpush1.bf16.msra.mxu0 %v3923_v50  ;;  %2184 = vmatprep.mubr.bf16.mxu0 %v3989_v58 }
 0x2f4   :  { %2162 = vmatprep.subr.bf16.mxu0 %v3928_v23 }
 0x2f7   :  { %2163 = vmatpush1.bf16.msra.mxu0 %v3926_v24 }
 0x2f8   :  { %2164 = vmatprep.subr.bf16.mxu0 %v3931_v51 }
 0x2fb   :  { %2165 = vmatpush1.bf16.msra.mxu0 %v3929_v55 }
 0x2fc   :  { %2166 = vmatprep.subr.bf16.mxu0 %v3934_v25 }
 0x2ff   :  { %2167 = vmatpush1.bf16.msra.mxu0 %v3932_v26 }
 0x302   :  { %2185 = vmatmul.mubr.bf16.vlgmr.msra.gmra.mrb[40].mxu0 %v4289_v47 }
 0x303   :  { %2194 = vmatprep.mubr.bf16.mxu0 %v3989_v58 }
 0x30a   :  { %2195 = vmatmul.mubr.bf16.gmra.mrb[44].mxu0 %v4300_v52 }
 0x30b   :  { %2204 = vmatprep.mubr.bf16.mxu0 %v3989_v58 }
 0x312   :  { %2205 = vmatmul.mubr.bf16.gmra.mrb[72].mxu0 %v4291_v48 }
 0x325   :  { %v1139_v0 = vpop.f32.mrb[48].mxu0 }
 0x326   :  { %v1141_v27 = vpop.f32.mrb[49].mxu0 }
 0x327   :  { %v1143_v29 = vpop.f32.mrb[50].mxu0 }
 0x328   :  { %v1144_v32 = vpop.f32.mrb[51].mxu0 }
 0x345   :  { %v1280_v33 = vpop.f32.mrb[52].mxu0 }
 0x346   :  { %v1281_v56 = vadd.f32 %v1280_v33, %v1139_v0  ;;  %v1282_v35 = vpop.f32.mrb[53].mxu0 }
 0x347   :  { %v1284_v36 = vpop.f32.mrb[54].mxu0 }
 0x348   :  { %v1285_v37 = vpop.f32.mrb[55].mxu0 }
 0x365   :  { %v1452_v22 = vpop.f32.mrb[56].mxu0 }
 0x366   :  { %v1467_v38 = vadd.f32 %v1452_v22, %v1281_v56  ;;  %v1454_v47 = vpop.f32.mrb[57].mxu0 }
 0x367   :  { %v1456_v39 = vpop.f32.mrb[58].mxu0 }
 0x368   :  { %v1457_v40 = vpop.f32.mrb[59].mxu0 }
 0x385   :  { %v1647_v42 = vpop.f32.mrb[60].mxu0 }
 0x386   :  { %v1662_v52 = vadd.f32 %v1647_v42, %v1467_v38  ;;  %v1649_v41 = vpop.f32.mrb[61].mxu0 }
 0x387   :  { %v1651_v58 = vpop.f32.mrb[62].mxu0 }
 0x388   :  { %v1652_v14 = vpop.f32.mrb[63].mxu0 }
 0x3a5   :  { %v1828_v48 = vpop.f32.mrb[64].mxu0 }
 0x3a6   :  { %v1843_v44 = vadd.f32 %v1828_v48, %v1662_v52  ;;  %v1830_v45 = vpop.f32.mrb[65].mxu0 }
 0x3a7   :  { %v1832_v46 = vpop.f32.mrb[66].mxu0 }
 0x3a8   :  { %v1833_v28 = vpop.f32.mrb[67].mxu0 }
 0x3c5   :  { %v2024_v49 = vpop.f32.mrb[68].mxu0 }
 0x3c6   :  { %v2039_v15 = vadd.f32 %v2024_v49, %v1843_v44  ;;  %v2026_v53 = vpop.f32.mrb[69].mxu0 }
 0x3c7   :  { %v2028_v57 = vpop.f32.mrb[70].mxu0 }
 0x3c8   :  { %v2029_v43 = vpop.f32.mrb[71].mxu0 }
 0x3d5   :  { %v2186_v1 = vpop.f32.mrb[40].mxu0 }
 0x3d6   :  { %v2236_v2 = vadd.f32 %v2229_v63, %v2186_v1  ;;  %v2188_v3 = vpop.f32.mrb[41].mxu0 }
 0x3d7   :  { %v2237_v4 = vadd.f32 %v2233_v34, %v2188_v3  ;;  %v2190_v5 = vpop.f32.mrb[42].mxu0 }
 0x3d8   :  { %v2246_v7 = vmax.f32 %v2236_v2, 0.0  ;;  %v2238_v8 = vadd.f32 %v2229_v63, %v2190_v5  ;;  %v2192_v9 = vpop.f32.mrb[43].mxu0 }
 0x3d9   :  { %v2247_v11 = vmax.f32 %v2237_v4, 0.0 }
 0x3da   :  { %2256 = vst [vmem:[#allocation2] sm:$0xff] %v2246_v7  ;;  %v2248_v31 = vmax.f32 %v2238_v8, 0.0 }
 0x3db   :  { %2257 = vst [vmem:[#allocation2 + $0x8] sm:$0xff] %v2247_v11 }
 0x3dc   :  { %2258 = vst [vmem:[#allocation2 + $0x10] sm:$0xff] %v2248_v31 }
 0x3dd   :  { %v2196_v12 = vpop.f32.mrb[44].mxu0 }
 0x3de   :  { %v2240_v6 = vadd.f32 %v2229_v63, %v2196_v12  ;;  %v2198_v10 = vpop.f32.mrb[45].mxu0 }
 0x3df   :  { %v2241_v13 = vadd.f32 %v2233_v34, %v2198_v10  ;;  %v2200_v16 = vpop.f32.mrb[46].mxu0 }
 0x3e0   :  { %v2250_v19 = vmax.f32 %v2240_v6, 0.0  ;;  %v2242_v17 = vadd.f32 %v2229_v63, %v2200_v16  ;;  %v2202_v30 = vpop.f32.mrb[47].mxu0 }
 0x3e1   :  { %v2251_v18 = vmax.f32 %v2241_v13, 0.0  ;;  %v2243_v20 = vadd.f32 %v2233_v34, %v2202_v30 }
 0x3e2   :  { %2260 = vst [vmem:[#allocation2 + $0x20] sm:$0xff] %v2250_v19  ;;  %v2252_v21 = vmax.f32 %v2242_v17, 0.0 }
 0x3e3   :  { %2261 = vst [vmem:[#allocation2 + $0x28] sm:$0xff] %v2251_v18  ;;  %v2253_v50 = vmax.f32 %v2243_v20, 0.0 }
 0x3e4   :  { %2262 = vst [vmem:[#allocation2 + $0x30] sm:$0xff] %v2252_v21 }
 0x3e5   :  { %2263 = vst [vmem:[#allocation2 + $0x38] sm:$0xff] %v2253_v50  ;;  %v2206_v23 = vpop.f32.mrb[72].mxu0 }
 0x3e6   :  { %v2221_v24 = vadd.f32 %v2206_v23, %v2039_v15  ;;  %v2208_v51 = vpop.f32.mrb[73].mxu0 }
 0x3e7   :  { %v2210_v55 = vpop.f32.mrb[74].mxu0 }
 0x3e8   :  { %v2244_v25 = vadd.f32 %v2229_v63, %v2221_v24  ;;  %v2211_v26 = vpop.f32.mrb[75].mxu0 }
 0x3ea   :  { %v2254_v0 = vmax.f32 %v2244_v25, 0.0 }
 0x3ec   :  { %2264 = vst [vmem:[#allocation2 + $0x40] sm:$0xff] %v2254_v0 }
 0x3ed   :  { %3975 = dma.done.wait [#allocation4], 16384 }
 0x3ee   :  { %3976 = vsyncadd [#allocation4], 4294950912  ;;  %v4353_v27 = vld [vmem:[#allocation3 + $0x108] sm:$0xff]  ;;  %v4355_v29 = vld [vmem:[#allocation3 + $0x100] sm:$0xff]  ;;  %vm2829_vm9 = vcmask 1040384   ;;  %vm2834_vm10 = vcmask 0  }
 0x3ef   :  { %5063 = vst [vmem:[#allocation11_spill] sm:$0xff] %v4355_v29  ;;  %v4357_v32 = vld [vmem:[#allocation3 + $0x118] sm:$0xff]  ;;  %2406 = vmatprep.subr.bf16.mxu1 %v4353_v27  ;;  %v4362_v33 = vld [vmem:[#allocation3 + $0x110] sm:$0xff]  ;;  %v4364_v56 = vld [vmem:[#allocation3 + $0x128] sm:$0xff] }
 0x3f0   :  { %5064 = vst [vmem:[#allocation12_spill] sm:$0xff] %v4357_v32  ;;  %2407 = vmatpush1.bf16.msra.mxu1 %v4355_v29  ;;  %5065 = vst [vmem:[#allocation13_spill] sm:$0xff] %v4362_v33  ;;  %v4368_v35 = vld [vmem:[#allocation3 + $0x120] sm:$0xff]  ;;  %v4370_v36 = vld [vmem:[#allocation3 + $0x138] sm:$0xff] }
 0x3f1   :  { %2408 = vmatprep.subr.bf16.mxu1 %v4357_v32  ;;  %5066 = vst [vmem:[#allocation14_spill] sm:$0xff] %v4364_v56  ;;  %5067 = vst [vmem:[#allocation15_spill] sm:$0xff] %v4368_v35  ;;  %v2357_v37 = vld [vmem:[#allocation2 + $0x2] ss:$8 sm:$0x3]  ;;  %v4374_v22 = vld [vmem:[#allocation3 + $0x130] sm:$0xff] }
 0x3f2   :  { %5068 = vst [vmem:[#allocation16_spill] sm:$0xff] %v4370_v36  ;;  %5069 = vst [vmem:[#allocation17_spill] sm:$0xff] %v4374_v22  ;;  %v2359_v38 = vld [vmem:[#allocation2 + $0x3] ss:$8 sm:$0x3]  ;;  %v4383_v52 = vld [vmem:[#allocation3 + $0x158] sm:$0xff] }
 0x3f3   :  { %v4376_v47 = vld [vmem:[#allocation3 + $0x148] sm:$0xff]  ;;  %v2360_v39 = vmax.f32 %v2357_v37, %v2359_v38  ;;  %v4381_v42 = vld [vmem:[#allocation3 + $0x140] sm:$0xff]  ;;  %5072 = vst [vmem:[#allocation20_spill] sm:$0xff] %v4383_v52  ;;  %v4387_v58 = vld [vmem:[#allocation3 + $0x150] sm:$0xff] }
 0x3f4   :  { %2409 = vmatpush1.bf16.msra.mxu1 %v4362_v33  ;;  %5070 = vst [vmem:[#allocation18_spill] sm:$0xff] %v4376_v47  ;;  %5071 = vst [vmem:[#allocation19_spill] sm:$0xff] %v4381_v42  ;;  %v4389_v14 = vld [vmem:[#allocation3 + $0x168] sm:$0xff]  ;;  %v4393_v48 = vld [vmem:[#allocation3 + $0x160] sm:$0xff] }
 0x3f5   :  { %2410 = vmatprep.subr.bf16.mxu1 %v4364_v56  ;;  %v2401_v40 = vrot.slane %v2360_v39, %v4349_v62  ;;  %5073 = vst [vmem:[#allocation21_spill] sm:$0xff] %v4387_v58  ;;  %5074 = vst [vmem:[#allocation22_spill] sm:$0xff] %v4389_v14  ;;  %v4395_v44 = vld [vmem:[#allocation3 + $0x178] sm:$0xff]  ;;  %v4399_v45 = vld [vmem:[#allocation3 + $0x170] sm:$0xff]  ;;  %v2397_v8 = vrot.slane %v2360_v39, %v4344_v60 }
 0x3f6   :  { %5075 = vst [vmem:[#allocation23_spill] sm:$0xff] %v4393_v48  ;;  %5076 = vst [vmem:[#allocation24_spill] sm:$0xff] %v4395_v44  ;;  %v4401_v46 = vld [vmem:[#allocation3 + $0x188] sm:$0xff]  ;;  %v4404_v28 = vld [vmem:[#allocation3 + $0x180] sm:$0xff] }
 0x3f7   :  { %v2405_v41 = vpack.c.bf16 %v2401_v40, %v2401_v40  ;;  %5077 = vst [vmem:[#allocation25_spill] sm:$0xff] %v4399_v45  ;;  %5078 = vst [vmem:[#allocation26_spill] sm:$0xff] %v4401_v46  ;;  %v4407_v49 = vld [vmem:[#allocation3 + $0x198] sm:$0xff]  ;;  %v4410_v15 = vld [vmem:[#allocation3 + $0x190] sm:$0xff]  ;;  %v2404_v12 = vpack.c.bf16 %v2397_v8, %v2397_v8 }
 0x3f8   :  { %2411 = vmatpush1.bf16.msra.mxu1 %v4368_v35  ;;  %5079 = vst [vmem:[#allocation27_spill] sm:$0xff] %v4404_v28  ;;  %5080 = vst [vmem:[#allocation28_spill] sm:$0xff] %v4407_v49  ;;  %v4413_v53 = vld [vmem:[#allocation3 + $0x1a8] sm:$0xff]  ;;  %v4416_v54 = vld [vmem:[#allocation3 + $0x1a0] sm:$0xff] }
 0x3f9   :  { %2412 = vmatprep.subr.bf16.mxu1 %v4370_v36  ;;  %2438 = vmatprep.mubr.bf16.mxu1 %v2405_v41  ;;  %5081 = vst [vmem:[#allocation29_spill] sm:$0xff] %v4410_v15  ;;  %5082 = vst [vmem:[#allocation30_spill] sm:$0xff] %v4413_v53  ;;  %v4419_v57 = vld [vmem:[#allocation3 + $0x1b8] sm:$0xff]  ;;  %v4423_v43 = vld [vmem:[#allocation3 + $0x1b0] sm:$0xff] }
 0x3fa   :  { %5083 = vst [vmem:[#allocation31_spill] sm:$0xff] %v4416_v54  ;;  %5084 = vst [vmem:[#allocation32_spill] sm:$0xff] %v4419_v57  ;;  %v4425_v59 = vld [vmem:[#allocation3 + $0x1c8] sm:$0xff]  ;;  %v4429_v61 = vld [vmem:[#allocation3 + $0x1c0] sm:$0xff] }
 0x3fb   :  { %5085 = vst [vmem:[#allocation33_spill] sm:$0xff] %v4423_v43  ;;  %5086 = vst [vmem:[#allocation34_spill] sm:$0xff] %v4425_v59  ;;  %v4431_v63 = vld [vmem:[#allocation3 + $0x1d8] sm:$0xff]  ;;  %v4434_v34 = vld [vmem:[#allocation3 + $0x1d0] sm:$0xff] }
 0x3fc   :  { %2413 = vmatpush1.bf16.msra.mxu1 %v4374_v22  ;;  %5087 = vst [vmem:[#allocation35_spill] sm:$0xff] %v4429_v61  ;;  %5088 = vst [vmem:[#allocation36_spill] sm:$0xff] %v4431_v63  ;;  %v2307_v1 = vld [vmem:[#allocation2] ss:$8 sm:$0x3]  ;;  %v4445_v7 = vld [vmem:[#allocation3 + $0x1f8] sm:$0xff] }
 0x3fd   :  { %2414 = vmatprep.subr.bf16.mxu1 %v4376_v47  ;;  %5089 = vst [vmem:[#allocation37_spill] sm:$0xff] %v4434_v34  ;;  %v2309_v2 = vld [vmem:[#allocation2 + $0x1] ss:$8 sm:$0x3]  ;;  %5092 = vst [vmem:[#allocation40_spill] sm:$0xff] %v4445_v7  ;;  %v4452_v11 = vld [vmem:[#allocation3 + $0x1f0] sm:$0xff] }
 0x3fe   :  { %v4437_v3 = vld [vmem:[#allocation3 + $0x1e8] sm:$0xff]  ;;  %v4440_v4 = vmax.f32 %v2307_v1, %v2309_v2  ;;  %v4443_v5 = vld [vmem:[#allocation3 + $0x1e0] sm:$0xff]  ;;  %5093 = vst [vmem:[#allocation41_spill] sm:$0xff] %v4452_v11  ;;  %v4460_v13 = vld [vmem:[#allocation3 + $0x18] sm:$0xff] }
 0x3ff   :  { %5090 = vst [vmem:[#allocation38_spill] sm:$0xff] %v4437_v3  ;;  %5091 = vst [vmem:[#allocation39_spill] sm:$0xff] %v4443_v5  ;;  %v4454_v31 = vld [vmem:[#allocation3 + $0x8] sm:$0xff]  ;;  %v4458_v10 = vld [vmem:[#allocation3] sm:$0xff] }
 0x400   :  { %2415 = vmatpush1.bf16.msra.mxu1 %v4381_v42  ;;  %v2351_v9 = vrot.slane %v4440_v4, %v4349_v62  ;;  %v4464_v16 = vld [vmem:[#allocation3 + $0x10] sm:$0xff]  ;;  %v4466_v19 = vld [vmem:[#allocation3 + $0x28] sm:$0xff]  ;;  %v4470_v17 = vld [vmem:[#allocation3 + $0x20] sm:$0xff] }
 0x401   :  { %2416 = vmatprep.subr.bf16.mxu1 %v4383_v52  ;;  %v4472_v30 = vld [vmem:[#allocation3 + $0x38] sm:$0xff]  ;;  %v4476_v18 = vld [vmem:[#allocation3 + $0x30] sm:$0xff]  ;;  %v4478_v20 = vld [vmem:[#allocation3 + $0x48] sm:$0xff] }
 0x402   :  { %v2355_v6 = vpack.c.bf16 %v2351_v9, %v2351_v9  ;;  %v4482_v21 = vld [vmem:[#allocation3 + $0x40] sm:$0xff]  ;;  %v4484_v50 = vld [vmem:[#allocation3 + $0x58] sm:$0xff]  ;;  %v4488_v23 = vld [vmem:[#allocation3 + $0x50] sm:$0xff] }
 0x403   :  { %v4490_v24 = vld [vmem:[#allocation3 + $0x68] sm:$0xff]  ;;  %v4494_v51 = vld [vmem:[#allocation3 + $0x60] sm:$0xff]  ;;  %v4496_v55 = vld [vmem:[#allocation3 + $0x78] sm:$0xff] }
 0x404   :  { %2417 = vmatpush1.bf16.msra.mxu1 %v4387_v58  ;;  %v4500_v25 = vld [vmem:[#allocation3 + $0x70] sm:$0xff]  ;;  %v4502_v26 = vld [vmem:[#allocation3 + $0x88] sm:$0xff]  ;;  %v4506_v0 = vld [vmem:[#allocation3 + $0x80] sm:$0xff] }
 0x405   :  { %2418 = vmatprep.subr.bf16.mxu1 %v4389_v14  ;;  %v4508_v37 = vld [vmem:[#allocation3 + $0x98] sm:$0xff]  ;;  %v4512_v38 = vld [vmem:[#allocation3 + $0x90] sm:$0xff]  ;;  %v4514_v39 = vld [vmem:[#allocation3 + $0xa8] sm:$0xff] }
 0x406   :  { %v4518_v40 = vld [vmem:[#allocation3 + $0xa0] sm:$0xff]  ;;  %v4520_v41 = vld [vmem:[#allocation3 + $0xb8] sm:$0xff]  ;;  %v4524_v1 = vld [vmem:[#allocation3 + $0xb0] sm:$0xff] }
 0x407   :  { %v4526_v2 = vld [vmem:[#allocation3 + $0xc8] sm:$0xff]  ;;  %v4530_v8 = vld [vmem:[#allocation3 + $0xc0] sm:$0xff]  ;;  %v4532_v9 = vld [vmem:[#allocation3 + $0xd8] sm:$0xff] }
 0x408   :  { %2419 = vmatpush1.bf16.msra.mxu1 %v4393_v48  ;;  %v4704_v48 = vld [vmem:[#allocation3 + $0x370] sm:$0xff]  ;;  %v4706_v14 = vld [vmem:[#allocation3 + $0x388] sm:$0xff]  ;;  %v4710_v58 = vld [vmem:[#allocation3 + $0x380] sm:$0xff] }
 0x409   :  { %2420 = vmatprep.subr.bf16.mxu1 %v4395_v44  ;;  %v4700_v44 = vld [vmem:[#allocation3 + $0x378] sm:$0xff]  ;;  %v4716_v42 = vld [vmem:[#allocation3 + $0x390] sm:$0xff]  ;;  %v4718_v47 = vld [vmem:[#allocation3 + $0x3a8] sm:$0xff] }
 0x40a   :  { %v4712_v52 = vld [vmem:[#allocation3 + $0x398] sm:$0xff]  ;;  %v4722_v22 = vld [vmem:[#allocation3 + $0x3a0] sm:$0xff]  ;;  %v4728_v35 = vld [vmem:[#allocation3 + $0x3b0] sm:$0xff] }
 0x40b   :  { %5126 = vst [vmem:[#allocation74_spill] sm:$0xff] %v4722_v22  ;;  %v4724_v36 = vld [vmem:[#allocation3 + $0x3b8] sm:$0xff]  ;;  %5128 = vst [vmem:[#allocation76_spill] sm:$0xff] %v4728_v35  ;;  %v4730_v56 = vld [vmem:[#allocation3 + $0x3c8] sm:$0xff] }
 0x40c   :  { %2421 = vmatpush1.bf16.msra.mxu1 %v4399_v45  ;;  %v4698_v45 = vld [vmem:[#allocation3 + $0x360] sm:$0xff]  ;;  %5127 = vst [vmem:[#allocation75_spill] sm:$0xff] %v4724_v36  ;;  %5129 = vst [vmem:[#allocation77_spill] sm:$0xff] %v4730_v56  ;;  %v4736_v32 = vld [vmem:[#allocation3 + $0x3d8] sm:$0xff] }
 0x40d   :  { %2422 = vmatprep.subr.bf16.mxu1 %v4401_v46  ;;  %v4694_v46 = vld [vmem:[#allocation3 + $0x368] sm:$0xff]  ;;  %v4734_v33 = vld [vmem:[#allocation3 + $0x3c0] sm:$0xff]  ;;  %5131 = vst [vmem:[#allocation79_spill] sm:$0xff] %v4736_v32  ;;  %v4740_v29 = vld [vmem:[#allocation3 + $0x3d0] sm:$0xff] }
 0x40e   :  { %5130 = vst [vmem:[#allocation78_spill] sm:$0xff] %v4734_v33 }
 0x410   :  { %2423 = vmatpush1.bf16.msra.mxu1 %v4404_v28  ;;  %v4692_v28 = vld [vmem:[#allocation3 + $0x350] sm:$0xff] }
 0x411   :  { %2424 = vmatprep.subr.bf16.mxu1 %v4407_v49  ;;  %v4688_v49 = vld [vmem:[#allocation3 + $0x358] sm:$0xff] }
 0x414   :  { %2425 = vmatpush1.bf16.msra.mxu1 %v4410_v15  ;;  %v4656_v15 = vld [vmem:[#allocation3 + $0x2f0] sm:$0xff] }
 0x415   :  { %2426 = vmatprep.subr.bf16.mxu1 %v4413_v53  ;;  %v4568_v53 = vld [vmem:[#allocation3 + $0x228] sm:$0xff]  ;;  %5125 = vst [vmem:[#allocation73_spill] sm:$0xff] %v4656_v15 }
 0x416   :  { %5098 = vst [vmem:[#allocation46_spill] sm:$0xff] %v4568_v53 }
 0x418   :  { %2427 = vmatpush1.bf16.msra.mxu1 %v4416_v54  ;;  %v4566_v54 = vld [vmem:[#allocation3 + $0x210] sm:$0xff] }
 0x419   :  { %2428 = vmatprep.subr.bf16.mxu1 %v4419_v57  ;;  %v4560_v57 = vld [vmem:[#allocation3 + $0x200] sm:$0xff]  ;;  %5097 = vst [vmem:[#allocation45_spill] sm:$0xff] %v4566_v54 }
 0x41a   :  { %5095 = vst [vmem:[#allocation43_spill] sm:$0xff] %v4560_v57 }
 0x41c   :  { %2429 = vmatpush1.bf16.msra.mxu1 %v4423_v43 }
 0x41d   :  { %2430 = vmatprep.subr.bf16.mxu1 %v4425_v59  ;;  %v4554_v59 = vld [vmem:[#allocation3 + $0xf0] sm:$0xff] }
 0x420   :  { %2431 = vmatpush1.bf16.msra.mxu1 %v4429_v61 }
 0x421   :  { %2432 = vmatprep.subr.bf16.mxu1 %v4431_v63  ;;  %v2347_v63 = vrot.slane %v4440_v4, %v4344_v60  ;;  %v4562_v4 = vld [vmem:[#allocation3 + $0x218] sm:$0xff] }
 0x422   :  { %5096 = vst [vmem:[#allocation44_spill] sm:$0xff] %v4562_v4 }
 0x424   :  { %2433 = vmatpush1.bf16.msra.mxu1 %v4434_v34  ;;  %v4546_v34 = vld [vmem:[#allocation3 + $0xf8] sm:$0xff] }
 0x425   :  { %2434 = vmatprep.subr.bf16.mxu1 %v4437_v3  ;;  %v4544_v3 = vld [vmem:[#allocation3 + $0xe0] sm:$0xff] }
 0x428   :  { %2435 = vmatpush1.bf16.msra.mxu1 %v4443_v5 }
 0x429   :  { %2436 = vmatprep.subr.bf16.mxu1 %v4445_v7  ;;  %v4538_v7 = vld [vmem:[#allocation3 + $0xe8] sm:$0xff] }
 0x42c   :  { %2437 = vmatpush1.bf16.msra.mxu1 %v4452_v11  ;;  %v2491_v11 = vld [vmem:[#allocation2 + $0x5] ss:$8 sm:$0x3] }
 0x42d   :  { %2447 = vmatprep.subr.bf16.mxu1 %v4454_v31 }
 0x42f   :  { %2439 = vmatmul.mubr.bf16.vlgmr.msra.gmra.mrb[56].mxu1 %v2404_v12  ;;  %v4535_v12 = vld [vmem:[#allocation3 + $0xd0] sm:$0xff] }
 0x430   :  { %2448 = vmatpush1.bf16.msra.mxu1 %v4458_v10  ;;  %2479 = vmatprep.mubr.bf16.mxu1 %v2355_v6  ;;  %v2489_v6 = vld [vmem:[#allocation2 + $0x4] ss:$8 sm:$0x3] }
 0x431   :  { %2449 = vmatprep.subr.bf16.mxu1 %v4460_v13  ;;  %v4541_v5 = vmax.f32 %v2489_v6, %v2491_v11  ;;  %v4556_v11 = vld [vmem:[#allocation3 + $0x208] sm:$0xff]  ;;  %v2354_v6 = vpack.c.bf16 %v2347_v63, %v2347_v63  ;;  %v4574_v63 = vld [vmem:[#allocation3 + $0x238] sm:$0xff] }
 0x432   :  { %5094 = vst [vmem:[#allocation42_spill] sm:$0xff] %v4556_v11  ;;  %5100 = vst [vmem:[#allocation48_spill] sm:$0xff] %v4574_v63 }
 0x433   :  { %v2533_v61 = vrot.slane %v4541_v5, %v4349_v62 }
 0x434   :  { %2450 = vmatpush1.bf16.msra.mxu1 %v4464_v16 }
 0x435   :  { %2451 = vmatprep.subr.bf16.mxu1 %v4466_v19  ;;  %v2537_v43 = vpack.c.bf16 %v2533_v61, %v2533_v61  ;;  %v4572_v61 = vld [vmem:[#allocation3 + $0x220] sm:$0xff] }
 0x436   :  { %5099 = vst [vmem:[#allocation47_spill] sm:$0xff] %v4572_v61 }
 0x438   :  { %2452 = vmatpush1.bf16.msra.mxu1 %v4470_v17 }
 0x439   :  { %2453 = vmatprep.subr.bf16.mxu1 %v4472_v30 }
 0x43c   :  { %2454 = vmatpush1.bf16.msra.mxu1 %v4476_v18 }
 0x43d   :  { %2455 = vmatprep.subr.bf16.mxu1 %v4478_v20 }
 0x440   :  { %2456 = vmatpush1.bf16.msra.mxu1 %v4482_v21 }
 0x441   :  { %2457 = vmatprep.subr.bf16.mxu1 %v4484_v50 }
 0x444   :  { %2458 = vmatpush1.bf16.msra.mxu1 %v4488_v23 }
 0x445   :  { %2459 = vmatprep.subr.bf16.mxu1 %v4490_v24 }
 0x448   :  { %2460 = vmatpush1.bf16.msra.mxu1 %v4494_v51 }
 0x449   :  { %2461 = vmatprep.subr.bf16.mxu1 %v4496_v55 }
 0x44c   :  { %2462 = vmatpush1.bf16.msra.mxu1 %v4500_v25 }
 0x44d   :  { %2463 = vmatprep.subr.bf16.mxu1 %v4502_v26 }
 0x450   :  { %2464 = vmatpush1.bf16.msra.mxu1 %v4506_v0 }
 0x451   :  { %2465 = vmatprep.subr.bf16.mxu1 %v4508_v37 }
 0x454   :  { %2466 = vmatpush1.bf16.msra.mxu1 %v4512_v38 }
 0x455   :  { %2467 = vmatprep.subr.bf16.mxu1 %v4514_v39 }
 0x458   :  { %2468 = vmatpush1.bf16.msra.mxu1 %v4518_v40 }
 0x459   :  { %2469 = vmatprep.subr.bf16.mxu1 %v4520_v41 }
 0x45c   :  { %2470 = vmatpush1.bf16.msra.mxu1 %v4524_v1 }
 0x45d   :  { %2471 = vmatprep.subr.bf16.mxu1 %v4526_v2 }
 0x460   :  { %2472 = vmatpush1.bf16.msra.mxu1 %v4530_v8 }
 0x461   :  { %2473 = vmatprep.subr.bf16.mxu1 %v4532_v9 }
 0x464   :  { %2474 = vmatpush1.bf16.msra.mxu1 %v4535_v12 }
 0x465   :  { %2475 = vmatprep.subr.bf16.mxu1 %v4538_v7 }
 0x468   :  { %2476 = vmatpush1.bf16.msra.mxu1 %v4544_v3 }
 0x469   :  { %2477 = vmatprep.subr.bf16.mxu1 %v4546_v34 }
 0x46c   :  { %2478 = vmatpush1.bf16.msra.mxu1 %v4554_v59 }
 0x46d   :  { %2538 = vmatprep.subr.bf16.mxu1 %v4556_v11 }
 0x46f   :  { %2480 = vmatmul.mubr.bf16.vlgmr.msra.gmra.mrb[60].mxu1 %v2354_v6  ;;  %v4578_v6 = vld [vmem:[#allocation3 + $0x230] sm:$0xff] }
 0x470   :  { %2539 = vmatpush1.bf16.msra.mxu1 %v4560_v57  ;;  %2570 = vmatprep.mubr.bf16.mxu1 %v2537_v43  ;;  %5101 = vst [vmem:[#allocation49_spill] sm:$0xff] %v4578_v6  ;;  %v4580_v43 = vld [vmem:[#allocation3 + $0x248] sm:$0xff] }
 0x471   :  { %2540 = vmatprep.subr.bf16.mxu1 %v4562_v4  ;;  %5102 = vst [vmem:[#allocation50_spill] sm:$0xff] %v4580_v43  ;;  %v4584_v4 = vld [vmem:[#allocation3 + $0x240] sm:$0xff]  ;;  %v4640_v57 = vld [vmem:[#allocation3 + $0x2e8] sm:$0xff] }
 0x472   :  { %5103 = vst [vmem:[#allocation51_spill] sm:$0xff] %v4584_v4  ;;  %5122 = vst [vmem:[#allocation70_spill] sm:$0xff] %v4640_v57 }
 0x474   :  { %2541 = vmatpush1.bf16.msra.mxu1 %v4566_v54  ;;  %v4586_v54 = vld [vmem:[#allocation3 + $0x258] sm:$0xff] }
 0x475   :  { %2542 = vmatprep.subr.bf16.mxu1 %v4568_v53  ;;  %5104 = vst [vmem:[#allocation52_spill] sm:$0xff] %v4586_v54  ;;  %v4590_v53 = vld [vmem:[#allocation3 + $0x250] sm:$0xff] }
 0x476   :  { %5105 = vst [vmem:[#allocation53_spill] sm:$0xff] %v4590_v53 }
 0x478   :  { %2543 = vmatpush1.bf16.msra.mxu1 %v4572_v61  ;;  %v4592_v61 = vld [vmem:[#allocation3 + $0x268] sm:$0xff] }
 0x479   :  { %2544 = vmatprep.subr.bf16.mxu1 %v4574_v63  ;;  %5106 = vst [vmem:[#allocation54_spill] sm:$0xff] %v4592_v61  ;;  %v4596_v63 = vld [vmem:[#allocation3 + $0x260] sm:$0xff] }
 0x47a   :  { %5107 = vst [vmem:[#allocation55_spill] sm:$0xff] %v4596_v63 }
 0x47c   :  { %2545 = vmatpush1.bf16.msra.mxu1 %v4578_v6  ;;  %v4598_v6 = vld [vmem:[#allocation3 + $0x278] sm:$0xff] }
 0x47d   :  { %2546 = vmatprep.subr.bf16.mxu1 %v4580_v43  ;;  %5108 = vst [vmem:[#allocation56_spill] sm:$0xff] %v4598_v6  ;;  %v4602_v43 = vld [vmem:[#allocation3 + $0x270] sm:$0xff] }
 0x47e   :  { %5109 = vst [vmem:[#allocation57_spill] sm:$0xff] %v4602_v43 }
 0x480   :  { %2547 = vmatpush1.bf16.msra.mxu1 %v4584_v4  ;;  %v4604_v4 = vld [vmem:[#allocation3 + $0x288] sm:$0xff] }
 0x481   :  { %2548 = vmatprep.subr.bf16.mxu1 %v4586_v54  ;;  %5110 = vst [vmem:[#allocation58_spill] sm:$0xff] %v4604_v4  ;;  %v4608_v54 = vld [vmem:[#allocation3 + $0x280] sm:$0xff] }
 0x482   :  { %5111 = vst [vmem:[#allocation59_spill] sm:$0xff] %v4608_v54 }
 0x484   :  { %2549 = vmatpush1.bf16.msra.mxu1 %v4590_v53  ;;  %v4610_v53 = vld [vmem:[#allocation3 + $0x298] sm:$0xff] }
 0x485   :  { %2550 = vmatprep.subr.bf16.mxu1 %v4592_v61  ;;  %5112 = vst [vmem:[#allocation60_spill] sm:$0xff] %v4610_v53  ;;  %v4614_v61 = vld [vmem:[#allocation3 + $0x290] sm:$0xff] }
 0x486   :  { %5113 = vst [vmem:[#allocation61_spill] sm:$0xff] %v4614_v61 }
 0x488   :  { %2551 = vmatpush1.bf16.msra.mxu1 %v4596_v63  ;;  %v4616_v63 = vld [vmem:[#allocation3 + $0x2a8] sm:$0xff] }
 0x489   :  { %2552 = vmatprep.subr.bf16.mxu1 %v4598_v6  ;;  %5114 = vst [vmem:[#allocation62_spill] sm:$0xff] %v4616_v63  ;;  %v4620_v6 = vld [vmem:[#allocation3 + $0x2a0] sm:$0xff] }
 0x48a   :  { %5115 = vst [vmem:[#allocation63_spill] sm:$0xff] %v4620_v6 }
 0x48c   :  { %2553 = vmatpush1.bf16.msra.mxu1 %v4602_v43  ;;  %v4622_v43 = vld [vmem:[#allocation3 + $0x2b8] sm:$0xff] }
 0x48d   :  { %2554 = vmatprep.subr.bf16.mxu1 %v4604_v4  ;;  %5116 = vst [vmem:[#allocation64_spill] sm:$0xff] %v4622_v43  ;;  %v4626_v4 = vld [vmem:[#allocation3 + $0x2b0] sm:$0xff] }
 0x48e   :  { %5117 = vst [vmem:[#allocation65_spill] sm:$0xff] %v4626_v4 }
 0x490   :  { %2555 = vmatpush1.bf16.msra.mxu1 %v4608_v54  ;;  %v4628_v54 = vld [vmem:[#allocation3 + $0x2c8] sm:$0xff] }
 0x491   :  { %2556 = vmatprep.subr.bf16.mxu1 %v4610_v53  ;;  %5118 = vst [vmem:[#allocation66_spill] sm:$0xff] %v4628_v54  ;;  %v4632_v53 = vld [vmem:[#allocation3 + $0x2c0] sm:$0xff] }
 0x492   :  { %5119 = vst [vmem:[#allocation67_spill] sm:$0xff] %v4632_v53 }
 0x494   :  { %2557 = vmatpush1.bf16.msra.mxu1 %v4614_v61  ;;  %v4634_v61 = vld [vmem:[#allocation3 + $0x2d8] sm:$0xff] }
 0x495   :  { %2558 = vmatprep.subr.bf16.mxu1 %v4616_v63  ;;  %5120 = vst [vmem:[#allocation68_spill] sm:$0xff] %v4634_v61  ;;  %v4637_v63 = vld [vmem:[#allocation3 + $0x2d0] sm:$0xff] }
 0x496   :  { %5121 = vst [vmem:[#allocation69_spill] sm:$0xff] %v4637_v63 }
 0x498   :  { %2559 = vmatpush1.bf16.msra.mxu1 %v4620_v6  ;;  %v2582_v6 = vld [vmem:[#allocation2 + $0x6] ss:$8 sm:$0x3] }
 0x499   :  { %2560 = vmatprep.subr.bf16.mxu1 %v4622_v43  ;;  %v2584_v43 = vld [vmem:[#allocation2 + $0x7] ss:$8 sm:$0x3] }
 0x49a   :  { %v4643_v11 = vmax.f32 %v2582_v6, %v2584_v43  ;;  %v4658_v6 = vld [vmem:[#allocation3 + $0x308] sm:$0xff] }
 0x49c   :  { %2561 = vmatpush1.bf16.msra.mxu1 %v4626_v4  ;;  %v4648_v4 = vld [vmem:[#allocation3 + $0x2f8] sm:$0xff] }
 0x49d   :  { %2562 = vmatprep.subr.bf16.mxu1 %v4628_v54  ;;  %v4646_v54 = vld [vmem:[#allocation3 + $0x2e0] sm:$0xff]  ;;  %5124 = vst [vmem:[#allocation72_spill] sm:$0xff] %v4648_v4 }
 0x49e   :  { %5123 = vst [vmem:[#allocation71_spill] sm:$0xff] %v4646_v54 }
 0x4a0   :  { %2563 = vmatpush1.bf16.msra.mxu1 %v4632_v53  ;;  %v2529_v53 = vrot.slane %v4541_v5, %v4344_v60  ;;  %v4664_v5 = vld [vmem:[#allocation3 + $0x318] sm:$0xff] }
 0x4a1   :  { %2564 = vmatprep.subr.bf16.mxu1 %v4634_v61  ;;  %v2626_v61 = vrot.slane %v4643_v11, %v4349_v62 }
 0x4a2   :  { %v2536_v43 = vpack.c.bf16 %v2529_v53, %v2529_v53  ;;  %v4674_v53 = vld [vmem:[#allocation3 + $0x320] sm:$0xff] }
 0x4a4   :  { %2565 = vmatpush1.bf16.msra.mxu1 %v4637_v63  ;;  %v4662_v63 = vld [vmem:[#allocation3 + $0x300] sm:$0xff] }
 0x4a5   :  { %2566 = vmatprep.subr.bf16.mxu1 %v4640_v57  ;;  %v2630_v57 = vpack.c.bf16 %v2626_v61, %v2626_v61  ;;  %v4676_v61 = vld [vmem:[#allocation3 + $0x338] sm:$0xff] }
 0x4a8   :  { %2567 = vmatpush1.bf16.msra.mxu1 %v4646_v54  ;;  %v4670_v54 = vld [vmem:[#allocation3 + $0x328] sm:$0xff] }
 0x4a9   :  { %2568 = vmatprep.subr.bf16.mxu1 %v4648_v4  ;;  %v4668_v4 = vld [vmem:[#allocation3 + $0x310] sm:$0xff] }
 0x4ac   :  { %2569 = vmatpush1.bf16.msra.mxu1 %v4656_v15  ;;  %v4686_v15 = vld [vmem:[#allocation3 + $0x340] sm:$0xff] }
 0x4ad   :  { %2631 = vmatprep.subr.bf16.mxu1 %v4658_v6 }
 0x4af   :  { %2571 = vmatmul.mubr.bf16.vlgmr.msra.gmra.mrb[64].mxu1 %v2536_v43  ;;  %v4680_v43 = vld [vmem:[#allocation3 + $0x330] sm:$0xff] }
 0x4b0   :  { %2632 = vmatpush1.bf16.msra.mxu1 %v4662_v63  ;;  %2663 = vmatprep.mubr.bf16.mxu1 %v2630_v57  ;;  %v4682_v57 = vld [vmem:[#allocation3 + $0x348] sm:$0xff] }
 0x4b1   :  { %2633 = vmatprep.subr.bf16.mxu1 %v4664_v5 }
 0x4b4   :  { %2634 = vmatpush1.bf16.msra.mxu1 %v4668_v4 }
 0x4b5   :  { %2635 = vmatprep.subr.bf16.mxu1 %v4670_v54 }
 0x4b8   :  { %2636 = vmatpush1.bf16.msra.mxu1 %v4674_v53 }
 0x4b9   :  { %2637 = vmatprep.subr.bf16.mxu1 %v4676_v61 }
 0x4bc   :  { %2638 = vmatpush1.bf16.msra.mxu1 %v4680_v43 }
 0x4bd   :  { %2639 = vmatprep.subr.bf16.mxu1 %v4682_v57 }
 0x4c0   :  { %2640 = vmatpush1.bf16.msra.mxu1 %v4686_v15 }
 0x4c1   :  { %2641 = vmatprep.subr.bf16.mxu1 %v4688_v49 }
 0x4c4   :  { %2642 = vmatpush1.bf16.msra.mxu1 %v4692_v28 }
 0x4c5   :  { %2643 = vmatprep.subr.bf16.mxu1 %v4694_v46 }
 0x4c8   :  { %2644 = vmatpush1.bf16.msra.mxu1 %v4698_v45 }
 0x4c9   :  { %2645 = vmatprep.subr.bf16.mxu1 %v4700_v44 }
 0x4cc   :  { %2646 = vmatpush1.bf16.msra.mxu1 %v4704_v48 }
 0x4cd   :  { %2647 = vmatprep.subr.bf16.mxu1 %v4706_v14 }
 0x4d0   :  { %2648 = vmatpush1.bf16.msra.mxu1 %v4710_v58 }
 0x4d1   :  { %2649 = vmatprep.subr.bf16.mxu1 %v4712_v52 }
 0x4d4   :  { %2650 = vmatpush1.bf16.msra.mxu1 %v4716_v42 }
 0x4d5   :  { %2651 = vmatprep.subr.bf16.mxu1 %v4718_v47 }
 0x4d8   :  { %2652 = vmatpush1.bf16.msra.mxu1 %v4722_v22  ;;  %v4742_v22 = vld [vmem:[#allocation3 + $0x3e8] sm:$0xff] }
 0x4d9   :  { %2653 = vmatprep.subr.bf16.mxu1 %v4724_v36  ;;  %v4746_v36 = vld [vmem:[#allocation3 + $0x3e0] sm:$0xff] }
 0x4dc   :  { %2654 = vmatpush1.bf16.msra.mxu1 %v4728_v35  ;;  %v4748_v35 = vld [vmem:[#allocation3 + $0x3f8] sm:$0xff] }
 0x4dd   :  { %2655 = vmatprep.subr.bf16.mxu1 %v4730_v56  ;;  %v2622_v56 = vrot.slane %v4643_v11, %v4344_v60 }
 0x4e0   :  { %2656 = vmatpush1.bf16.msra.mxu1 %v4734_v33  ;;  %v2629_v33 = vpack.c.bf16 %v2622_v56, %v2622_v56 }
 0x4e1   :  { %2657 = vmatprep.subr.bf16.mxu1 %v4736_v32  ;;  %v4754_v32 = vld [vmem:[#allocation3 + $0x3f0] sm:$0xff] }
 0x4e4   :  { %2658 = vmatpush1.bf16.msra.mxu1 %v4740_v29 }
 0x4e5   :  { %2659 = vmatprep.subr.bf16.mxu1 %v4742_v22 }
 0x4e8   :  { %2660 = vmatpush1.bf16.msra.mxu1 %v4746_v36 }
 0x4e9   :  { %2661 = vmatprep.subr.bf16.mxu1 %v4748_v35 }
 0x4ec   :  { %2662 = vmatpush1.bf16.msra.mxu1 %v4754_v32 }
 0x4ed   :  { %2977 = vmatprep.subr.bf16.mxu1 %v4454_v31 }
 0x4ef   :  { %2664 = vmatmul.mubr.bf16.vlgmr.msra.gmra.mrb[68].mxu1 %v2629_v33 }
 0x4f0   :  { %2978 = vmatpush1.bf16.msra.mxu1 %v4458_v10 }
 0x4f1   :  { %2979 = vmatprep.subr.bf16.mxu1 %v4460_v13  ;;  %v4769_v13 = vld [vmem:[#allocation5 + $0x570] ss:$8 sps:$4 sm:$0xff]  }
 0x4f2   :  { %3495 = vmatprep.subr.bf16.mxu0 %v4769_v13 }
 0x4f4   :  { %2980 = vmatpush1.bf16.msra.mxu1 %v4464_v16  ;;  %v4771_v16 = vld [vmem:[#allocation5 + $0x4f0] ss:$8 sps:$4 sm:$0xff]  }
 0x4f5   :  { %2981 = vmatprep.subr.bf16.mxu1 %v4466_v19  ;;  %v4774_v19 = vld [vmem:[#allocation5 + $0x580] ss:$8 sps:$4 sm:$0xff]   ;;  %3496 = vmatpush3.bf16.msra.mxu0 %v4771_v16 }
 0x4f6   :  { %3497 = vmatprep.subr.bf16.mxu0 %v4774_v19 }
 0x4f8   :  { %2982 = vmatpush1.bf16.msra.mxu1 %v4470_v17  ;;  %v4778_v17 = vld [vmem:[#allocation5 + $0x500] ss:$8 sps:$4 sm:$0xff]  }
 0x4f9   :  { %2983 = vmatprep.subr.bf16.mxu1 %v4472_v30  ;;  %v4782_v30 = vld [vmem:[#allocation5 + $0x590] ss:$8 sps:$4 sm:$0xff]   ;;  %3498 = vmatpush3.bf16.msra.mxu0 %v4778_v17 }
 0x4fa   :  { %3499 = vmatprep.subr.bf16.mxu0 %v4782_v30 }
 0x4fc   :  { %2984 = vmatpush1.bf16.msra.mxu1 %v4476_v18  ;;  %v4786_v18 = vld [vmem:[#allocation5 + $0x510] ss:$8 sps:$4 sm:$0xff]  }
 0x4fd   :  { %2985 = vmatprep.subr.bf16.mxu1 %v4478_v20  ;;  %v4790_v20 = vld [vmem:[#allocation5 + $0x5a0] ss:$8 sps:$4 sm:$0xff]   ;;  %3500 = vmatpush3.bf16.msra.mxu0 %v4786_v18 }
 0x4fe   :  { %3501 = vmatprep.subr.bf16.mxu0 %v4790_v20 }
 0x500   :  { %2986 = vmatpush1.bf16.msra.mxu1 %v4482_v21  ;;  %v4794_v21 = vld [vmem:[#allocation5 + $0x520] ss:$8 sps:$4 sm:$0xff]  }
 0x501   :  { %2987 = vmatprep.subr.bf16.mxu1 %v4484_v50  ;;  %v4798_v50 = vld [vmem:[#allocation5 + $0x5b0] ss:$8 sps:$4 sm:$0xff]   ;;  %3502 = vmatpush3.bf16.msra.mxu0 %v4794_v21 }
 0x502   :  { %v2440_v33 = vpop.f32.mrb[56].mxu1  ;;  %3503 = vmatprep.subr.bf16.mxu0 %v4798_v50 }
 0x503   :  { %v2442_v56 = vpop.f32.mrb[57].mxu1 }
 0x504   :  { %v2444_v31 = vpop.f32.mrb[58].mxu1  ;;  %2988 = vmatpush1.bf16.msra.mxu1 %v4488_v23  ;;  %v4802_v23 = vld [vmem:[#allocation5 + $0x530] ss:$8 sps:$4 sm:$0xff]  }
 0x505   :  { %v2445_v10 = vpop.f32.mrb[59].mxu1  ;;  %2989 = vmatprep.subr.bf16.mxu1 %v4490_v24  ;;  %v4806_v24 = vld [vmem:[#allocation5 + $0x5c0] ss:$8 sps:$4 sm:$0xff]   ;;  %3504 = vmatpush3.bf16.msra.mxu0 %v4802_v23 }
 0x506   :  { %3505 = vmatprep.subr.bf16.mxu0 %v4806_v24 }
 0x508   :  { %2990 = vmatpush1.bf16.msra.mxu1 %v4494_v51  ;;  %v4810_v51 = vld [vmem:[#allocation5 + $0x540] ss:$8 sps:$4 sm:$0xff]  }
 0x509   :  { %2991 = vmatprep.subr.bf16.mxu1 %v4496_v55  ;;  %3506 = vmatpush3.bf16.msra.mxu0 %v4810_v51 }
 0x50c   :  { %2992 = vmatpush1.bf16.msra.mxu1 %v4500_v25  ;;  %v4826_v25 = vld [vmem:[#allocation5 + $0x5d0] ss:$8 sps:$4 sm:$0xff]  }
 0x50d   :  { %2993 = vmatprep.subr.bf16.mxu1 %v4502_v26  ;;  %3507 = vmatprep.subr.bf16.mxu0 %v4826_v25 }
 0x510   :  { %2994 = vmatpush1.bf16.msra.mxu1 %v4506_v0 }
 0x511   :  { %2995 = vmatprep.subr.bf16.mxu1 %v4508_v37  ;;  %v4828_v37 = vld [vmem:[#allocation5 + $0x550] ss:$8 sps:$4 sm:$0xff]  }
 0x512   :  { %3508 = vmatpush3.bf16.msra.mxu0 %v4828_v37 }
 0x514   :  { %2996 = vmatpush1.bf16.msra.mxu1 %v4512_v38 }
 0x515   :  { %2997 = vmatprep.subr.bf16.mxu1 %v4514_v39 }
 0x518   :  { %2998 = vmatpush1.bf16.msra.mxu1 %v4518_v40 }
 0x519   :  { %2999 = vmatprep.subr.bf16.mxu1 %v4520_v41 }
 0x51c   :  { %3000 = vmatpush1.bf16.msra.mxu1 %v4524_v1 }
 0x51d   :  { %3001 = vmatprep.subr.bf16.mxu1 %v4526_v2 }
 0x520   :  { %3002 = vmatpush1.bf16.msra.mxu1 %v4530_v8 }
 0x521   :  { %3003 = vmatprep.subr.bf16.mxu1 %v4532_v9  ;;  %v2837_v9 = vld [vmem:[#allocation2 + $0x24] ss:$8 sm:$0x3] }
 0x524   :  { %3004 = vmatpush1.bf16.msra.mxu1 %v4535_v12  ;;  %v2839_v12 = vld [vmem:[#allocation2 + $0x25] ss:$8 sm:$0x3] }
 0x525   :  { %3005 = vmatprep.subr.bf16.mxu1 %v4538_v7  ;;  %v2840_v11 = vmax.f32 %v2837_v9, %v2839_v12  ;;  %v5143_v9 = vld [vmem:[#allocation16_spill] sm:$0xff]  ;;  %v5144_v12 = vld [vmem:[#allocation17_spill] sm:$0xff] }
 0x528   :  { %3006 = vmatpush1.bf16.msra.mxu1 %v4544_v3  ;;  %v4832_v3 = vld [vmem:[#allocation5 + $0x5e0] ss:$8 sps:$4 sm:$0xff]  }
 0x529   :  { %3007 = vmatprep.subr.bf16.mxu1 %v4546_v34  ;;  %v4834_v34 = vld [vmem:[#allocation5 + $0x560] ss:$8 sps:$4 sm:$0xff]   ;;  %3509 = vmatprep.subr.bf16.mxu0 %v4832_v3 }
 0x52a   :  { %3510 = vmatpush3.bf16.msra.mxu0 %v4834_v34 }
 0x52b   :  { %2936 = vmatprep.subr.bf16.mxu0 %v4353_v27  ;;  %v5132_v27 = vld [vmem:[#allocation74_spill] sm:$0xff] }
 0x52c   :  { %3008 = vmatpush1.bf16.msra.mxu1 %v4554_v59 }
 0x52d   :  { %3161 = vmatprep.subr.bf16.mxu1 %v4658_v6  ;;  %v2881_v6 = vrot.slane %v2840_v11, %v4349_v62 }
 0x542   :  { %v2481_v55 = vpop.f32.mrb[60].mxu1 }
 0x543   :  { %v2482_v26 = vadd.f32 %v2481_v55, %v2440_v33  ;;  %v2483_v0 = vpop.f32.mrb[61].mxu1  ;;  %v2877_v33 = vrot.slane %v2840_v11, %v4344_v60  ;;  %v5145_v11 = vld [vmem:[#allocation18_spill] sm:$0xff] }
 0x544   :  { %v2484_v38 = vadd.f32 %v2483_v0, %v2442_v56  ;;  %v2485_v39 = vpop.f32.mrb[62].mxu1  ;;  %v2885_v56 = vpack.c.bf16 %v2881_v6, %v2881_v6  ;;  %v5147_v6 = vld [vmem:[#allocation20_spill] sm:$0xff] }
 0x545   :  { %v2486_v7 = vpop.f32.mrb[63].mxu1  ;;  %v2884_v31 = vpack.c.bf16 %v2877_v33, %v2877_v33  ;;  %v5148_v33 = vld [vmem:[#allocation21_spill] sm:$0xff] }
 0x546   :  { %3009 = vmatprep.mubr.bf16.mxu1 %v2885_v56  ;;  %v5149_v56 = vld [vmem:[#allocation22_spill] sm:$0xff] }
 0x547   :  { %3010 = vmatmul.mubr.bf16.vlgmr.msra.gmra.mrb[72].mxu1 %v2884_v31  ;;  %v5150_v31 = vld [vmem:[#allocation23_spill] sm:$0xff] }
 0x548   :  { %3162 = vmatpush1.bf16.msra.mxu1 %v4662_v63 }
 0x549   :  { %3163 = vmatprep.subr.bf16.mxu1 %v4664_v5 }
 0x54c   :  { %3164 = vmatpush1.bf16.msra.mxu1 %v4668_v4 }
 0x54d   :  { %3165 = vmatprep.subr.bf16.mxu1 %v4670_v54 }
 0x550   :  { %3166 = vmatpush1.bf16.msra.mxu1 %v4674_v53  ;;  %v3112_v53 = vld [vmem:[#allocation2 + $0x32] ss:$8 sm:$0x3] }
 0x551   :  { %3167 = vmatprep.subr.bf16.mxu1 %v4676_v61 }
 0x554   :  { %3168 = vmatpush1.bf16.msra.mxu1 %v4680_v43 }
 0x555   :  { %3169 = vmatprep.subr.bf16.mxu1 %v4682_v57  ;;  %v3114_v57 = vld [vmem:[#allocation2 + $0x33] ss:$8 sm:$0x3] }
 0x558   :  { %3170 = vmatpush1.bf16.msra.mxu1 %v4686_v15 }
 0x559   :  { %3171 = vmatprep.subr.bf16.mxu1 %v4688_v49 }
 0x55c   :  { %3172 = vmatpush1.bf16.msra.mxu1 %v4692_v28  ;;  %v5133_v28 = vld [vmem:[#allocation75_spill] sm:$0xff] }
 0x55d   :  { %3173 = vmatprep.subr.bf16.mxu1 %v4694_v46  ;;  %v5134_v46 = vld [vmem:[#allocation76_spill] sm:$0xff] }
 0x560   :  { %3174 = vmatpush1.bf16.msra.mxu1 %v4698_v45  ;;  %v5135_v45 = vld [vmem:[#allocation77_spill] sm:$0xff] }
 0x561   :  { %3175 = vmatprep.subr.bf16.mxu1 %v4700_v44  ;;  %v5136_v44 = vld [vmem:[#allocation78_spill] sm:$0xff] }
 0x564   :  { %3176 = vmatpush1.bf16.msra.mxu1 %v4704_v48  ;;  %v2887_v48 = vld [vmem:[#allocation2 + $0x26] ss:$8 sm:$0x3] }
 0x565   :  { %3177 = vmatprep.subr.bf16.mxu1 %v4706_v14  ;;  %v3430_v14 = vld [vmem:[%s4991_s2 + $0x3] ss:$8 sm:$0x3] }
 0x566   :  { %v4874_v49 = vrot.slane %v3430_v14, %v4349_v62 }
 0x568   :  { %3178 = vmatpush1.bf16.msra.mxu1 %v4710_v58  ;;  %v2889_v58 = vld [vmem:[#allocation2 + $0x27] ss:$8 sm:$0x3] }
 0x569   :  { %3179 = vmatprep.subr.bf16.mxu1 %v4712_v52  ;;  %v2890_v15 = vmax.f32 %v2887_v48, %v2889_v58  ;;  %v5156_v48 = vld [vmem:[#allocation29_spill] sm:$0xff]  ;;  %v5157_v58 = vld [vmem:[#allocation30_spill] sm:$0xff] }
 0x56b   :  { %v2931_v55 = vrot.slane %v2890_v15, %v4349_v62 }
 0x56c   :  { %3180 = vmatpush1.bf16.msra.mxu1 %v4716_v42  ;;  %v4870_v42 = vrot.slane %v3430_v14, %v4344_v60  ;;  %v5155_v14 = vld [vmem:[#allocation28_spill] sm:$0xff] }
 0x56d   :  { %3181 = vmatprep.subr.bf16.mxu1 %v4718_v47  ;;  %v5137_v47 = vld [vmem:[#allocation79_spill] sm:$0xff] }
 0x570   :  { %3182 = vmatpush1.bf16.msra.mxu1 %v5132_v27  ;;  %v5151_v27 = vld [vmem:[#allocation24_spill] sm:$0xff] }
 0x571   :  { %3183 = vmatprep.subr.bf16.mxu1 %v5133_v28  ;;  %v5152_v28 = vld [vmem:[#allocation25_spill] sm:$0xff] }
 0x574   :  { %3184 = vmatpush1.bf16.msra.mxu1 %v5134_v46  ;;  %v5153_v46 = vld [vmem:[#allocation26_spill] sm:$0xff] }
 0x575   :  { %3185 = vmatprep.subr.bf16.mxu1 %v5135_v45  ;;  %v5154_v45 = vld [vmem:[#allocation27_spill] sm:$0xff] }
 0x578   :  { %3186 = vmatpush1.bf16.msra.mxu1 %v5136_v44  ;;  %v5158_v44 = vld [vmem:[#allocation31_spill] sm:$0xff] }
 0x579   :  { %3187 = vmatprep.subr.bf16.mxu1 %v5137_v47  ;;  %v5159_v47 = vld [vmem:[#allocation32_spill] sm:$0xff] }
 0x57c   :  { %3188 = vmatpush1.bf16.msra.mxu1 %v4740_v29 }
 0x57d   :  { %3189 = vmatprep.subr.bf16.mxu1 %v4742_v22 }
 0x580   :  { %3190 = vmatpush1.bf16.msra.mxu1 %v4746_v36  ;;  %v5139_v36 = vld [vmem:[#allocation12_spill] sm:$0xff] }
 0x581   :  { %3191 = vmatprep.subr.bf16.mxu1 %v4748_v35  ;;  %v5142_v35 = vld [vmem:[#allocation15_spill] sm:$0xff] }
 0x582   :  { %v2572_v59 = vpop.f32.mrb[64].mxu1 }
 0x583   :  { %v2579_v40 = vadd.f32 %v2572_v59, %v2482_v26  ;;  %v2574_v41 = vpop.f32.mrb[65].mxu1  ;;  %v3115_v26 = vmax.f32 %v3112_v53, %v3114_v57  ;;  %v2935_v59 = vpack.c.bf16 %v2931_v55, %v2931_v55  ;;  %v3021_v53 = vld [vmem:[#allocation2 + $0x31] ss:$8 sm:$0x3]  ;;  %v5165_v57 = vld [vmem:[#allocation38_spill] sm:$0xff] }
 0x584   :  { %v2580_v1 = vadd.f32 %v2574_v41, %v2484_v38  ;;  %v2576_v2 = vpop.f32.mrb[66].mxu1  ;;  %3192 = vmatpush1.bf16.msra.mxu1 %v4754_v32  ;;  %v5146_v32 = vld [vmem:[#allocation19_spill] sm:$0xff] }
 0x585   :  { %v2577_v8 = vpop.f32.mrb[67].mxu1  ;;  %v3156_v39 = vrot.slane %v3115_v26, %v4349_v62  ;;  %v3152_v29 = vrot.slane %v3115_v26, %v4344_v60  ;;  %v5140_v2 = vld [vmem:[#allocation13_spill] sm:$0xff]  ;;  %v5166_v55 = vld [vmem:[#allocation39_spill] sm:$0xff] }
 0x586   :  { %v5141_v8 = vld [vmem:[#allocation14_spill] sm:$0xff] }
 0x587   :  { %v3159_v41 = vpack.c.bf16 %v3152_v29, %v3152_v29 }
 0x5c2   :  { %v2665_v52 = vpop.f32.mrb[68].mxu1 }
 0x5c3   :  { %v2672_v54 = vadd.f32 %v2665_v52, %v2579_v40  ;;  %v2667_v4 = vpop.f32.mrb[69].mxu1  ;;  %v3160_v40 = vpack.c.bf16 %v3156_v39, %v3156_v39  ;;  %v5160_v52 = vld [vmem:[#allocation33_spill] sm:$0xff] }
 0x5c4   :  { %v2673_v63 = vadd.f32 %v2667_v4, %v2580_v1  ;;  %v2669_v5 = vpop.f32.mrb[70].mxu1  ;;  %v5138_v1 = vld [vmem:[#allocation11_spill] sm:$0xff]  ;;  %v5168_v39 = vld [vmem:[#allocation41_spill] sm:$0xff] }
 0x5c5   :  { %v2685_v61 = vadd.f32 %v4870_v42, %v2672_v54  ;;  %v2670_v43 = vpop.f32.mrb[71].mxu1  ;;  %3193 = vmatprep.mubr.bf16.mxu1 %v3160_v40  ;;  %v5161_v54 = vld [vmem:[#allocation34_spill] sm:$0xff]  ;;  %v5162_v4 = vld [vmem:[#allocation35_spill] sm:$0xff]  ;;  %v5171_v40 = vld [vmem:[#allocation44_spill] sm:$0xff] }
 0x5c6   :  { %v2686_v10 = vadd.f32 %v4874_v49, %v2673_v63  ;;  %3194 = vmatmul.mubr.bf16.vlgmr.msra.gmra.mrb[76].mxu1 %v3159_v41  ;;  %v5163_v63 = vld [vmem:[#allocation36_spill] sm:$0xff]  ;;  %v5174_v41 = vld [vmem:[#allocation47_spill] sm:$0xff] }
 0x5c7   :  { %v2687_v0 = vmax.f32 %v2685_v61, 0.0  ;;  %v3019_v5 = vld [vmem:[#allocation2 + $0x30] ss:$8 sm:$0x3]  ;;  %v5164_v61 = vld [vmem:[#allocation37_spill] sm:$0xff] }
 0x5c8   :  { %v2688_v38 = vmax.f32 %v2686_v10, 0.0  ;;  %v3022_v43 = vmax.f32 %v3019_v5, %v3021_v53  ;;  %v2927_v10 = vrot.slane %v2890_v15, %v4344_v60  ;;  %v5173_v15 = vld [vmem:[#allocation46_spill] sm:$0xff]  ;;  %v5200_v5 = vld [vmem:[#allocation73_spill] sm:$0xff] }
 0x5c9   :  { %v2689_v22 = vpack.c.bf16 %v2687_v0, %v2687_v0  ;;  %v5167_v0 = vld [vmem:[#allocation40_spill] sm:$0xff] }
 0x5ca   :  { %v2690_v7 = vpack.c.bf16 %v2688_v38, %v2688_v38  ;;  %v3063_v26 = vrot.slane %v3022_v43, %v4349_v62  ;;  %v2934_v38 = vpack.c.bf16 %v2927_v10, %v2927_v10  ;;  %v5175_v62 = vld [vmem:[#allocation48_spill] sm:$0xff] }
 0x5cc   :  { %2819 = vmatprep.mubr.bf16.mxu0 %v2690_v7  ;;  %v3067_v29 = vpack.c.bf16 %v3063_v26, %v3063_v26  ;;  %v5169_v7 = vld [vmem:[#allocation42_spill] sm:$0xff] }
 0x5cd   :  { %2820 = vmatmul.mubr.bf16.vlgmr.msra.gmra.mrb[76].mxu0 %v2689_v22  ;;  %v5172_v22 = vld [vmem:[#allocation45_spill] sm:$0xff] }
 0x5ce   :  { %2937 = vmatpush1.bf16.msra.mxu0 %v5138_v1  ;;  %2968 = vmatprep.mubr.bf16.mxu0 %v2935_v59  ;;  %v5170_v59 = vld [vmem:[#allocation43_spill] sm:$0xff]  ;;  %v5176_v1 = vld [vmem:[#allocation49_spill] sm:$0xff] }
 0x5cf   :  { %2938 = vmatprep.subr.bf16.mxu0 %v5139_v36  ;;  %v5177_v36 = vld [vmem:[#allocation50_spill] sm:$0xff] }
 0x5d2   :  { %2939 = vmatpush1.bf16.msra.mxu0 %v5140_v2  ;;  %v5178_v2 = vld [vmem:[#allocation51_spill] sm:$0xff] }
 0x5d3   :  { %2940 = vmatprep.subr.bf16.mxu0 %v5141_v8  ;;  %v5179_v8 = vld [vmem:[#allocation52_spill] sm:$0xff] }
 0x5d6   :  { %2941 = vmatpush1.bf16.msra.mxu0 %v5142_v35  ;;  %v5180_v35 = vld [vmem:[#allocation53_spill] sm:$0xff] }
 0x5d7   :  { %2942 = vmatprep.subr.bf16.mxu0 %v5143_v9  ;;  %v5181_v9 = vld [vmem:[#allocation54_spill] sm:$0xff] }
 0x5da   :  { %2943 = vmatpush1.bf16.msra.mxu0 %v5144_v12  ;;  %v5182_v12 = vld [vmem:[#allocation55_spill] sm:$0xff] }
 0x5db   :  { %2944 = vmatprep.subr.bf16.mxu0 %v5145_v11  ;;  %v5183_v11 = vld [vmem:[#allocation56_spill] sm:$0xff] }
 0x5de   :  { %2945 = vmatpush1.bf16.msra.mxu0 %v5146_v32  ;;  %v5184_v32 = vld [vmem:[#allocation57_spill] sm:$0xff] }
 0x5df   :  { %2946 = vmatprep.subr.bf16.mxu0 %v5147_v6  ;;  %v5185_v6 = vld [vmem:[#allocation58_spill] sm:$0xff] }
 0x5e2   :  { %2947 = vmatpush1.bf16.msra.mxu0 %v5148_v33  ;;  %v5186_v33 = vld [vmem:[#allocation59_spill] sm:$0xff] }
 0x5e3   :  { %2948 = vmatprep.subr.bf16.mxu0 %v5149_v56  ;;  %v5187_v56 = vld [vmem:[#allocation60_spill] sm:$0xff] }
 0x5e6   :  { %2949 = vmatpush1.bf16.msra.mxu0 %v5150_v31  ;;  %v5188_v31 = vld [vmem:[#allocation61_spill] sm:$0xff] }
 0x5e7   :  { %2950 = vmatprep.subr.bf16.mxu0 %v5151_v27  ;;  %v5189_v27 = vld [vmem:[#allocation62_spill] sm:$0xff] }
 0x5ea   :  { %2951 = vmatpush1.bf16.msra.mxu0 %v5152_v28  ;;  %v5190_v28 = vld [vmem:[#allocation63_spill] sm:$0xff] }
 0x5eb   :  { %2952 = vmatprep.subr.bf16.mxu0 %v5153_v46  ;;  %v5191_v46 = vld [vmem:[#allocation64_spill] sm:$0xff] }
 0x5ee   :  { %2953 = vmatpush1.bf16.msra.mxu0 %v5154_v45  ;;  %v5192_v45 = vld [vmem:[#allocation65_spill] sm:$0xff] }
 0x5ef   :  { %2954 = vmatprep.subr.bf16.mxu0 %v5155_v14  ;;  %v5193_v14 = vld [vmem:[#allocation66_spill] sm:$0xff] }
 0x5f2   :  { %2955 = vmatpush1.bf16.msra.mxu0 %v5156_v48  ;;  %v5194_v48 = vld [vmem:[#allocation67_spill] sm:$0xff] }
 0x5f3   :  { %2956 = vmatprep.subr.bf16.mxu0 %v5157_v58  ;;  %v5195_v58 = vld [vmem:[#allocation68_spill] sm:$0xff] }
 0x5f6   :  { %2957 = vmatpush1.bf16.msra.mxu0 %v5158_v44  ;;  %v5196_v44 = vld [vmem:[#allocation69_spill] sm:$0xff] }
 0x5f7   :  { %2958 = vmatprep.subr.bf16.mxu0 %v5159_v47  ;;  %v5197_v47 = vld [vmem:[#allocation70_spill] sm:$0xff] }
 0x5fa   :  { %2959 = vmatpush1.bf16.msra.mxu0 %v5160_v52  ;;  %v3059_v52 = vrot.slane %v3022_v43, %v4344_v60 }
 0x5fb   :  { %2960 = vmatprep.subr.bf16.mxu0 %v5161_v54  ;;  %v5198_v54 = vld [vmem:[#allocation71_spill] sm:$0xff] }
 0x5fe   :  { %2961 = vmatpush1.bf16.msra.mxu0 %v5162_v4  ;;  %v5199_v4 = vld [vmem:[#allocation72_spill] sm:$0xff] }
 0x5ff   :  { %2962 = vmatprep.subr.bf16.mxu0 %v5163_v63  ;;  %v3066_v63 = vpack.c.bf16 %v3059_v52, %v3059_v52 }
 0x602   :  { %2963 = vmatpush1.bf16.msra.mxu0 %v5164_v61 }
 0x603   :  { %2964 = vmatprep.subr.bf16.mxu0 %v5165_v57 }
 0x606   :  { %2965 = vmatpush1.bf16.msra.mxu0 %v5166_v55 }
 0x607   :  { %2966 = vmatprep.subr.bf16.mxu0 %v5167_v0 }
 0x60a   :  { %2967 = vmatpush1.bf16.msra.mxu0 %v5168_v39 }
 0x60b   :  { %3068 = vmatprep.subr.bf16.mxu0 %v5169_v7 }
 0x60d   :  { %2969 = vmatmul.mubr.bf16.vlgmr.msra.gmra.mrb[80].mxu0 %v2934_v38 }
 0x60e   :  { %3069 = vmatpush1.bf16.msra.mxu0 %v5170_v59  ;;  %3100 = vmatprep.mubr.bf16.mxu0 %v3067_v29 }
 0x60f   :  { %3070 = vmatprep.subr.bf16.mxu0 %v5171_v40 }
 0x612   :  { %3071 = vmatpush1.bf16.msra.mxu0 %v5172_v22 }
 0x613   :  { %3072 = vmatprep.subr.bf16.mxu0 %v5173_v15 }
 0x616   :  { %3073 = vmatpush1.bf16.msra.mxu0 %v5174_v41 }
 0x617   :  { %3074 = vmatprep.subr.bf16.mxu0 %v5175_v62 }
 0x61a   :  { %3075 = vmatpush1.bf16.msra.mxu0 %v5176_v1  ;;  %v3011_v60 = vpop.f32.mrb[72].mxu1 }
 0x61b   :  { %3076 = vmatprep.subr.bf16.mxu0 %v5177_v36 }
 0x61e   :  { %3077 = vmatpush1.bf16.msra.mxu0 %v5178_v2 }
 0x61f   :  { %3078 = vmatprep.subr.bf16.mxu0 %v5179_v8 }
 0x622   :  { %3079 = vmatpush1.bf16.msra.mxu0 %v5180_v35  ;;  %v2305_v35 = vld [vmem:[%s4991_s2 + $0x5] ss:$0 sm:$0xff] }
 0x623   :  { %3080 = vmatprep.subr.bf16.mxu0 %v5181_v9 }
 0x626   :  { %3081 = vmatpush1.bf16.msra.mxu0 %v5182_v12 }
 0x627   :  { %3082 = vmatprep.subr.bf16.mxu0 %v5183_v11 }
 0x62a   :  { %3083 = vmatpush1.bf16.msra.mxu0 %v5184_v32 }
 0x62b   :  { %3084 = vmatprep.subr.bf16.mxu0 %v5185_v6 }
 0x62e   :  { %3085 = vmatpush1.bf16.msra.mxu0 %v5186_v33 }
 0x62f   :  { %3086 = vmatprep.subr.bf16.mxu0 %v5187_v56 }
 0x632   :  { %3087 = vmatpush1.bf16.msra.mxu0 %v5188_v31 }
 0x633   :  { %3088 = vmatprep.subr.bf16.mxu0 %v5189_v27 }
 0x636   :  { %3089 = vmatpush1.bf16.msra.mxu0 %v5190_v28 }
 0x637   :  { %3090 = vmatprep.subr.bf16.mxu0 %v5191_v46 }
 0x63a   :  { %3091 = vmatpush1.bf16.msra.mxu0 %v5192_v45 }
 0x63b   :  { %3092 = vmatprep.subr.bf16.mxu0 %v5193_v14 }
 0x63e   :  { %3093 = vmatpush1.bf16.msra.mxu0 %v5194_v48 }
 0x63f   :  { %3094 = vmatprep.subr.bf16.mxu0 %v5195_v58 }
 0x642   :  { %3095 = vmatpush1.bf16.msra.mxu0 %v5196_v44 }
 0x643   :  { %3096 = vmatprep.subr.bf16.mxu0 %v5197_v47 }
 0x646   :  { %3097 = vmatpush1.bf16.msra.mxu0 %v5198_v54 }
 0x647   :  { %3098 = vmatprep.subr.bf16.mxu0 %v5199_v4 }
 0x64a   :  { %3099 = vmatpush1.bf16.msra.mxu0 %v5200_v5 }
 0x64b   :  { %3517 = vmatprep.subr.bf16.mxu0 %v4769_v13  ;;  %v3013_v13 = vpop.f32.mrb[73].mxu1 }
 0x64d   :  { %3101 = vmatmul.mubr.bf16.vlgmr.msra.gmra.mrb[84].mxu0 %v3066_v63 }
 0x64e   :  { %3518 = vmatpush3.bf16.msra.mxu0 %v4771_v16  ;;  %v3015_v16 = vpop.f32.mrb[74].mxu1 }
 0x64f   :  { %3519 = vmatprep.subr.bf16.mxu0 %v4774_v19  ;;  %v3016_v19 = vpop.f32.mrb[75].mxu1 }
 0x652   :  { %3520 = vmatpush3.bf16.msra.mxu0 %v4778_v17 }
 0x653   :  { %3521 = vmatprep.subr.bf16.mxu0 %v4782_v30  ;;  %v2304_v30 = vld [vmem:[%s4991_s2 + $0x4] ss:$0 sm:$0xff] }
 0x656   :  { %3522 = vmatpush3.bf16.msra.mxu0 %v4786_v18 }
 0x657   :  { %3523 = vmatprep.subr.bf16.mxu0 %v4790_v20 }
 0x65a   :  { %3524 = vmatpush3.bf16.msra.mxu0 %v4794_v21 }
 0x65b   :  { %3525 = vmatprep.subr.bf16.mxu0 %v4798_v50 }
 0x65e   :  { %3526 = vmatpush3.bf16.msra.mxu0 %v4802_v23 }
 0x65f   :  { %3527 = vmatprep.subr.bf16.mxu0 %v4806_v24 }
 0x662   :  { %3528 = vmatpush3.bf16.msra.mxu0 %v4810_v51 }
 0x663   :  { %3529 = vmatprep.subr.bf16.mxu0 %v4826_v25 }
 0x666   :  { %3530 = vmatpush3.bf16.msra.mxu0 %v4828_v37  ;;  %v2306_v37 = vld [vmem:[%s4991_s2 + $0x6] ss:$0 sm:$0xff] }
 0x667   :  { %3531 = vmatprep.subr.bf16.mxu0 %v4832_v3 }
 0x66a   :  { %3532 = vmatpush3.bf16.msra.mxu0 %v4834_v34 }
 0x699   :  { %v3195_v50 = vpop.f32.mrb[76].mxu1 }
 0x69a   :  { %v3197_v24 = vpop.f32.mrb[77].mxu1 }
 0x69b   :  { %v3199_v25 = vpop.f32.mrb[78].mxu1 }
 0x69c   :  { %v3200_v3 = vpop.f32.mrb[79].mxu1 }
 0x6a0   :  { %v3511_v17 = vpop.f32.mrb[76].mxu0 }
 0x6a1   :  { %v3512_v18 = vpop.f32.mrb[77].mxu0 }
 0x6a2   :  { %v3513_v20 = vadd.f32 %v3512_v18, %v3511_v17  ;;  %v3514_v21 = vpop.f32.mrb[78].mxu0 }
 0x6a3   :  { %v3515_v23 = vpop.f32.mrb[79].mxu0 }
 0x6a4   :  { %v2822_v51 = vadd.f32 %v3513_v20, %v2304_v30 }
 0x6a6   :  { %v2827_v53 = vmax.f32 %v2822_v51, 0.0 }
 0x6a8   :  { %v2828_v34 = vmul.f32 %v2827_v53, %v2306_v37 }
 0x6aa   :  { %v2830_v61 = vsel %vm2829_vm9, %v2828_v34, 0.0 }
 0x6ab   :  { %2831 = vadd.xlane.f32.xlu0 %v2830_v61 }
 0x6e0   :  { %v2970_v43 = vpop.f32.mrb[80].mxu0 }
 0x6e1   :  { %v3012_v57 = vadd.f32 %v3011_v60, %v2970_v43  ;;  %v2972_v10 = vpop.f32.mrb[81].mxu0 }
 0x6e2   :  { %v3014_v55 = vadd.f32 %v3013_v13, %v2972_v10  ;;  %v2974_v26 = vpop.f32.mrb[82].mxu0 }
 0x6e3   :  { %v2975_v0 = vpop.f32.mrb[83].mxu0 }
 0x720   :  { %v3102_v38 = vpop.f32.mrb[84].mxu0 }
 0x721   :  { %v3109_v39 = vadd.f32 %v3102_v38, %v3012_v57  ;;  %v3104_v29 = vpop.f32.mrb[85].mxu0 }
 0x722   :  { %v3110_v7 = vadd.f32 %v3104_v29, %v3014_v55  ;;  %v3106_v59 = vpop.f32.mrb[86].mxu0 }
 0x723   :  { %v3202_v40 = vadd.f32 %v3195_v50, %v3109_v39  ;;  %v3107_v22 = vpop.f32.mrb[87].mxu0 }
 0x724   :  { %v3203_v15 = vadd.f32 %v3197_v24, %v3110_v7 }
 0x725   :  { %v3204_v41 = vadd.f32 %v3202_v40, %v4870_v42 }
 0x726   :  { %v3205_v62 = vadd.f32 %v3203_v15, %v4874_v49 }
 0x727   :  { %v3206_v1 = vmax.f32 %v3204_v41, 0.0 }
 0x728   :  { %v3207_v36 = vmax.f32 %v3205_v62, 0.0 }
 0x729   :  { %v3208_v8 = vpack.c.bf16 %v3206_v1, %v3206_v1 }
 0x72a   :  { %v3209_v2 = vpack.c.bf16 %v3207_v36, %v3207_v36 }
 0x72c   :  { %3242 = vmatprep.mubr.bf16.mxu0 %v3209_v2 }
 0x72d   :  { %3243 = vmatmul.mubr.bf16.vlgmr.msra.gmra.mrb[88].mxu0 %v3208_v8 }
 0x738   :  { %v2832_v9 = vpop.xlane.xlu0 %2831 }
 0x739   :  { %v2833_v12 = vadd.f32 %v2832_v9, %v2305_v35 }
 0x73b   :  { %2835 = vst.msk [vmem:[%s4993_s4] sm:$0x1] %vm2834_vm10, %v2833_v12 }
 0x800   :  { %v3533_v42 = vpop.f32.mrb[88].mxu0 }
 0x801   :  { %v3534_v49 = vpop.f32.mrb[89].mxu0 }
 0x802   :  { %v3535_v11 = vadd.f32 %v3534_v49, %v3533_v42  ;;  %v3536_v32 = vpop.f32.mrb[90].mxu0 }
 0x803   :  { %v3537_v6 = vpop.f32.mrb[91].mxu0 }
 0x804   :  { %v3245_v33 = vadd.f32 %v3535_v11, %v2304_v30 }
 0x806   :  { %v3250_v56 = vmax.f32 %v3245_v33, 0.0 }
 0x808   :  { %v3251_v31 = vmul.f32 %v3250_v56, %v2306_v37 }
 0x80a   :  { %v3252_v27 = vsel %vm2829_vm9, %v3251_v31, 0.0 }
 0x80b   :  { %3253 = vadd.xlane.f32.xlu0 %v3252_v27 }
 0x898   :  { %v3254_v28 = vpop.xlane.xlu0 %3253 }
 0x899   :  { %v3255_v46 = vadd.f32 %v3254_v28, %v2305_v35 }
 0x89b   :  { %3256 = vst.msk [vmem:[%s4993_s4 + $0x1] sm:$0x1] %vm2834_vm10, %v3255_v46 }
 0x89c   :  { %3261 = vsyncpa [#allocation6], 1 }
 0x89d   :  { %3262 = vsyncmov [#allocation4] }
 0x8a0   :  { %s3263_s1 = vpop.sfrf %3262 }
 0x8a1   :  { %p3447_p8 = scmp.ne.s32.totalorder %s3263_s1, 0 }
 0x8a3   :  { %3267 = shalt.err (%p3447_p8)  }

</bundles_post_ra>
